<compile_context>
chip_gen: v7x
topology: tpu7x:2x2x1
jax: 0.10.0
libtpu: 0.0.40
codegen_flags: <defaults>
</compile_context>

<pallas_src>
import math

import jax
import jax.numpy as jnp
from jax.experimental import pallas as pl
from jax.experimental.pallas import tpu as pltpu

# ----------------------------- hyper-parameters (small) -----------------------------
D_MODEL = 32
N_HEADS = 4
D_HEAD = D_MODEL // N_HEADS
D_FF = 64
N_LAYERS = 2
EPS = 1e-6
NEG_INF = -1e9
LANES = 128

assert D_MODEL % N_HEADS == 0

# ------------------- packed-slab row offsets (all static Python ints) ---------------
# Weight slab (rows, 128) f32; per layer:
#   [ per-head Wq_self | per-head Wk_self | per-head Wv_self | Wo_self |
#     per-head Wq_src  | per-head Wk_src  | per-head Wv_src  | Wo_src  | W_ff1 | W_ff2 ]
_WQ_SELF = 0
_WK_SELF = _WQ_SELF + N_HEADS * D_MODEL
_WV_SELF = _WK_SELF + N_HEADS * D_MODEL
_WO_SELF = _WV_SELF + N_HEADS * D_MODEL
_WQ_SRC = _WO_SELF + D_MODEL
_WK_SRC = _WQ_SRC + N_HEADS * D_MODEL
_WV_SRC = _WK_SRC + N_HEADS * D_MODEL
_WO_SRC = _WV_SRC + N_HEADS * D_MODEL
_W_FF1 = _WO_SRC + D_MODEL
_W_FF2 = _W_FF1 + D_MODEL
_W_LAYER_ROWS = _W_FF2 + D_FF

# Bias/LayerNorm slab (rows, 128) f32; per layer:
#   [ per-head bq/bk/bv (self), per-head bq/bk/bv (src), bo_self, bo_src,
#     b_ff1, b_ff2, ln1_g, ln1_b, ln2_g, ln2_b, ln3_g, ln3_b ]
# followed (after all layers) by [fin_g, fin_b] for the final LayerNorm.
_BQ_SELF = 0
_BK_SELF = _BQ_SELF + N_HEADS
_BV_SELF = _BK_SELF + N_HEADS
_BQ_SRC = _BV_SELF + N_HEADS
_BK_SRC = _BQ_SRC + N_HEADS
_BV_SRC = _BK_SRC + N_HEADS
_BO_SELF = _BV_SRC + N_HEADS
_BO_SRC = _BO_SELF + 1
_B_FF1 = _BO_SRC + 1
_B_FF2 = _B_FF1 + 1
_LN1_G = _B_FF2 + 1
_LN1_B = _LN1_G + 1
_LN2_G = _LN1_B + 1
_LN2_B = _LN2_G + 1
_LN3_G = _LN2_B + 1
_LN3_B = _LN3_G + 1
_P_LAYER_ROWS = _LN3_B + 1


# ------------------------------ fused Pallas kernel ---------------------------------
def _decoder_kernel(x_ref, mem_ref, src_bias_ref, tgt_bias_ref, w_ref, p_ref, o_ref):
    B = tgt_bias_ref.shape[0]
    St = tgt_bias_ref.shape[1]
    Ss = src_bias_ref.shape[2]
    D, H, Dh = D_MODEL, N_HEADS, D_HEAD
    scale = 1.0 / math.sqrt(Dh)

    x = x_ref[...].astype(jnp.float32)      # (B*St, D)
    mem = mem_ref[...].astype(jnp.float32)  # (B*Ss, D)
    src_bias = src_bias_ref[...]            # (B, 1,  Ss) additive (0 / -1e9)
    tgt_bias = tgt_bias_ref[...]            # (B, St, St) additive (0 / -1e9)

    def prow(r, n=D):
        # Static row slice of the bias/LN slab -> (1, n).
        return p_ref[r:r + 1, 0:n]

    def layer_norm(h, g, b):
        # torch: a_2 * (x - mean) / sqrt(std_unbiased**2 + eps) + b_2
        mean = jnp.mean(h, axis=-1, keepdims=True)
        diff = h - mean
        var_unb = jnp.sum(diff * diff, axis=-1, keepdims=True) / (h.shape[-1] - 1)
        return g * diff * jax.lax.rsqrt(var_unb + EPS) + b

    def attention(xq, xkv, bias, Sq, Sk, wq0, wk0, wv0, wo0, bq0, bk0, bv0, bo0):
        # Head split happens on the weight side (pre-split per-head blocks in
        # the slab): no activation lane slices.  One mask add + one softmax
        # shared across all heads (scores stacked along a leading dim).
        scores = []
        vals = []
        for h in range(H):
            wq = w_ref[wq0 + h * D: wq0 + (h + 1) * D, 0:Dh]
            wk = w_ref[wk0 + h * D: wk0 + (h + 1) * D, 0:Dh]
            wv = w_ref[wv0 + h * D: wv0 + (h + 1) * D, 0:Dh]
            q = (jnp.dot(xq, wq, preferred_element_type=jnp.float32)
                 + prow(bq0 + h, Dh)).reshape(B, Sq, Dh)
            k = (jnp.dot(xkv, wk, preferred_element_type=jnp.float32)
                 + prow(bk0 + h, Dh)).reshape(B, Sk, Dh)
            v = (jnp.dot(xkv, wv, preferred_element_type=jnp.float32)
                 + prow(bv0 + h, Dh)).reshape(B, Sk, Dh)
            scores.append(jnp.einsum('bqd,bkd->bqk', q, k,
                                     preferred_element_type=jnp.float32))
            vals.append(v)

        s = jnp.stack(scores, axis=0) * scale + bias[None, :, :, :]   # (H,B,Sq,Sk)
        s = s - jnp.max(s, axis=-1, keepdims=True)                    # one softmax
        p = jnp.exp(s)
        p = p / jnp.sum(p, axis=-1, keepdims=True)                    # exact divide

        out = jnp.zeros((B * Sq, D), jnp.float32)
        for h in range(H):
            ctx = jnp.einsum('bqk,bkd->bqd', p[h], vals[h],
                             preferred_element_type=jnp.float32)      # (B,Sq,Dh)
            wo = w_ref[wo0 + h * Dh: wo0 + (h + 1) * Dh, 0:D]
            # concat(heads) @ Wo  ==  sum_h ctx_h @ Wo[h*Dh:(h+1)*Dh, :]
            out = out + jnp.dot(ctx.reshape(B * Sq, Dh), wo,
                                preferred_element_type=jnp.float32)
        return out + prow(bo0, D)

    for l in range(N_LAYERS):
        wl = l * _W_LAYER_ROWS
        pb = l * _P_LAYER_ROWS

        # ---- sublayer 1: masked self-attention (pre-norm, residual) ----
        xn = layer_norm(x, prow(pb + _LN1_G), prow(pb + _LN1_B))
        x = x + attention(xn, xn, tgt_bias, St, St,
                          wl + _WQ_SELF, wl + _WK_SELF, wl + _WV_SELF, wl + _WO_SELF,
                          pb + _BQ_SELF, pb + _BK_SELF, pb + _BV_SELF, pb + _BO_SELF)

        # ---- sublayer 2: encoder-decoder attention ----
        xn = layer_norm(x, prow(pb + _LN2_G), prow(pb + _LN2_B))
        x = x + attention(xn, mem, src_bias, St, Ss,
                          wl + _WQ_SRC, wl + _WK_SRC, wl + _WV_SRC, wl + _WO_SRC,
                          pb + _BQ_SRC, pb + _BK_SRC, pb + _BV_SRC, pb + _BO_SRC)

        # ---- sublayer 3: position-wise FFN (dropout == identity in eval) ----
        xn = layer_norm(x, prow(pb + _LN3_G), prow(pb + _LN3_B))
        h1 = jnp.dot(xn, w_ref[wl + _W_FF1: wl + _W_FF1 + D_MODEL, 0:D_FF],
                     preferred_element_type=jnp.float32) + prow(pb + _B_FF1, D_FF)
        h1 = jnp.maximum(h1, 0.0)
        x = x + jnp.dot(h1, w_ref[wl + _W_FF2: wl + _W_FF2 + D_FF, 0:D_MODEL],
                        preferred_element_type=jnp.float32) + prow(pb + _B_FF2, D)

    # ---- final LayerNorm, single output write ----
    fg = N_LAYERS * _P_LAYER_ROWS
    o_ref[...] = layer_norm(x, prow(fg), prow(fg + 1)).astype(o_ref.dtype)


# ------------------------------ wrapper / glue ---------------------------------------
@jax.jit
def decoder_forward(w_slab, p_slab, x, memory, src_mask, tgt_mask):
    B, St, D = x.shape
    Ss = memory.shape[1]
    x2d = x.reshape(B * St, D)
    mem2d = memory.reshape(B * Ss, D)
    # Masks -> additive f32 bias (0 keep / -1e9 drop); built once outside kernel.
    src_bias = jnp.where(src_mask > 0, 0.0, NEG_INF).astype(jnp.float32)
    tgt_bias = jnp.where(tgt_mask > 0, 0.0, NEG_INF).astype(jnp.float32)

    vmem = pl.BlockSpec(memory_space=pltpu.MemorySpace.VMEM)
    out2d = pl.pallas_call(
        _decoder_kernel,
        out_shape=jax.ShapeDtypeStruct((B * St, D), x.dtype),
        in_specs=[vmem] * 6,
        out_specs=vmem,
    )(x2d, mem2d, src_bias, tgt_bias, w_slab, p_slab)
    return out2d.reshape(B, St, D)


# ------------------------------- parameter packing -----------------------------------
def _pad_lanes(a):
    return jnp.pad(a, ((0, 0), (0, LANES - a.shape[1])))


def _heads_rows(w):
    # (D, H*Dh) -> (H*D, Dh): block h = w[:, h*Dh:(h+1)*Dh]
    d_in = w.shape[0]
    return w.reshape(d_in, N_HEADS, D_HEAD).transpose(1, 0, 2).reshape(
        N_HEADS * d_in, D_HEAD)


def _heads_bias(b):
    # (H*Dh,) -> (H, Dh): row h = b[h*Dh:(h+1)*Dh]
    return b.reshape(N_HEADS, D_HEAD)


def _row(v):
    return v[None, :]


def pack_decoder_params(layers, fin_g, fin_b):
    wrows, prows = [], []
    for lp in layers:
        wrows += [
            _pad_lanes(_heads_rows(lp["wq_self"])),
            _pad_lanes(_heads_rows(lp["wk_self"])),
            _pad_lanes(_heads_rows(lp["wv_self"])),
            _pad_lanes(lp["wo_self"]),
            _pad_lanes(_heads_rows(lp["wq_src"])),
            _pad_lanes(_heads_rows(lp["wk_src"])),
            _pad_lanes(_heads_rows(lp["wv_src"])),
            _pad_lanes(lp["wo_src"]),
            _pad_lanes(lp["w_ff1"]),
            _pad_lanes(lp["w_ff2"]),
        ]
        prows += [
            _pad_lanes(_heads_bias(lp["bq_self"])),
            _pad_lanes(_heads_bias(lp["bk_self"])),
            _pad_lanes(_heads_bias(lp["bv_self"])),
            _pad_lanes(_heads_bias(lp["bq_src"])),
            _pad_lanes(_heads_bias(lp["bk_src"])),
            _pad_lanes(_heads_bias(lp["bv_src"])),
            _pad_lanes(_row(lp["bo_self"])),
            _pad_lanes(_row(lp["bo_src"])),
            _pad_lanes(_row(lp["b_ff1"])),
            _pad_lanes(_row(lp["b_ff2"])),
            _pad_lanes(_row(lp["ln1_g"])), _pad_lanes(_row(lp["ln1_b"])),
            _pad_lanes(_row(lp["ln2_g"])), _pad_lanes(_row(lp["ln2_b"])),
            _pad_lanes(_row(lp["ln3_g"])), _pad_lanes(_row(lp["ln3_b"])),
        ]
    prows += [_pad_lanes(_row(fin_g)), _pad_lanes(_row(fin_b))]
    w_slab = jnp.concatenate(wrows, axis=0)
    p_slab = jnp.concatenate(prows, axis=0)
    assert w_slab.shape == (N_LAYERS * _W_LAYER_ROWS, LANES)
    assert p_slab.shape == (N_LAYERS * _P_LAYER_ROWS + 2, LANES)
    return w_slab, p_slab


# ------------------------------- parameter init --------------------------------------
def init_decoder_params(key):
    def linear(k, d_in, d_out):
        k1, k2 = jax.random.split(k)
        w = jax.random.normal(k1, (d_in, d_out), jnp.float32) * 0.02
        b = jax.random.normal(k2, (d_out,), jnp.float32) * 0.02
        return w, b

    layers = []
    for lk in jax.random.split(key, N_LAYERS):
        ks = jax.random.split(lk, 10)
        lp = {}
        lp["wq_self"], lp["bq_self"] = linear(ks[0], D_MODEL, D_MODEL)
        lp["wk_self"], lp["bk_self"] = linear(ks[1], D_MODEL, D_MODEL)
        lp["wv_self"], lp["bv_self"] = linear(ks[2], D_MODEL, D_MODEL)
        lp["wo_self"], lp["bo_self"] = linear(ks[3], D_MODEL, D_MODEL)
        lp["wq_src"], lp["bq_src"] = linear(ks[4], D_MODEL, D_MODEL)
        lp["wk_src"], lp["bk_src"] = linear(ks[5], D_MODEL, D_MODEL)
        lp["wv_src"], lp["bv_src"] = linear(ks[6], D_MODEL, D_MODEL)
        lp["wo_src"], lp["bo_src"] = linear(ks[7], D_MODEL, D_MODEL)
        lp["w_ff1"], lp["b_ff1"] = linear(ks[8], D_MODEL, D_FF)
        lp["w_ff2"], lp["b_ff2"] = linear(ks[9], D_FF, D_MODEL)
        for i in (1, 2, 3):
            lp[f"ln{i}_g"] = jnp.ones((D_MODEL,), jnp.float32)
            lp[f"ln{i}_b"] = jnp.zeros((D_MODEL,), jnp.float32)
        layers.append(lp)
    fin_g = jnp.ones((D_MODEL,), jnp.float32)
    fin_b = jnp.zeros((D_MODEL,), jnp.float32)
    return layers, fin_g, fin_b


# ------------------------------ pure-JAX reference ------------------------------------
def decoder_reference(layers, fin_g, fin_b, x, memory, src_mask, tgt_mask):
    H, Dh, D = N_HEADS, D_HEAD, D_MODEL

    def layer_norm(h, g, b):
        mean = jnp.mean(h, axis=-1, keepdims=True)
        diff = h - mean
        var_unb = jnp.sum(diff * diff, axis=-1, keepdims=True) / (h.shape[-1] - 1)
        return g * diff / jnp.sqrt(var_unb + EPS) + b

    def mha(q_in, kv_in, mask, wq, bq, wk, bk, wv, bv, wo, bo):
        Bq, Sq, _ = q_in.shape
        Sk = kv_in.shape[1]
        q = (q_in @ wq + bq).reshape(Bq, Sq, H, Dh).transpose(0, 2, 1, 3)
        k = (kv_in @ wk + bk).reshape(Bq, Sk, H, Dh).transpose(0, 2, 1, 3)
        v = (kv_in @ wv + bv).reshape(Bq, Sk, H, Dh).transpose(0, 2, 1, 3)
        s = jnp.einsum('bhqd,bhkd->bhqk', q, k) / math.sqrt(Dh)
        s = jnp.where(mask[:, None, :, :] > 0, s, NEG_INF)
        p = jax.nn.softmax(s, axis=-1)
        ctx = jnp.einsum('bhqk,bhkd->bhqd', p, v)
        ctx = ctx.transpose(0, 2, 1, 3).reshape(Bq, Sq, D)
        return ctx @ wo + bo

    h = x
    for lp in layers:
        hn = layer_norm(h, lp["ln1_g"], lp["ln1_b"])
        h = h + mha(hn, hn, tgt_mask,
                    lp["wq_self"], lp["bq_self"], lp["wk_self"], lp["bk_self"],
                    lp["wv_self"], lp["bv_self"], lp["wo_self"], lp["bo_self"])
        hn = layer_norm(h, lp["ln2_g"], lp["ln2_b"])
        h = h + mha(hn, memory, src_mask,
                    lp["wq_src"], lp["bq_src"], lp["wk_src"], lp["bk_src"],
                    lp["wv_src"], lp["bv_src"], lp["wo_src"], lp["bo_src"])
        hn = layer_norm(h, lp["ln3_g"], lp["ln3_b"])
        h = h + jnp.maximum(hn @ lp["w_ff1"] + lp["b_ff1"], 0.0) @ lp["w_ff2"] + lp["b_ff2"]
    return layer_norm(h, fin_g, fin_b)


# ------------------------------------ main --------------------------------------------
if __name__ == "__main__":
    B, S_TGT, S_SRC = 2, 8, 8

    root = jax.random.PRNGKey(0)
    k_params, k_x, k_mem = jax.random.split(root, 3)

    layers, fin_g, fin_b = init_decoder_params(k_params)
    w_slab, p_slab = pack_decoder_params(layers, fin_g, fin_b)

    x = jax.random.normal(k_x, (B, S_TGT, D_MODEL), jnp.float32)
    memory = jax.random.normal(k_mem, (B, S_SRC, D_MODEL), jnp.float32)

    # src_mask: (B, 1, S_src) all visible; tgt_mask: (B, S_tgt, S_tgt) causal.
    src_mask = jnp.ones((B, 1, S_SRC), jnp.float32)
    tgt_mask = jnp.broadcast_to(
        jnp.tril(jnp.ones((S_TGT, S_TGT), jnp.float32))[None, :, :],
        (B, S_TGT, S_TGT))

    out = decoder_forward(w_slab, p_slab, x, memory, src_mask, tgt_mask)
    out = jax.block_until_ready(out)

    assert out.shape == (B, S_TGT, D_MODEL)
    assert bool(jnp.all(jnp.isfinite(out)))

    with jax.default_matmul_precision("highest"):
        ref = decoder_reference(layers, fin_g, fin_b, x, memory, src_mask, tgt_mask)
    max_err = float(jnp.max(jnp.abs(out - ref)))
    assert max_err < 2e-2, f"kernel vs reference mismatch: {max_err}"

    print("KERNEL_OK")
</pallas_src>

<mosaic_0001>
module attributes {stable_mosaic.version = 11 : i64} {
  func.func @_decoder_kernel(%arg0: memref<16x32xf32, #tpu.memory_space<vmem>>, %arg1: memref<16x32xf32, #tpu.memory_space<vmem>>, %arg2: memref<2x1x8xf32, #tpu.memory_space<vmem>>, %arg3: memref<2x8x8xf32, #tpu.memory_space<vmem>>, %arg4: memref<1856x128xf32, #tpu.memory_space<vmem>>, %arg5: memref<70x128xf32, #tpu.memory_space<vmem>>, %arg6: memref<16x32xf32, #tpu.memory_space<vmem>>) attributes {dimension_semantics = [], scalar_prefetch = 0 : i64, scratch_operands = 0 : i64, tpu.core_type = #tpu.core_type<tc>} {
    %c0 = arith.constant 0 : index
    %c0_0 = arith.constant 0 : index
    %0 = vector.load %arg0[%c0, %c0_0] : memref<16x32xf32, #tpu.memory_space<vmem>>, vector<16x32xf32>
    %c0_1 = arith.constant 0 : index
    %c0_2 = arith.constant 0 : index
    %1 = vector.load %arg1[%c0_1, %c0_2] : memref<16x32xf32, #tpu.memory_space<vmem>>, vector<16x32xf32>
    %c0_3 = arith.constant 0 : index
    %c0_4 = arith.constant 0 : index
    %c0_5 = arith.constant 0 : index
    %2 = vector.load %arg2[%c0_3, %c0_4, %c0_5] : memref<2x1x8xf32, #tpu.memory_space<vmem>>, vector<2x1x8xf32>
    %c0_6 = arith.constant 0 : index
    %c0_7 = arith.constant 0 : index
    %c0_8 = arith.constant 0 : index
    %3 = vector.load %arg3[%c0_6, %c0_7, %c0_8] : memref<2x8x8xf32, #tpu.memory_space<vmem>>, vector<2x8x8xf32>
    %c28 = arith.constant 28 : index
    %c0_9 = arith.constant 0 : index
    %4 = vector.load %arg5[%c28, %c0_9] : memref<70x128xf32, #tpu.memory_space<vmem>>, vector<1x32xf32>
    %c29 = arith.constant 29 : index
    %c0_10 = arith.constant 0 : index
    %5 = vector.load %arg5[%c29, %c0_10] : memref<70x128xf32, #tpu.memory_space<vmem>>, vector<1x32xf32>
    %cst = arith.constant dense<0.000000e+00> : vector<16xf32>
    %6 = vector.multi_reduction <add>, %0, %cst [1] : vector<16x32xf32> to vector<16xf32>
    %7 = vector.shape_cast %6 : vector<16xf32> to vector<16x1xf32>
    %cst_11 = arith.constant 3.200000e+01 : f32
    %8 = vector.broadcast %cst_11 : f32 to vector<16x1xf32>
    %9 = arith.divf %7, %8 : vector<16x1xf32>
    %10 = vector.broadcast %9 : vector<16x1xf32> to vector<16x32xf32>
    %11 = arith.subf %0, %10 : vector<16x32xf32>
    %12 = arith.mulf %11, %11 : vector<16x32xf32>
    %cst_12 = arith.constant dense<0.000000e+00> : vector<16xf32>
    %13 = vector.multi_reduction <add>, %12, %cst_12 [1] : vector<16x32xf32> to vector<16xf32>
    %14 = vector.shape_cast %13 : vector<16xf32> to vector<16x1xf32>
    %cst_13 = arith.constant 3.100000e+01 : f32
    %15 = vector.broadcast %cst_13 : f32 to vector<16x1xf32>
    %16 = arith.divf %14, %15 : vector<16x1xf32>
    %17 = vector.broadcast %4 : vector<1x32xf32> to vector<16x32xf32>
    %18 = arith.mulf %17, %11 : vector<16x32xf32>
    %cst_14 = arith.constant 9.99999997E-7 : f32
    %19 = vector.broadcast %cst_14 : f32 to vector<16x1xf32>
    %20 = arith.addf %16, %19 : vector<16x1xf32>
    %21 = math.rsqrt %20 : vector<16x1xf32>
    %22 = vector.broadcast %21 : vector<16x1xf32> to vector<16x32xf32>
    %23 = arith.mulf %18, %22 : vector<16x32xf32>
    %24 = vector.broadcast %5 : vector<1x32xf32> to vector<16x32xf32>
    %25 = arith.addf %23, %24 : vector<16x32xf32>
    %c0_15 = arith.constant 0 : index
    %c0_16 = arith.constant 0 : index
    %26 = vector.load %arg4[%c0_15, %c0_16] : memref<1856x128xf32, #tpu.memory_space<vmem>>, vector<32x8xf32>
    %c128 = arith.constant 128 : index
    %c0_17 = arith.constant 0 : index
    %27 = vector.load %arg4[%c128, %c0_17] : memref<1856x128xf32, #tpu.memory_space<vmem>>, vector<32x8xf32>
    %c256 = arith.constant 256 : index
    %c0_18 = arith.constant 0 : index
    %28 = vector.load %arg4[%c256, %c0_18] : memref<1856x128xf32, #tpu.memory_space<vmem>>, vector<32x8xf32>
    %cst_19 = arith.constant dense<0.000000e+00> : vector<16x8xf32>
    %29 = tpu.matmul %25, %26, %cst_19 {dimension_numbers = #tpu.dot_dimension_numbers<[1], [0], [0], [1], [0, 0, 1, 1], [], []>} : vector<16x32xf32>, vector<32x8xf32>, vector<16x8xf32> -> vector<16x8xf32>
    %c0_20 = arith.constant 0 : index
    %c0_21 = arith.constant 0 : index
    %30 = vector.load %arg5[%c0_20, %c0_21] : memref<70x128xf32, #tpu.memory_space<vmem>>, vector<1x8xf32>
    %31 = vector.broadcast %30 : vector<1x8xf32> to vector<16x8xf32>
    %32 = arith.addf %29, %31 : vector<16x8xf32>
    %33 = vector.shape_cast %32 : vector<16x8xf32> to vector<2x8x8xf32>
    %cst_22 = arith.constant dense<0.000000e+00> : vector<16x8xf32>
    %34 = tpu.matmul %25, %27, %cst_22 {dimension_numbers = #tpu.dot_dimension_numbers<[1], [0], [0], [1], [0, 0, 1, 1], [], []>} : vector<16x32xf32>, vector<32x8xf32>, vector<16x8xf32> -> vector<16x8xf32>
    %c4 = arith.constant 4 : index
    %c0_23 = arith.constant 0 : index
    %35 = vector.load %arg5[%c4, %c0_23] : memref<70x128xf32, #tpu.memory_space<vmem>>, vector<1x8xf32>
    %36 = vector.broadcast %35 : vector<1x8xf32> to vector<16x8xf32>
    %37 = arith.addf %34, %36 : vector<16x8xf32>
    %38 = vector.shape_cast %37 : vector<16x8xf32> to vector<2x8x8xf32>
    %cst_24 = arith.constant dense<0.000000e+00> : vector<16x8xf32>
    %39 = tpu.matmul %25, %28, %cst_24 {dimension_numbers = #tpu.dot_dimension_numbers<[1], [0], [0], [1], [0, 0, 1, 1], [], []>} : vector<16x32xf32>, vector<32x8xf32>, vector<16x8xf32> -> vector<16x8xf32>
    %c8 = arith.constant 8 : index
    %c0_25 = arith.constant 0 : index
    %40 = vector.load %arg5[%c8, %c0_25] : memref<70x128xf32, #tpu.memory_space<vmem>>, vector<1x8xf32>
    %41 = vector.broadcast %40 : vector<1x8xf32> to vector<16x8xf32>
    %42 = arith.addf %39, %41 : vector<16x8xf32>
    %43 = vector.shape_cast %42 : vector<16x8xf32> to vector<2x8x8xf32>
    "tpu.trace_start"() <{level = 10 : i32, message = "bqd,bkd->bqk"}> : () -> ()
    %cst_26 = arith.constant dense<0.000000e+00> : vector<2x8x8xf32>
    %44 = tpu.matmul %33, %38, %cst_26 {dimension_numbers = #tpu.dot_dimension_numbers<[2], [2], [1], [1], [0, 0, 0, 1, 1, 1], [0], [0]>} : vector<2x8x8xf32>, vector<2x8x8xf32>, vector<2x8x8xf32> -> vector<2x8x8xf32>
    "tpu.trace_stop"() : () -> ()
    %c32 = arith.constant 32 : index
    %c0_27 = arith.constant 0 : index
    %45 = vector.load %arg4[%c32, %c0_27] : memref<1856x128xf32, #tpu.memory_space<vmem>>, vector<32x8xf32>
    %c160 = arith.constant 160 : index
    %c0_28 = arith.constant 0 : index
    %46 = vector.load %arg4[%c160, %c0_28] : memref<1856x128xf32, #tpu.memory_space<vmem>>, vector<32x8xf32>
    %c288 = arith.constant 288 : index
    %c0_29 = arith.constant 0 : index
    %47 = vector.load %arg4[%c288, %c0_29] : memref<1856x128xf32, #tpu.memory_space<vmem>>, vector<32x8xf32>
    %cst_30 = arith.constant dense<0.000000e+00> : vector<16x8xf32>
    %48 = tpu.matmul %25, %45, %cst_30 {dimension_numbers = #tpu.dot_dimension_numbers<[1], [0], [0], [1], [0, 0, 1, 1], [], []>} : vector<16x32xf32>, vector<32x8xf32>, vector<16x8xf32> -> vector<16x8xf32>
    %c1 = arith.constant 1 : index
    %c0_31 = arith.constant 0 : index
    %49 = vector.load %arg5[%c1, %c0_31] : memref<70x128xf32, #tpu.memory_space<vmem>>, vector<1x8xf32>
    %50 = vector.broadcast %49 : vector<1x8xf32> to vector<16x8xf32>
    %51 = arith.addf %48, %50 : vector<16x8xf32>
    %52 = vector.shape_cast %51 : vector<16x8xf32> to vector<2x8x8xf32>
    %cst_32 = arith.constant dense<0.000000e+00> : vector<16x8xf32>
    %53 = tpu.matmul %25, %46, %cst_32 {dimension_numbers = #tpu.dot_dimension_numbers<[1], [0], [0], [1], [0, 0, 1, 1], [], []>} : vector<16x32xf32>, vector<32x8xf32>, vector<16x8xf32> -> vector<16x8xf32>
    %c5 = arith.constant 5 : index
    %c0_33 = arith.constant 0 : index
    %54 = vector.load %arg5[%c5, %c0_33] : memref<70x128xf32, #tpu.memory_space<vmem>>, vector<1x8xf32>
    %55 = vector.broadcast %54 : vector<1x8xf32> to vector<16x8xf32>
    %56 = arith.addf %53, %55 : vector<16x8xf32>
    %57 = vector.shape_cast %56 : vector<16x8xf32> to vector<2x8x8xf32>
    %cst_34 = arith.constant dense<0.000000e+00> : vector<16x8xf32>
    %58 = tpu.matmul %25, %47, %cst_34 {dimension_numbers = #tpu.dot_dimension_numbers<[1], [0], [0], [1], [0, 0, 1, 1], [], []>} : vector<16x32xf32>, vector<32x8xf32>, vector<16x8xf32> -> vector<16x8xf32>
    %c9 = arith.constant 9 : index
    %c0_35 = arith.constant 0 : index
    %59 = vector.load %arg5[%c9, %c0_35] : memref<70x128xf32, #tpu.memory_space<vmem>>, vector<1x8xf32>
    %60 = vector.broadcast %59 : vector<1x8xf32> to vector<16x8xf32>
    %61 = arith.addf %58, %60 : vector<16x8xf32>
    %62 = vector.shape_cast %61 : vector<16x8xf32> to vector<2x8x8xf32>
    "tpu.trace_start"() <{level = 10 : i32, message = "bqd,bkd->bqk"}> : () -> ()
    %cst_36 = arith.constant dense<0.000000e+00> : vector<2x8x8xf32>
    %63 = tpu.matmul %52, %57, %cst_36 {dimension_numbers = #tpu.dot_dimension_numbers<[2], [2], [1], [1], [0, 0, 0, 1, 1, 1], [0], [0]>} : vector<2x8x8xf32>, vector<2x8x8xf32>, vector<2x8x8xf32> -> vector<2x8x8xf32>
    "tpu.trace_stop"() : () -> ()
    %c64 = arith.constant 64 : index
    %c0_37 = arith.constant 0 : index
    %64 = vector.load %arg4[%c64, %c0_37] : memref<1856x128xf32, #tpu.memory_space<vmem>>, vector<32x8xf32>
    %c192 = arith.constant 192 : index
    %c0_38 = arith.constant 0 : index
    %65 = vector.load %arg4[%c192, %c0_38] : memref<1856x128xf32, #tpu.memory_space<vmem>>, vector<32x8xf32>
    %c320 = arith.constant 320 : index
    %c0_39 = arith.constant 0 : index
    %66 = vector.load %arg4[%c320, %c0_39] : memref<1856x128xf32, #tpu.memory_space<vmem>>, vector<32x8xf32>
    %cst_40 = arith.constant dense<0.000000e+00> : vector<16x8xf32>
    %67 = tpu.matmul %25, %64, %cst_40 {dimension_numbers = #tpu.dot_dimension_numbers<[1], [0], [0], [1], [0, 0, 1, 1], [], []>} : vector<16x32xf32>, vector<32x8xf32>, vector<16x8xf32> -> vector<16x8xf32>
    %c2 = arith.constant 2 : index
    %c0_41 = arith.constant 0 : index
    %68 = vector.load %arg5[%c2, %c0_41] : memref<70x128xf32, #tpu.memory_space<vmem>>, vector<1x8xf32>
    %69 = vector.broadcast %68 : vector<1x8xf32> to vector<16x8xf32>
    %70 = arith.addf %67, %69 : vector<16x8xf32>
    %71 = vector.shape_cast %70 : vector<16x8xf32> to vector<2x8x8xf32>
    %cst_42 = arith.constant dense<0.000000e+00> : vector<16x8xf32>
    %72 = tpu.matmul %25, %65, %cst_42 {dimension_numbers = #tpu.dot_dimension_numbers<[1], [0], [0], [1], [0, 0, 1, 1], [], []>} : vector<16x32xf32>, vector<32x8xf32>, vector<16x8xf32> -> vector<16x8xf32>
    %c6 = arith.constant 6 : index
    %c0_43 = arith.constant 0 : index
    %73 = vector.load %arg5[%c6, %c0_43] : memref<70x128xf32, #tpu.memory_space<vmem>>, vector<1x8xf32>
    %74 = vector.broadcast %73 : vector<1x8xf32> to vector<16x8xf32>
    %75 = arith.addf %72, %74 : vector<16x8xf32>
    %76 = vector.shape_cast %75 : vector<16x8xf32> to vector<2x8x8xf32>
    %cst_44 = arith.constant dense<0.000000e+00> : vector<16x8xf32>
    %77 = tpu.matmul %25, %66, %cst_44 {dimension_numbers = #tpu.dot_dimension_numbers<[1], [0], [0], [1], [0, 0, 1, 1], [], []>} : vector<16x32xf32>, vector<32x8xf32>, vector<16x8xf32> -> vector<16x8xf32>
    %c10 = arith.constant 10 : index
    %c0_45 = arith.constant 0 : index
    %78 = vector.load %arg5[%c10, %c0_45] : memref<70x128xf32, #tpu.memory_space<vmem>>, vector<1x8xf32>
    %79 = vector.broadcast %78 : vector<1x8xf32> to vector<16x8xf32>
    %80 = arith.addf %77, %79 : vector<16x8xf32>
    %81 = vector.shape_cast %80 : vector<16x8xf32> to vector<2x8x8xf32>
    "tpu.trace_start"() <{level = 10 : i32, message = "bqd,bkd->bqk"}> : () -> ()
    %cst_46 = arith.constant dense<0.000000e+00> : vector<2x8x8xf32>
    %82 = tpu.matmul %71, %76, %cst_46 {dimension_numbers = #tpu.dot_dimension_numbers<[2], [2], [1], [1], [0, 0, 0, 1, 1, 1], [0], [0]>} : vector<2x8x8xf32>, vector<2x8x8xf32>, vector<2x8x8xf32> -> vector<2x8x8xf32>
    "tpu.trace_stop"() : () -> ()
    %c96 = arith.constant 96 : index
    %c0_47 = arith.constant 0 : index
    %83 = vector.load %arg4[%c96, %c0_47] : memref<1856x128xf32, #tpu.memory_space<vmem>>, vector<32x8xf32>
    %c224 = arith.constant 224 : index
    %c0_48 = arith.constant 0 : index
    %84 = vector.load %arg4[%c224, %c0_48] : memref<1856x128xf32, #tpu.memory_space<vmem>>, vector<32x8xf32>
    %c352 = arith.constant 352 : index
    %c0_49 = arith.constant 0 : index
    %85 = vector.load %arg4[%c352, %c0_49] : memref<1856x128xf32, #tpu.memory_space<vmem>>, vector<32x8xf32>
    %cst_50 = arith.constant dense<0.000000e+00> : vector<16x8xf32>
    %86 = tpu.matmul %25, %83, %cst_50 {dimension_numbers = #tpu.dot_dimension_numbers<[1], [0], [0], [1], [0, 0, 1, 1], [], []>} : vector<16x32xf32>, vector<32x8xf32>, vector<16x8xf32> -> vector<16x8xf32>
    %c3 = arith.constant 3 : index
    %c0_51 = arith.constant 0 : index
    %87 = vector.load %arg5[%c3, %c0_51] : memref<70x128xf32, #tpu.memory_space<vmem>>, vector<1x8xf32>
    %88 = vector.broadcast %87 : vector<1x8xf32> to vector<16x8xf32>
    %89 = arith.addf %86, %88 : vector<16x8xf32>
    %90 = vector.shape_cast %89 : vector<16x8xf32> to vector<2x8x8xf32>
    %cst_52 = arith.constant dense<0.000000e+00> : vector<16x8xf32>
    %91 = tpu.matmul %25, %84, %cst_52 {dimension_numbers = #tpu.dot_dimension_numbers<[1], [0], [0], [1], [0, 0, 1, 1], [], []>} : vector<16x32xf32>, vector<32x8xf32>, vector<16x8xf32> -> vector<16x8xf32>
    %c7 = arith.constant 7 : index
    %c0_53 = arith.constant 0 : index
    %92 = vector.load %arg5[%c7, %c0_53] : memref<70x128xf32, #tpu.memory_space<vmem>>, vector<1x8xf32>
    %93 = vector.broadcast %92 : vector<1x8xf32> to vector<16x8xf32>
    %94 = arith.addf %91, %93 : vector<16x8xf32>
    %95 = vector.shape_cast %94 : vector<16x8xf32> to vector<2x8x8xf32>
    %cst_54 = arith.constant dense<0.000000e+00> : vector<16x8xf32>
    %96 = tpu.matmul %25, %85, %cst_54 {dimension_numbers = #tpu.dot_dimension_numbers<[1], [0], [0], [1], [0, 0, 1, 1], [], []>} : vector<16x32xf32>, vector<32x8xf32>, vector<16x8xf32> -> vector<16x8xf32>
    %c11 = arith.constant 11 : index
    %c0_55 = arith.constant 0 : index
    %97 = vector.load %arg5[%c11, %c0_55] : memref<70x128xf32, #tpu.memory_space<vmem>>, vector<1x8xf32>
    %98 = vector.broadcast %97 : vector<1x8xf32> to vector<16x8xf32>
    %99 = arith.addf %96, %98 : vector<16x8xf32>
    %100 = vector.shape_cast %99 : vector<16x8xf32> to vector<2x8x8xf32>
    "tpu.trace_start"() <{level = 10 : i32, message = "bqd,bkd->bqk"}> : () -> ()
    %cst_56 = arith.constant dense<0.000000e+00> : vector<2x8x8xf32>
    %101 = tpu.matmul %90, %95, %cst_56 {dimension_numbers = #tpu.dot_dimension_numbers<[2], [2], [1], [1], [0, 0, 0, 1, 1, 1], [0], [0]>} : vector<2x8x8xf32>, vector<2x8x8xf32>, vector<2x8x8xf32> -> vector<2x8x8xf32>
    "tpu.trace_stop"() : () -> ()
    %102 = vector.shape_cast %44 : vector<2x8x8xf32> to vector<1x2x8x8xf32>
    %103 = vector.shape_cast %63 : vector<2x8x8xf32> to vector<1x2x8x8xf32>
    %104 = vector.shape_cast %82 : vector<2x8x8xf32> to vector<1x2x8x8xf32>
    %105 = vector.shape_cast %101 : vector<2x8x8xf32> to vector<1x2x8x8xf32>
    %106 = tpu.concatenate %102, %103, %104, %105 in 0 : vector<1x2x8x8xf32>, vector<1x2x8x8xf32>, vector<1x2x8x8xf32>, vector<1x2x8x8xf32> -> vector<4x2x8x8xf32>
    %cst_57 = arith.constant 0.353553385 : f32
    %107 = vector.broadcast %cst_57 : f32 to vector<4x2x8x8xf32>
    %108 = arith.mulf %106, %107 : vector<4x2x8x8xf32>
    %109 = vector.shape_cast %3 : vector<2x8x8xf32> to vector<1x2x8x8xf32>
    %110 = vector.broadcast %109 : vector<1x2x8x8xf32> to vector<4x2x8x8xf32>
    %111 = arith.addf %108, %110 : vector<4x2x8x8xf32>
    %cst_58 = arith.constant dense<0xFF800000> : vector<4x2x8xf32>
    %112 = vector.multi_reduction <maximumf>, %111, %cst_58 [3] : vector<4x2x8x8xf32> to vector<4x2x8xf32>
    %113 = vector.shape_cast %112 : vector<4x2x8xf32> to vector<4x2x8x1xf32>
    %114 = vector.broadcast %113 : vector<4x2x8x1xf32> to vector<4x2x8x8xf32>
    %115 = arith.subf %111, %114 : vector<4x2x8x8xf32>
    %116 = math.exp %115 : vector<4x2x8x8xf32>
    %cst_59 = arith.constant dense<0.000000e+00> : vector<4x2x8xf32>
    %117 = vector.multi_reduction <add>, %116, %cst_59 [3] : vector<4x2x8x8xf32> to vector<4x2x8xf32>
    %118 = vector.shape_cast %117 : vector<4x2x8xf32> to vector<4x2x8x1xf32>
    %119 = vector.broadcast %118 : vector<4x2x8x1xf32> to vector<4x2x8x8xf32>
    %120 = arith.divf %116, %119 : vector<4x2x8x8xf32>
    %cst_60 = arith.constant 0.000000e+00 : f32
    %121 = vector.broadcast %cst_60 : f32 to vector<16x32xf32>
    %122 = vector.extract_strided_slice %120 {offsets = [0, 0, 0, 0], sizes = [1, 2, 8, 8], strides = [1, 1, 1, 1]} : vector<4x2x8x8xf32> to vector<1x2x8x8xf32>
    %123 = vector.shape_cast %122 : vector<1x2x8x8xf32> to vector<2x8x8xf32>
    "tpu.trace_start"() <{level = 10 : i32, message = "bqk,bkd->bqd"}> : () -> ()
    %cst_61 = arith.constant dense<0.000000e+00> : vector<2x8x8xf32>
    %124 = tpu.matmul %123, %43, %cst_61 {dimension_numbers = #tpu.dot_dimension_numbers<[2], [1], [1], [2], [0, 0, 0, 1, 1, 2], [0], [0]>} : vector<2x8x8xf32>, vector<2x8x8xf32>, vector<2x8x8xf32> -> vector<2x8x8xf32>
    "tpu.trace_stop"() : () -> ()
    %c384 = arith.constant 384 : index
    %c0_62 = arith.constant 0 : index
    %125 = vector.load %arg4[%c384, %c0_62] : memref<1856x128xf32, #tpu.memory_space<vmem>>, vector<8x32xf32>
    %126 = vector.shape_cast %124 : vector<2x8x8xf32> to vector<16x8xf32>
    %cst_63 = arith.constant dense<0.000000e+00> : vector<16x32xf32>
    %127 = tpu.matmul %126, %125, %cst_63 {dimension_numbers = #tpu.dot_dimension_numbers<[1], [0], [0], [1], [0, 0, 1, 1], [], []>} : vector<16x8xf32>, vector<8x32xf32>, vector<16x32xf32> -> vector<16x32xf32>
    %128 = arith.addf %121, %127 : vector<16x32xf32>
    %129 = vector.extract_strided_slice %120 {offsets = [1, 0, 0, 0], sizes = [1, 2, 8, 8], strides = [1, 1, 1, 1]} : vector<4x2x8x8xf32> to vector<1x2x8x8xf32>
    %130 = vector.shape_cast %129 : vector<1x2x8x8xf32> to vector<2x8x8xf32>
    "tpu.trace_start"() <{level = 10 : i32, message = "bqk,bkd->bqd"}> : () -> ()
    %cst_64 = arith.constant dense<0.000000e+00> : vector<2x8x8xf32>
    %131 = tpu.matmul %130, %62, %cst_64 {dimension_numbers = #tpu.dot_dimension_numbers<[2], [1], [1], [2], [0, 0, 0, 1, 1, 2], [0], [0]>} : vector<2x8x8xf32>, vector<2x8x8xf32>, vector<2x8x8xf32> -> vector<2x8x8xf32>
    "tpu.trace_stop"() : () -> ()
    %c392 = arith.constant 392 : index
    %c0_65 = arith.constant 0 : index
    %132 = vector.load %arg4[%c392, %c0_65] : memref<1856x128xf32, #tpu.memory_space<vmem>>, vector<8x32xf32>
    %133 = vector.shape_cast %131 : vector<2x8x8xf32> to vector<16x8xf32>
    %cst_66 = arith.constant dense<0.000000e+00> : vector<16x32xf32>
    %134 = tpu.matmul %133, %132, %cst_66 {dimension_numbers = #tpu.dot_dimension_numbers<[1], [0], [0], [1], [0, 0, 1, 1], [], []>} : vector<16x8xf32>, vector<8x32xf32>, vector<16x32xf32> -> vector<16x32xf32>
    %135 = arith.addf %128, %134 : vector<16x32xf32>
    %136 = vector.extract_strided_slice %120 {offsets = [2, 0, 0, 0], sizes = [1, 2, 8, 8], strides = [1, 1, 1, 1]} : vector<4x2x8x8xf32> to vector<1x2x8x8xf32>
    %137 = vector.shape_cast %136 : vector<1x2x8x8xf32> to vector<2x8x8xf32>
    "tpu.trace_start"() <{level = 10 : i32, message = "bqk,bkd->bqd"}> : () -> ()
    %cst_67 = arith.constant dense<0.000000e+00> : vector<2x8x8xf32>
    %138 = tpu.matmul %137, %81, %cst_67 {dimension_numbers = #tpu.dot_dimension_numbers<[2], [1], [1], [2], [0, 0, 0, 1, 1, 2], [0], [0]>} : vector<2x8x8xf32>, vector<2x8x8xf32>, vector<2x8x8xf32> -> vector<2x8x8xf32>
    "tpu.trace_stop"() : () -> ()
    %c400 = arith.constant 400 : index
    %c0_68 = arith.constant 0 : index
    %139 = vector.load %arg4[%c400, %c0_68] : memref<1856x128xf32, #tpu.memory_space<vmem>>, vector<8x32xf32>
    %140 = vector.shape_cast %138 : vector<2x8x8xf32> to vector<16x8xf32>
    %cst_69 = arith.constant dense<0.000000e+00> : vector<16x32xf32>
    %141 = tpu.matmul %140, %139, %cst_69 {dimension_numbers = #tpu.dot_dimension_numbers<[1], [0], [0], [1], [0, 0, 1, 1], [], []>} : vector<16x8xf32>, vector<8x32xf32>, vector<16x32xf32> -> vector<16x32xf32>
    %142 = arith.addf %135, %141 : vector<16x32xf32>
    %143 = vector.extract_strided_slice %120 {offsets = [3, 0, 0, 0], sizes = [1, 2, 8, 8], strides = [1, 1, 1, 1]} : vector<4x2x8x8xf32> to vector<1x2x8x8xf32>
    %144 = vector.shape_cast %143 : vector<1x2x8x8xf32> to vector<2x8x8xf32>
    "tpu.trace_start"() <{level = 10 : i32, message = "bqk,bkd->bqd"}> : () -> ()
    %cst_70 = arith.constant dense<0.000000e+00> : vector<2x8x8xf32>
    %145 = tpu.matmul %144, %100, %cst_70 {dimension_numbers = #tpu.dot_dimension_numbers<[2], [1], [1], [2], [0, 0, 0, 1, 1, 2], [0], [0]>} : vector<2x8x8xf32>, vector<2x8x8xf32>, vector<2x8x8xf32> -> vector<2x8x8xf32>
    "tpu.trace_stop"() : () -> ()
    %c408 = arith.constant 408 : index
    %c0_71 = arith.constant 0 : index
    %146 = vector.load %arg4[%c408, %c0_71] : memref<1856x128xf32, #tpu.memory_space<vmem>>, vector<8x32xf32>
    %147 = vector.shape_cast %145 : vector<2x8x8xf32> to vector<16x8xf32>
    %cst_72 = arith.constant dense<0.000000e+00> : vector<16x32xf32>
    %148 = tpu.matmul %147, %146, %cst_72 {dimension_numbers = #tpu.dot_dimension_numbers<[1], [0], [0], [1], [0, 0, 1, 1], [], []>} : vector<16x8xf32>, vector<8x32xf32>, vector<16x32xf32> -> vector<16x32xf32>
    %149 = arith.addf %142, %148 : vector<16x32xf32>
    %c24 = arith.constant 24 : index
    %c0_73 = arith.constant 0 : index
    %150 = vector.load %arg5[%c24, %c0_73] : memref<70x128xf32, #tpu.memory_space<vmem>>, vector<1x32xf32>
    %151 = vector.broadcast %150 : vector<1x32xf32> to vector<16x32xf32>
    %152 = arith.addf %149, %151 : vector<16x32xf32>
    %153 = arith.addf %0, %152 : vector<16x32xf32>
    %c30 = arith.constant 30 : index
    %c0_74 = arith.constant 0 : index
    %154 = vector.load %arg5[%c30, %c0_74] : memref<70x128xf32, #tpu.memory_space<vmem>>, vector<1x32xf32>
    %c31 = arith.constant 31 : index
    %c0_75 = arith.constant 0 : index
    %155 = vector.load %arg5[%c31, %c0_75] : memref<70x128xf32, #tpu.memory_space<vmem>>, vector<1x32xf32>
    %cst_76 = arith.constant dense<0.000000e+00> : vector<16xf32>
    %156 = vector.multi_reduction <add>, %153, %cst_76 [1] : vector<16x32xf32> to vector<16xf32>
    %157 = vector.shape_cast %156 : vector<16xf32> to vector<16x1xf32>
    %cst_77 = arith.constant 3.200000e+01 : f32
    %158 = vector.broadcast %cst_77 : f32 to vector<16x1xf32>
    %159 = arith.divf %157, %158 : vector<16x1xf32>
    %160 = vector.broadcast %159 : vector<16x1xf32> to vector<16x32xf32>
    %161 = arith.subf %153, %160 : vector<16x32xf32>
    %162 = arith.mulf %161, %161 : vector<16x32xf32>
    %cst_78 = arith.constant dense<0.000000e+00> : vector<16xf32>
    %163 = vector.multi_reduction <add>, %162, %cst_78 [1] : vector<16x32xf32> to vector<16xf32>
    %164 = vector.shape_cast %163 : vector<16xf32> to vector<16x1xf32>
    %cst_79 = arith.constant 3.100000e+01 : f32
    %165 = vector.broadcast %cst_79 : f32 to vector<16x1xf32>
    %166 = arith.divf %164, %165 : vector<16x1xf32>
    %167 = vector.broadcast %154 : vector<1x32xf32> to vector<16x32xf32>
    %168 = arith.mulf %167, %161 : vector<16x32xf32>
    %cst_80 = arith.constant 9.99999997E-7 : f32
    %169 = vector.broadcast %cst_80 : f32 to vector<16x1xf32>
    %170 = arith.addf %166, %169 : vector<16x1xf32>
    %171 = math.rsqrt %170 : vector<16x1xf32>
    %172 = vector.broadcast %171 : vector<16x1xf32> to vector<16x32xf32>
    %173 = arith.mulf %168, %172 : vector<16x32xf32>
    %174 = vector.broadcast %155 : vector<1x32xf32> to vector<16x32xf32>
    %175 = arith.addf %173, %174 : vector<16x32xf32>
    %c416 = arith.constant 416 : index
    %c0_81 = arith.constant 0 : index
    %176 = vector.load %arg4[%c416, %c0_81] : memref<1856x128xf32, #tpu.memory_space<vmem>>, vector<32x8xf32>
    %c544 = arith.constant 544 : index
    %c0_82 = arith.constant 0 : index
    %177 = vector.load %arg4[%c544, %c0_82] : memref<1856x128xf32, #tpu.memory_space<vmem>>, vector<32x8xf32>
    %c672 = arith.constant 672 : index
    %c0_83 = arith.constant 0 : index
    %178 = vector.load %arg4[%c672, %c0_83] : memref<1856x128xf32, #tpu.memory_space<vmem>>, vector<32x8xf32>
    %cst_84 = arith.constant dense<0.000000e+00> : vector<16x8xf32>
    %179 = tpu.matmul %175, %176, %cst_84 {dimension_numbers = #tpu.dot_dimension_numbers<[1], [0], [0], [1], [0, 0, 1, 1], [], []>} : vector<16x32xf32>, vector<32x8xf32>, vector<16x8xf32> -> vector<16x8xf32>
    %c12 = arith.constant 12 : index
    %c0_85 = arith.constant 0 : index
    %180 = vector.load %arg5[%c12, %c0_85] : memref<70x128xf32, #tpu.memory_space<vmem>>, vector<1x8xf32>
    %181 = vector.broadcast %180 : vector<1x8xf32> to vector<16x8xf32>
    %182 = arith.addf %179, %181 : vector<16x8xf32>
    %183 = vector.shape_cast %182 : vector<16x8xf32> to vector<2x8x8xf32>
    %cst_86 = arith.constant dense<0.000000e+00> : vector<16x8xf32>
    %184 = tpu.matmul %1, %177, %cst_86 {dimension_numbers = #tpu.dot_dimension_numbers<[1], [0], [0], [1], [0, 0, 1, 1], [], []>} : vector<16x32xf32>, vector<32x8xf32>, vector<16x8xf32> -> vector<16x8xf32>
    %c16 = arith.constant 16 : index
    %c0_87 = arith.constant 0 : index
    %185 = vector.load %arg5[%c16, %c0_87] : memref<70x128xf32, #tpu.memory_space<vmem>>, vector<1x8xf32>
    %186 = vector.broadcast %185 : vector<1x8xf32> to vector<16x8xf32>
    %187 = arith.addf %184, %186 : vector<16x8xf32>
    %188 = vector.shape_cast %187 : vector<16x8xf32> to vector<2x8x8xf32>
    %cst_88 = arith.constant dense<0.000000e+00> : vector<16x8xf32>
    %189 = tpu.matmul %1, %178, %cst_88 {dimension_numbers = #tpu.dot_dimension_numbers<[1], [0], [0], [1], [0, 0, 1, 1], [], []>} : vector<16x32xf32>, vector<32x8xf32>, vector<16x8xf32> -> vector<16x8xf32>
    %c20 = arith.constant 20 : index
    %c0_89 = arith.constant 0 : index
    %190 = vector.load %arg5[%c20, %c0_89] : memref<70x128xf32, #tpu.memory_space<vmem>>, vector<1x8xf32>
    %191 = vector.broadcast %190 : vector<1x8xf32> to vector<16x8xf32>
    %192 = arith.addf %189, %191 : vector<16x8xf32>
    %193 = vector.shape_cast %192 : vector<16x8xf32> to vector<2x8x8xf32>
    "tpu.trace_start"() <{level = 10 : i32, message = "bqd,bkd->bqk"}> : () -> ()
    %cst_90 = arith.constant dense<0.000000e+00> : vector<2x8x8xf32>
    %194 = tpu.matmul %183, %188, %cst_90 {dimension_numbers = #tpu.dot_dimension_numbers<[2], [2], [1], [1], [0, 0, 0, 1, 1, 1], [0], [0]>} : vector<2x8x8xf32>, vector<2x8x8xf32>, vector<2x8x8xf32> -> vector<2x8x8xf32>
    "tpu.trace_stop"() : () -> ()
    %c448 = arith.constant 448 : index
    %c0_91 = arith.constant 0 : index
    %195 = vector.load %arg4[%c448, %c0_91] : memref<1856x128xf32, #tpu.memory_space<vmem>>, vector<32x8xf32>
    %c576 = arith.constant 576 : index
    %c0_92 = arith.constant 0 : index
    %196 = vector.load %arg4[%c576, %c0_92] : memref<1856x128xf32, #tpu.memory_space<vmem>>, vector<32x8xf32>
    %c704 = arith.constant 704 : index
    %c0_93 = arith.constant 0 : index
    %197 = vector.load %arg4[%c704, %c0_93] : memref<1856x128xf32, #tpu.memory_space<vmem>>, vector<32x8xf32>
    %cst_94 = arith.constant dense<0.000000e+00> : vector<16x8xf32>
    %198 = tpu.matmul %175, %195, %cst_94 {dimension_numbers = #tpu.dot_dimension_numbers<[1], [0], [0], [1], [0, 0, 1, 1], [], []>} : vector<16x32xf32>, vector<32x8xf32>, vector<16x8xf32> -> vector<16x8xf32>
    %c13 = arith.constant 13 : index
    %c0_95 = arith.constant 0 : index
    %199 = vector.load %arg5[%c13, %c0_95] : memref<70x128xf32, #tpu.memory_space<vmem>>, vector<1x8xf32>
    %200 = vector.broadcast %199 : vector<1x8xf32> to vector<16x8xf32>
    %201 = arith.addf %198, %200 : vector<16x8xf32>
    %202 = vector.shape_cast %201 : vector<16x8xf32> to vector<2x8x8xf32>
    %cst_96 = arith.constant dense<0.000000e+00> : vector<16x8xf32>
    %203 = tpu.matmul %1, %196, %cst_96 {dimension_numbers = #tpu.dot_dimension_numbers<[1], [0], [0], [1], [0, 0, 1, 1], [], []>} : vector<16x32xf32>, vector<32x8xf32>, vector<16x8xf32> -> vector<16x8xf32>
    %c17 = arith.constant 17 : index
    %c0_97 = arith.constant 0 : index
    %204 = vector.load %arg5[%c17, %c0_97] : memref<70x128xf32, #tpu.memory_space<vmem>>, vector<1x8xf32>
    %205 = vector.broadcast %204 : vector<1x8xf32> to vector<16x8xf32>
    %206 = arith.addf %203, %205 : vector<16x8xf32>
    %207 = vector.shape_cast %206 : vector<16x8xf32> to vector<2x8x8xf32>
    %cst_98 = arith.constant dense<0.000000e+00> : vector<16x8xf32>
    %208 = tpu.matmul %1, %197, %cst_98 {dimension_numbers = #tpu.dot_dimension_numbers<[1], [0], [0], [1], [0, 0, 1, 1], [], []>} : vector<16x32xf32>, vector<32x8xf32>, vector<16x8xf32> -> vector<16x8xf32>
    %c21 = arith.constant 21 : index
    %c0_99 = arith.constant 0 : index
    %209 = vector.load %arg5[%c21, %c0_99] : memref<70x128xf32, #tpu.memory_space<vmem>>, vector<1x8xf32>
    %210 = vector.broadcast %209 : vector<1x8xf32> to vector<16x8xf32>
    %211 = arith.addf %208, %210 : vector<16x8xf32>
    %212 = vector.shape_cast %211 : vector<16x8xf32> to vector<2x8x8xf32>
    "tpu.trace_start"() <{level = 10 : i32, message = "bqd,bkd->bqk"}> : () -> ()
    %cst_100 = arith.constant dense<0.000000e+00> : vector<2x8x8xf32>
    %213 = tpu.matmul %202, %207, %cst_100 {dimension_numbers = #tpu.dot_dimension_numbers<[2], [2], [1], [1], [0, 0, 0, 1, 1, 1], [0], [0]>} : vector<2x8x8xf32>, vector<2x8x8xf32>, vector<2x8x8xf32> -> vector<2x8x8xf32>
    "tpu.trace_stop"() : () -> ()
    %c480 = arith.constant 480 : index
    %c0_101 = arith.constant 0 : index
    %214 = vector.load %arg4[%c480, %c0_101] : memref<1856x128xf32, #tpu.memory_space<vmem>>, vector<32x8xf32>
    %c608 = arith.constant 608 : index
    %c0_102 = arith.constant 0 : index
    %215 = vector.load %arg4[%c608, %c0_102] : memref<1856x128xf32, #tpu.memory_space<vmem>>, vector<32x8xf32>
    %c736 = arith.constant 736 : index
    %c0_103 = arith.constant 0 : index
    %216 = vector.load %arg4[%c736, %c0_103] : memref<1856x128xf32, #tpu.memory_space<vmem>>, vector<32x8xf32>
    %cst_104 = arith.constant dense<0.000000e+00> : vector<16x8xf32>
    %217 = tpu.matmul %175, %214, %cst_104 {dimension_numbers = #tpu.dot_dimension_numbers<[1], [0], [0], [1], [0, 0, 1, 1], [], []>} : vector<16x32xf32>, vector<32x8xf32>, vector<16x8xf32> -> vector<16x8xf32>
    %c14 = arith.constant 14 : index
    %c0_105 = arith.constant 0 : index
    %218 = vector.load %arg5[%c14, %c0_105] : memref<70x128xf32, #tpu.memory_space<vmem>>, vector<1x8xf32>
    %219 = vector.broadcast %218 : vector<1x8xf32> to vector<16x8xf32>
    %220 = arith.addf %217, %219 : vector<16x8xf32>
    %221 = vector.shape_cast %220 : vector<16x8xf32> to vector<2x8x8xf32>
    %cst_106 = arith.constant dense<0.000000e+00> : vector<16x8xf32>
    %222 = tpu.matmul %1, %215, %cst_106 {dimension_numbers = #tpu.dot_dimension_numbers<[1], [0], [0], [1], [0, 0, 1, 1], [], []>} : vector<16x32xf32>, vector<32x8xf32>, vector<16x8xf32> -> vector<16x8xf32>
    %c18 = arith.constant 18 : index
    %c0_107 = arith.constant 0 : index
    %223 = vector.load %arg5[%c18, %c0_107] : memref<70x128xf32, #tpu.memory_space<vmem>>, vector<1x8xf32>
    %224 = vector.broadcast %223 : vector<1x8xf32> to vector<16x8xf32>
    %225 = arith.addf %222, %224 : vector<16x8xf32>
    %226 = vector.shape_cast %225 : vector<16x8xf32> to vector<2x8x8xf32>
    %cst_108 = arith.constant dense<0.000000e+00> : vector<16x8xf32>
    %227 = tpu.matmul %1, %216, %cst_108 {dimension_numbers = #tpu.dot_dimension_numbers<[1], [0], [0], [1], [0, 0, 1, 1], [], []>} : vector<16x32xf32>, vector<32x8xf32>, vector<16x8xf32> -> vector<16x8xf32>
    %c22 = arith.constant 22 : index
    %c0_109 = arith.constant 0 : index
    %228 = vector.load %arg5[%c22, %c0_109] : memref<70x128xf32, #tpu.memory_space<vmem>>, vector<1x8xf32>
    %229 = vector.broadcast %228 : vector<1x8xf32> to vector<16x8xf32>
    %230 = arith.addf %227, %229 : vector<16x8xf32>
    %231 = vector.shape_cast %230 : vector<16x8xf32> to vector<2x8x8xf32>
    "tpu.trace_start"() <{level = 10 : i32, message = "bqd,bkd->bqk"}> : () -> ()
    %cst_110 = arith.constant dense<0.000000e+00> : vector<2x8x8xf32>
    %232 = tpu.matmul %221, %226, %cst_110 {dimension_numbers = #tpu.dot_dimension_numbers<[2], [2], [1], [1], [0, 0, 0, 1, 1, 1], [0], [0]>} : vector<2x8x8xf32>, vector<2x8x8xf32>, vector<2x8x8xf32> -> vector<2x8x8xf32>
    "tpu.trace_stop"() : () -> ()
    %c512 = arith.constant 512 : index
    %c0_111 = arith.constant 0 : index
    %233 = vector.load %arg4[%c512, %c0_111] : memref<1856x128xf32, #tpu.memory_space<vmem>>, vector<32x8xf32>
    %c640 = arith.constant 640 : index
    %c0_112 = arith.constant 0 : index
    %234 = vector.load %arg4[%c640, %c0_112] : memref<1856x128xf32, #tpu.memory_space<vmem>>, vector<32x8xf32>
    %c768 = arith.constant 768 : index
    %c0_113 = arith.constant 0 : index
    %235 = vector.load %arg4[%c768, %c0_113] : memref<1856x128xf32, #tpu.memory_space<vmem>>, vector<32x8xf32>
    %cst_114 = arith.constant dense<0.000000e+00> : vector<16x8xf32>
    %236 = tpu.matmul %175, %233, %cst_114 {dimension_numbers = #tpu.dot_dimension_numbers<[1], [0], [0], [1], [0, 0, 1, 1], [], []>} : vector<16x32xf32>, vector<32x8xf32>, vector<16x8xf32> -> vector<16x8xf32>
    %c15 = arith.constant 15 : index
    %c0_115 = arith.constant 0 : index
    %237 = vector.load %arg5[%c15, %c0_115] : memref<70x128xf32, #tpu.memory_space<vmem>>, vector<1x8xf32>
    %238 = vector.broadcast %237 : vector<1x8xf32> to vector<16x8xf32>
    %239 = arith.addf %236, %238 : vector<16x8xf32>
    %240 = vector.shape_cast %239 : vector<16x8xf32> to vector<2x8x8xf32>
    %cst_116 = arith.constant dense<0.000000e+00> : vector<16x8xf32>
    %241 = tpu.matmul %1, %234, %cst_116 {dimension_numbers = #tpu.dot_dimension_numbers<[1], [0], [0], [1], [0, 0, 1, 1], [], []>} : vector<16x32xf32>, vector<32x8xf32>, vector<16x8xf32> -> vector<16x8xf32>
    %c19 = arith.constant 19 : index
    %c0_117 = arith.constant 0 : index
    %242 = vector.load %arg5[%c19, %c0_117] : memref<70x128xf32, #tpu.memory_space<vmem>>, vector<1x8xf32>
    %243 = vector.broadcast %242 : vector<1x8xf32> to vector<16x8xf32>
    %244 = arith.addf %241, %243 : vector<16x8xf32>
    %245 = vector.shape_cast %244 : vector<16x8xf32> to vector<2x8x8xf32>
    %cst_118 = arith.constant dense<0.000000e+00> : vector<16x8xf32>
    %246 = tpu.matmul %1, %235, %cst_118 {dimension_numbers = #tpu.dot_dimension_numbers<[1], [0], [0], [1], [0, 0, 1, 1], [], []>} : vector<16x32xf32>, vector<32x8xf32>, vector<16x8xf32> -> vector<16x8xf32>
    %c23 = arith.constant 23 : index
    %c0_119 = arith.constant 0 : index
    %247 = vector.load %arg5[%c23, %c0_119] : memref<70x128xf32, #tpu.memory_space<vmem>>, vector<1x8xf32>
    %248 = vector.broadcast %247 : vector<1x8xf32> to vector<16x8xf32>
    %249 = arith.addf %246, %248 : vector<16x8xf32>
    %250 = vector.shape_cast %249 : vector<16x8xf32> to vector<2x8x8xf32>
    "tpu.trace_start"() <{level = 10 : i32, message = "bqd,bkd->bqk"}> : () -> ()
    %cst_120 = arith.constant dense<0.000000e+00> : vector<2x8x8xf32>
    %251 = tpu.matmul %240, %245, %cst_120 {dimension_numbers = #tpu.dot_dimension_numbers<[2], [2], [1], [1], [0, 0, 0, 1, 1, 1], [0], [0]>} : vector<2x8x8xf32>, vector<2x8x8xf32>, vector<2x8x8xf32> -> vector<2x8x8xf32>
    "tpu.trace_stop"() : () -> ()
    %252 = vector.shape_cast %194 : vector<2x8x8xf32> to vector<1x2x8x8xf32>
    %253 = vector.shape_cast %213 : vector<2x8x8xf32> to vector<1x2x8x8xf32>
    %254 = vector.shape_cast %232 : vector<2x8x8xf32> to vector<1x2x8x8xf32>
    %255 = vector.shape_cast %251 : vector<2x8x8xf32> to vector<1x2x8x8xf32>
    %256 = tpu.concatenate %252, %253, %254, %255 in 0 : vector<1x2x8x8xf32>, vector<1x2x8x8xf32>, vector<1x2x8x8xf32>, vector<1x2x8x8xf32> -> vector<4x2x8x8xf32>
    %cst_121 = arith.constant 0.353553385 : f32
    %257 = vector.broadcast %cst_121 : f32 to vector<4x2x8x8xf32>
    %258 = arith.mulf %256, %257 : vector<4x2x8x8xf32>
    %259 = vector.shape_cast %2 : vector<2x1x8xf32> to vector<1x2x1x8xf32>
    %260 = vector.broadcast %259 : vector<1x2x1x8xf32> to vector<4x2x8x8xf32>
    %261 = arith.addf %258, %260 : vector<4x2x8x8xf32>
    %cst_122 = arith.constant dense<0xFF800000> : vector<4x2x8xf32>
    %262 = vector.multi_reduction <maximumf>, %261, %cst_122 [3] : vector<4x2x8x8xf32> to vector<4x2x8xf32>
    %263 = vector.shape_cast %262 : vector<4x2x8xf32> to vector<4x2x8x1xf32>
    %264 = vector.broadcast %263 : vector<4x2x8x1xf32> to vector<4x2x8x8xf32>
    %265 = arith.subf %261, %264 : vector<4x2x8x8xf32>
    %266 = math.exp %265 : vector<4x2x8x8xf32>
    %cst_123 = arith.constant dense<0.000000e+00> : vector<4x2x8xf32>
    %267 = vector.multi_reduction <add>, %266, %cst_123 [3] : vector<4x2x8x8xf32> to vector<4x2x8xf32>
    %268 = vector.shape_cast %267 : vector<4x2x8xf32> to vector<4x2x8x1xf32>
    %269 = vector.broadcast %268 : vector<4x2x8x1xf32> to vector<4x2x8x8xf32>
    %270 = arith.divf %266, %269 : vector<4x2x8x8xf32>
    %cst_124 = arith.constant 0.000000e+00 : f32
    %271 = vector.broadcast %cst_124 : f32 to vector<16x32xf32>
    %272 = vector.extract_strided_slice %270 {offsets = [0, 0, 0, 0], sizes = [1, 2, 8, 8], strides = [1, 1, 1, 1]} : vector<4x2x8x8xf32> to vector<1x2x8x8xf32>
    %273 = vector.shape_cast %272 : vector<1x2x8x8xf32> to vector<2x8x8xf32>
    "tpu.trace_start"() <{level = 10 : i32, message = "bqk,bkd->bqd"}> : () -> ()
    %cst_125 = arith.constant dense<0.000000e+00> : vector<2x8x8xf32>
    %274 = tpu.matmul %273, %193, %cst_125 {dimension_numbers = #tpu.dot_dimension_numbers<[2], [1], [1], [2], [0, 0, 0, 1, 1, 2], [0], [0]>} : vector<2x8x8xf32>, vector<2x8x8xf32>, vector<2x8x8xf32> -> vector<2x8x8xf32>
    "tpu.trace_stop"() : () -> ()
    %c800 = arith.constant 800 : index
    %c0_126 = arith.constant 0 : index
    %275 = vector.load %arg4[%c800, %c0_126] : memref<1856x128xf32, #tpu.memory_space<vmem>>, vector<8x32xf32>
    %276 = vector.shape_cast %274 : vector<2x8x8xf32> to vector<16x8xf32>
    %cst_127 = arith.constant dense<0.000000e+00> : vector<16x32xf32>
    %277 = tpu.matmul %276, %275, %cst_127 {dimension_numbers = #tpu.dot_dimension_numbers<[1], [0], [0], [1], [0, 0, 1, 1], [], []>} : vector<16x8xf32>, vector<8x32xf32>, vector<16x32xf32> -> vector<16x32xf32>
    %278 = arith.addf %271, %277 : vector<16x32xf32>
    %279 = vector.extract_strided_slice %270 {offsets = [1, 0, 0, 0], sizes = [1, 2, 8, 8], strides = [1, 1, 1, 1]} : vector<4x2x8x8xf32> to vector<1x2x8x8xf32>
    %280 = vector.shape_cast %279 : vector<1x2x8x8xf32> to vector<2x8x8xf32>
    "tpu.trace_start"() <{level = 10 : i32, message = "bqk,bkd->bqd"}> : () -> ()
    %cst_128 = arith.constant dense<0.000000e+00> : vector<2x8x8xf32>
    %281 = tpu.matmul %280, %212, %cst_128 {dimension_numbers = #tpu.dot_dimension_numbers<[2], [1], [1], [2], [0, 0, 0, 1, 1, 2], [0], [0]>} : vector<2x8x8xf32>, vector<2x8x8xf32>, vector<2x8x8xf32> -> vector<2x8x8xf32>
    "tpu.trace_stop"() : () -> ()
    %c808 = arith.constant 808 : index
    %c0_129 = arith.constant 0 : index
    %282 = vector.load %arg4[%c808, %c0_129] : memref<1856x128xf32, #tpu.memory_space<vmem>>, vector<8x32xf32>
    %283 = vector.shape_cast %281 : vector<2x8x8xf32> to vector<16x8xf32>
    %cst_130 = arith.constant dense<0.000000e+00> : vector<16x32xf32>
    %284 = tpu.matmul %283, %282, %cst_130 {dimension_numbers = #tpu.dot_dimension_numbers<[1], [0], [0], [1], [0, 0, 1, 1], [], []>} : vector<16x8xf32>, vector<8x32xf32>, vector<16x32xf32> -> vector<16x32xf32>
    %285 = arith.addf %278, %284 : vector<16x32xf32>
    %286 = vector.extract_strided_slice %270 {offsets = [2, 0, 0, 0], sizes = [1, 2, 8, 8], strides = [1, 1, 1, 1]} : vector<4x2x8x8xf32> to vector<1x2x8x8xf32>
    %287 = vector.shape_cast %286 : vector<1x2x8x8xf32> to vector<2x8x8xf32>
    "tpu.trace_start"() <{level = 10 : i32, message = "bqk,bkd->bqd"}> : () -> ()
    %cst_131 = arith.constant dense<0.000000e+00> : vector<2x8x8xf32>
    %288 = tpu.matmul %287, %231, %cst_131 {dimension_numbers = #tpu.dot_dimension_numbers<[2], [1], [1], [2], [0, 0, 0, 1, 1, 2], [0], [0]>} : vector<2x8x8xf32>, vector<2x8x8xf32>, vector<2x8x8xf32> -> vector<2x8x8xf32>
    "tpu.trace_stop"() : () -> ()
    %c816 = arith.constant 816 : index
    %c0_132 = arith.constant 0 : index
    %289 = vector.load %arg4[%c816, %c0_132] : memref<1856x128xf32, #tpu.memory_space<vmem>>, vector<8x32xf32>
    %290 = vector.shape_cast %288 : vector<2x8x8xf32> to vector<16x8xf32>
    %cst_133 = arith.constant dense<0.000000e+00> : vector<16x32xf32>
    %291 = tpu.matmul %290, %289, %cst_133 {dimension_numbers = #tpu.dot_dimension_numbers<[1], [0], [0], [1], [0, 0, 1, 1], [], []>} : vector<16x8xf32>, vector<8x32xf32>, vector<16x32xf32> -> vector<16x32xf32>
    %292 = arith.addf %285, %291 : vector<16x32xf32>
    %293 = vector.extract_strided_slice %270 {offsets = [3, 0, 0, 0], sizes = [1, 2, 8, 8], strides = [1, 1, 1, 1]} : vector<4x2x8x8xf32> to vector<1x2x8x8xf32>
    %294 = vector.shape_cast %293 : vector<1x2x8x8xf32> to vector<2x8x8xf32>
    "tpu.trace_start"() <{level = 10 : i32, message = "bqk,bkd->bqd"}> : () -> ()
    %cst_134 = arith.constant dense<0.000000e+00> : vector<2x8x8xf32>
    %295 = tpu.matmul %294, %250, %cst_134 {dimension_numbers = #tpu.dot_dimension_numbers<[2], [1], [1], [2], [0, 0, 0, 1, 1, 2], [0], [0]>} : vector<2x8x8xf32>, vector<2x8x8xf32>, vector<2x8x8xf32> -> vector<2x8x8xf32>
    "tpu.trace_stop"() : () -> ()
    %c824 = arith.constant 824 : index
    %c0_135 = arith.constant 0 : index
    %296 = vector.load %arg4[%c824, %c0_135] : memref<1856x128xf32, #tpu.memory_space<vmem>>, vector<8x32xf32>
    %297 = vector.shape_cast %295 : vector<2x8x8xf32> to vector<16x8xf32>
    %cst_136 = arith.constant dense<0.000000e+00> : vector<16x32xf32>
    %298 = tpu.matmul %297, %296, %cst_136 {dimension_numbers = #tpu.dot_dimension_numbers<[1], [0], [0], [1], [0, 0, 1, 1], [], []>} : vector<16x8xf32>, vector<8x32xf32>, vector<16x32xf32> -> vector<16x32xf32>
    %299 = arith.addf %292, %298 : vector<16x32xf32>
    %c25 = arith.constant 25 : index
    %c0_137 = arith.constant 0 : index
    %300 = vector.load %arg5[%c25, %c0_137] : memref<70x128xf32, #tpu.memory_space<vmem>>, vector<1x32xf32>
    %301 = vector.broadcast %300 : vector<1x32xf32> to vector<16x32xf32>
    %302 = arith.addf %299, %301 : vector<16x32xf32>
    %303 = arith.addf %153, %302 : vector<16x32xf32>
    %c32_138 = arith.constant 32 : index
    %c0_139 = arith.constant 0 : index
    %304 = vector.load %arg5[%c32_138, %c0_139] : memref<70x128xf32, #tpu.memory_space<vmem>>, vector<1x32xf32>
    %c33 = arith.constant 33 : index
    %c0_140 = arith.constant 0 : index
    %305 = vector.load %arg5[%c33, %c0_140] : memref<70x128xf32, #tpu.memory_space<vmem>>, vector<1x32xf32>
    %cst_141 = arith.constant dense<0.000000e+00> : vector<16xf32>
    %306 = vector.multi_reduction <add>, %303, %cst_141 [1] : vector<16x32xf32> to vector<16xf32>
    %307 = vector.shape_cast %306 : vector<16xf32> to vector<16x1xf32>
    %cst_142 = arith.constant 3.200000e+01 : f32
    %308 = vector.broadcast %cst_142 : f32 to vector<16x1xf32>
    %309 = arith.divf %307, %308 : vector<16x1xf32>
    %310 = vector.broadcast %309 : vector<16x1xf32> to vector<16x32xf32>
    %311 = arith.subf %303, %310 : vector<16x32xf32>
    %312 = arith.mulf %311, %311 : vector<16x32xf32>
    %cst_143 = arith.constant dense<0.000000e+00> : vector<16xf32>
    %313 = vector.multi_reduction <add>, %312, %cst_143 [1] : vector<16x32xf32> to vector<16xf32>
    %314 = vector.shape_cast %313 : vector<16xf32> to vector<16x1xf32>
    %cst_144 = arith.constant 3.100000e+01 : f32
    %315 = vector.broadcast %cst_144 : f32 to vector<16x1xf32>
    %316 = arith.divf %314, %315 : vector<16x1xf32>
    %317 = vector.broadcast %304 : vector<1x32xf32> to vector<16x32xf32>
    %318 = arith.mulf %317, %311 : vector<16x32xf32>
    %cst_145 = arith.constant 9.99999997E-7 : f32
    %319 = vector.broadcast %cst_145 : f32 to vector<16x1xf32>
    %320 = arith.addf %316, %319 : vector<16x1xf32>
    %321 = math.rsqrt %320 : vector<16x1xf32>
    %322 = vector.broadcast %321 : vector<16x1xf32> to vector<16x32xf32>
    %323 = arith.mulf %318, %322 : vector<16x32xf32>
    %324 = vector.broadcast %305 : vector<1x32xf32> to vector<16x32xf32>
    %325 = arith.addf %323, %324 : vector<16x32xf32>
    %c832 = arith.constant 832 : index
    %c0_146 = arith.constant 0 : index
    %326 = vector.load %arg4[%c832, %c0_146] : memref<1856x128xf32, #tpu.memory_space<vmem>>, vector<32x64xf32>
    %cst_147 = arith.constant dense<0.000000e+00> : vector<16x64xf32>
    %327 = tpu.matmul %325, %326, %cst_147 {dimension_numbers = #tpu.dot_dimension_numbers<[1], [0], [0], [1], [0, 0, 1, 1], [], []>} : vector<16x32xf32>, vector<32x64xf32>, vector<16x64xf32> -> vector<16x64xf32>
    %c26 = arith.constant 26 : index
    %c0_148 = arith.constant 0 : index
    %328 = vector.load %arg5[%c26, %c0_148] : memref<70x128xf32, #tpu.memory_space<vmem>>, vector<1x64xf32>
    %329 = vector.broadcast %328 : vector<1x64xf32> to vector<16x64xf32>
    %330 = arith.addf %327, %329 : vector<16x64xf32>
    %cst_149 = arith.constant 0.000000e+00 : f32
    %331 = vector.broadcast %cst_149 : f32 to vector<16x64xf32>
    %332 = arith.maximumf %330, %331 : vector<16x64xf32>
    %c864 = arith.constant 864 : index
    %c0_150 = arith.constant 0 : index
    %333 = vector.load %arg4[%c864, %c0_150] : memref<1856x128xf32, #tpu.memory_space<vmem>>, vector<64x32xf32>
    %cst_151 = arith.constant dense<0.000000e+00> : vector<16x32xf32>
    %334 = tpu.matmul %332, %333, %cst_151 {dimension_numbers = #tpu.dot_dimension_numbers<[1], [0], [0], [1], [0, 0, 1, 1], [], []>} : vector<16x64xf32>, vector<64x32xf32>, vector<16x32xf32> -> vector<16x32xf32>
    %335 = arith.addf %303, %334 : vector<16x32xf32>
    %c27 = arith.constant 27 : index
    %c0_152 = arith.constant 0 : index
    %336 = vector.load %arg5[%c27, %c0_152] : memref<70x128xf32, #tpu.memory_space<vmem>>, vector<1x32xf32>
    %337 = vector.broadcast %336 : vector<1x32xf32> to vector<16x32xf32>
    %338 = arith.addf %335, %337 : vector<16x32xf32>
    %c62 = arith.constant 62 : index
    %c0_153 = arith.constant 0 : index
    %339 = vector.load %arg5[%c62, %c0_153] : memref<70x128xf32, #tpu.memory_space<vmem>>, vector<1x32xf32>
    %c63 = arith.constant 63 : index
    %c0_154 = arith.constant 0 : index
    %340 = vector.load %arg5[%c63, %c0_154] : memref<70x128xf32, #tpu.memory_space<vmem>>, vector<1x32xf32>
    %cst_155 = arith.constant dense<0.000000e+00> : vector<16xf32>
    %341 = vector.multi_reduction <add>, %338, %cst_155 [1] : vector<16x32xf32> to vector<16xf32>
    %342 = vector.shape_cast %341 : vector<16xf32> to vector<16x1xf32>
    %cst_156 = arith.constant 3.200000e+01 : f32
    %343 = vector.broadcast %cst_156 : f32 to vector<16x1xf32>
    %344 = arith.divf %342, %343 : vector<16x1xf32>
    %345 = vector.broadcast %344 : vector<16x1xf32> to vector<16x32xf32>
    %346 = arith.subf %338, %345 : vector<16x32xf32>
    %347 = arith.mulf %346, %346 : vector<16x32xf32>
    %cst_157 = arith.constant dense<0.000000e+00> : vector<16xf32>
    %348 = vector.multi_reduction <add>, %347, %cst_157 [1] : vector<16x32xf32> to vector<16xf32>
    %349 = vector.shape_cast %348 : vector<16xf32> to vector<16x1xf32>
    %cst_158 = arith.constant 3.100000e+01 : f32
    %350 = vector.broadcast %cst_158 : f32 to vector<16x1xf32>
    %351 = arith.divf %349, %350 : vector<16x1xf32>
    %352 = vector.broadcast %339 : vector<1x32xf32> to vector<16x32xf32>
    %353 = arith.mulf %352, %346 : vector<16x32xf32>
    %cst_159 = arith.constant 9.99999997E-7 : f32
    %354 = vector.broadcast %cst_159 : f32 to vector<16x1xf32>
    %355 = arith.addf %351, %354 : vector<16x1xf32>
    %356 = math.rsqrt %355 : vector<16x1xf32>
    %357 = vector.broadcast %356 : vector<16x1xf32> to vector<16x32xf32>
    %358 = arith.mulf %353, %357 : vector<16x32xf32>
    %359 = vector.broadcast %340 : vector<1x32xf32> to vector<16x32xf32>
    %360 = arith.addf %358, %359 : vector<16x32xf32>
    %c928 = arith.constant 928 : index
    %c0_160 = arith.constant 0 : index
    %361 = vector.load %arg4[%c928, %c0_160] : memref<1856x128xf32, #tpu.memory_space<vmem>>, vector<32x8xf32>
    %c1056 = arith.constant 1056 : index
    %c0_161 = arith.constant 0 : index
    %362 = vector.load %arg4[%c1056, %c0_161] : memref<1856x128xf32, #tpu.memory_space<vmem>>, vector<32x8xf32>
    %c1184 = arith.constant 1184 : index
    %c0_162 = arith.constant 0 : index
    %363 = vector.load %arg4[%c1184, %c0_162] : memref<1856x128xf32, #tpu.memory_space<vmem>>, vector<32x8xf32>
    %cst_163 = arith.constant dense<0.000000e+00> : vector<16x8xf32>
    %364 = tpu.matmul %360, %361, %cst_163 {dimension_numbers = #tpu.dot_dimension_numbers<[1], [0], [0], [1], [0, 0, 1, 1], [], []>} : vector<16x32xf32>, vector<32x8xf32>, vector<16x8xf32> -> vector<16x8xf32>
    %c34 = arith.constant 34 : index
    %c0_164 = arith.constant 0 : index
    %365 = vector.load %arg5[%c34, %c0_164] : memref<70x128xf32, #tpu.memory_space<vmem>>, vector<1x8xf32>
    %366 = vector.broadcast %365 : vector<1x8xf32> to vector<16x8xf32>
    %367 = arith.addf %364, %366 : vector<16x8xf32>
    %368 = vector.shape_cast %367 : vector<16x8xf32> to vector<2x8x8xf32>
    %cst_165 = arith.constant dense<0.000000e+00> : vector<16x8xf32>
    %369 = tpu.matmul %360, %362, %cst_165 {dimension_numbers = #tpu.dot_dimension_numbers<[1], [0], [0], [1], [0, 0, 1, 1], [], []>} : vector<16x32xf32>, vector<32x8xf32>, vector<16x8xf32> -> vector<16x8xf32>
    %c38 = arith.constant 38 : index
    %c0_166 = arith.constant 0 : index
    %370 = vector.load %arg5[%c38, %c0_166] : memref<70x128xf32, #tpu.memory_space<vmem>>, vector<1x8xf32>
    %371 = vector.broadcast %370 : vector<1x8xf32> to vector<16x8xf32>
    %372 = arith.addf %369, %371 : vector<16x8xf32>
    %373 = vector.shape_cast %372 : vector<16x8xf32> to vector<2x8x8xf32>
    %cst_167 = arith.constant dense<0.000000e+00> : vector<16x8xf32>
    %374 = tpu.matmul %360, %363, %cst_167 {dimension_numbers = #tpu.dot_dimension_numbers<[1], [0], [0], [1], [0, 0, 1, 1], [], []>} : vector<16x32xf32>, vector<32x8xf32>, vector<16x8xf32> -> vector<16x8xf32>
    %c42 = arith.constant 42 : index
    %c0_168 = arith.constant 0 : index
    %375 = vector.load %arg5[%c42, %c0_168] : memref<70x128xf32, #tpu.memory_space<vmem>>, vector<1x8xf32>
    %376 = vector.broadcast %375 : vector<1x8xf32> to vector<16x8xf32>
    %377 = arith.addf %374, %376 : vector<16x8xf32>
    %378 = vector.shape_cast %377 : vector<16x8xf32> to vector<2x8x8xf32>
    "tpu.trace_start"() <{level = 10 : i32, message = "bqd,bkd->bqk"}> : () -> ()
    %cst_169 = arith.constant dense<0.000000e+00> : vector<2x8x8xf32>
    %379 = tpu.matmul %368, %373, %cst_169 {dimension_numbers = #tpu.dot_dimension_numbers<[2], [2], [1], [1], [0, 0, 0, 1, 1, 1], [0], [0]>} : vector<2x8x8xf32>, vector<2x8x8xf32>, vector<2x8x8xf32> -> vector<2x8x8xf32>
    "tpu.trace_stop"() : () -> ()
    %c960 = arith.constant 960 : index
    %c0_170 = arith.constant 0 : index
    %380 = vector.load %arg4[%c960, %c0_170] : memref<1856x128xf32, #tpu.memory_space<vmem>>, vector<32x8xf32>
    %c1088 = arith.constant 1088 : index
    %c0_171 = arith.constant 0 : index
    %381 = vector.load %arg4[%c1088, %c0_171] : memref<1856x128xf32, #tpu.memory_space<vmem>>, vector<32x8xf32>
    %c1216 = arith.constant 1216 : index
    %c0_172 = arith.constant 0 : index
    %382 = vector.load %arg4[%c1216, %c0_172] : memref<1856x128xf32, #tpu.memory_space<vmem>>, vector<32x8xf32>
    %cst_173 = arith.constant dense<0.000000e+00> : vector<16x8xf32>
    %383 = tpu.matmul %360, %380, %cst_173 {dimension_numbers = #tpu.dot_dimension_numbers<[1], [0], [0], [1], [0, 0, 1, 1], [], []>} : vector<16x32xf32>, vector<32x8xf32>, vector<16x8xf32> -> vector<16x8xf32>
    %c35 = arith.constant 35 : index
    %c0_174 = arith.constant 0 : index
    %384 = vector.load %arg5[%c35, %c0_174] : memref<70x128xf32, #tpu.memory_space<vmem>>, vector<1x8xf32>
    %385 = vector.broadcast %384 : vector<1x8xf32> to vector<16x8xf32>
    %386 = arith.addf %383, %385 : vector<16x8xf32>
    %387 = vector.shape_cast %386 : vector<16x8xf32> to vector<2x8x8xf32>
    %cst_175 = arith.constant dense<0.000000e+00> : vector<16x8xf32>
    %388 = tpu.matmul %360, %381, %cst_175 {dimension_numbers = #tpu.dot_dimension_numbers<[1], [0], [0], [1], [0, 0, 1, 1], [], []>} : vector<16x32xf32>, vector<32x8xf32>, vector<16x8xf32> -> vector<16x8xf32>
    %c39 = arith.constant 39 : index
    %c0_176 = arith.constant 0 : index
    %389 = vector.load %arg5[%c39, %c0_176] : memref<70x128xf32, #tpu.memory_space<vmem>>, vector<1x8xf32>
    %390 = vector.broadcast %389 : vector<1x8xf32> to vector<16x8xf32>
    %391 = arith.addf %388, %390 : vector<16x8xf32>
    %392 = vector.shape_cast %391 : vector<16x8xf32> to vector<2x8x8xf32>
    %cst_177 = arith.constant dense<0.000000e+00> : vector<16x8xf32>
    %393 = tpu.matmul %360, %382, %cst_177 {dimension_numbers = #tpu.dot_dimension_numbers<[1], [0], [0], [1], [0, 0, 1, 1], [], []>} : vector<16x32xf32>, vector<32x8xf32>, vector<16x8xf32> -> vector<16x8xf32>
    %c43 = arith.constant 43 : index
    %c0_178 = arith.constant 0 : index
    %394 = vector.load %arg5[%c43, %c0_178] : memref<70x128xf32, #tpu.memory_space<vmem>>, vector<1x8xf32>
    %395 = vector.broadcast %394 : vector<1x8xf32> to vector<16x8xf32>
    %396 = arith.addf %393, %395 : vector<16x8xf32>
    %397 = vector.shape_cast %396 : vector<16x8xf32> to vector<2x8x8xf32>
    "tpu.trace_start"() <{level = 10 : i32, message = "bqd,bkd->bqk"}> : () -> ()
    %cst_179 = arith.constant dense<0.000000e+00> : vector<2x8x8xf32>
    %398 = tpu.matmul %387, %392, %cst_179 {dimension_numbers = #tpu.dot_dimension_numbers<[2], [2], [1], [1], [0, 0, 0, 1, 1, 1], [0], [0]>} : vector<2x8x8xf32>, vector<2x8x8xf32>, vector<2x8x8xf32> -> vector<2x8x8xf32>
    "tpu.trace_stop"() : () -> ()
    %c992 = arith.constant 992 : index
    %c0_180 = arith.constant 0 : index
    %399 = vector.load %arg4[%c992, %c0_180] : memref<1856x128xf32, #tpu.memory_space<vmem>>, vector<32x8xf32>
    %c1120 = arith.constant 1120 : index
    %c0_181 = arith.constant 0 : index
    %400 = vector.load %arg4[%c1120, %c0_181] : memref<1856x128xf32, #tpu.memory_space<vmem>>, vector<32x8xf32>
    %c1248 = arith.constant 1248 : index
    %c0_182 = arith.constant 0 : index
    %401 = vector.load %arg4[%c1248, %c0_182] : memref<1856x128xf32, #tpu.memory_space<vmem>>, vector<32x8xf32>
    %cst_183 = arith.constant dense<0.000000e+00> : vector<16x8xf32>
    %402 = tpu.matmul %360, %399, %cst_183 {dimension_numbers = #tpu.dot_dimension_numbers<[1], [0], [0], [1], [0, 0, 1, 1], [], []>} : vector<16x32xf32>, vector<32x8xf32>, vector<16x8xf32> -> vector<16x8xf32>
    %c36 = arith.constant 36 : index
    %c0_184 = arith.constant 0 : index
    %403 = vector.load %arg5[%c36, %c0_184] : memref<70x128xf32, #tpu.memory_space<vmem>>, vector<1x8xf32>
    %404 = vector.broadcast %403 : vector<1x8xf32> to vector<16x8xf32>
    %405 = arith.addf %402, %404 : vector<16x8xf32>
    %406 = vector.shape_cast %405 : vector<16x8xf32> to vector<2x8x8xf32>
    %cst_185 = arith.constant dense<0.000000e+00> : vector<16x8xf32>
    %407 = tpu.matmul %360, %400, %cst_185 {dimension_numbers = #tpu.dot_dimension_numbers<[1], [0], [0], [1], [0, 0, 1, 1], [], []>} : vector<16x32xf32>, vector<32x8xf32>, vector<16x8xf32> -> vector<16x8xf32>
    %c40 = arith.constant 40 : index
    %c0_186 = arith.constant 0 : index
    %408 = vector.load %arg5[%c40, %c0_186] : memref<70x128xf32, #tpu.memory_space<vmem>>, vector<1x8xf32>
    %409 = vector.broadcast %408 : vector<1x8xf32> to vector<16x8xf32>
    %410 = arith.addf %407, %409 : vector<16x8xf32>
    %411 = vector.shape_cast %410 : vector<16x8xf32> to vector<2x8x8xf32>
    %cst_187 = arith.constant dense<0.000000e+00> : vector<16x8xf32>
    %412 = tpu.matmul %360, %401, %cst_187 {dimension_numbers = #tpu.dot_dimension_numbers<[1], [0], [0], [1], [0, 0, 1, 1], [], []>} : vector<16x32xf32>, vector<32x8xf32>, vector<16x8xf32> -> vector<16x8xf32>
    %c44 = arith.constant 44 : index
    %c0_188 = arith.constant 0 : index
    %413 = vector.load %arg5[%c44, %c0_188] : memref<70x128xf32, #tpu.memory_space<vmem>>, vector<1x8xf32>
    %414 = vector.broadcast %413 : vector<1x8xf32> to vector<16x8xf32>
    %415 = arith.addf %412, %414 : vector<16x8xf32>
    %416 = vector.shape_cast %415 : vector<16x8xf32> to vector<2x8x8xf32>
    "tpu.trace_start"() <{level = 10 : i32, message = "bqd,bkd->bqk"}> : () -> ()
    %cst_189 = arith.constant dense<0.000000e+00> : vector<2x8x8xf32>
    %417 = tpu.matmul %406, %411, %cst_189 {dimension_numbers = #tpu.dot_dimension_numbers<[2], [2], [1], [1], [0, 0, 0, 1, 1, 1], [0], [0]>} : vector<2x8x8xf32>, vector<2x8x8xf32>, vector<2x8x8xf32> -> vector<2x8x8xf32>
    "tpu.trace_stop"() : () -> ()
    %c1024 = arith.constant 1024 : index
    %c0_190 = arith.constant 0 : index
    %418 = vector.load %arg4[%c1024, %c0_190] : memref<1856x128xf32, #tpu.memory_space<vmem>>, vector<32x8xf32>
    %c1152 = arith.constant 1152 : index
    %c0_191 = arith.constant 0 : index
    %419 = vector.load %arg4[%c1152, %c0_191] : memref<1856x128xf32, #tpu.memory_space<vmem>>, vector<32x8xf32>
    %c1280 = arith.constant 1280 : index
    %c0_192 = arith.constant 0 : index
    %420 = vector.load %arg4[%c1280, %c0_192] : memref<1856x128xf32, #tpu.memory_space<vmem>>, vector<32x8xf32>
    %cst_193 = arith.constant dense<0.000000e+00> : vector<16x8xf32>
    %421 = tpu.matmul %360, %418, %cst_193 {dimension_numbers = #tpu.dot_dimension_numbers<[1], [0], [0], [1], [0, 0, 1, 1], [], []>} : vector<16x32xf32>, vector<32x8xf32>, vector<16x8xf32> -> vector<16x8xf32>
    %c37 = arith.constant 37 : index
    %c0_194 = arith.constant 0 : index
    %422 = vector.load %arg5[%c37, %c0_194] : memref<70x128xf32, #tpu.memory_space<vmem>>, vector<1x8xf32>
    %423 = vector.broadcast %422 : vector<1x8xf32> to vector<16x8xf32>
    %424 = arith.addf %421, %423 : vector<16x8xf32>
    %425 = vector.shape_cast %424 : vector<16x8xf32> to vector<2x8x8xf32>
    %cst_195 = arith.constant dense<0.000000e+00> : vector<16x8xf32>
    %426 = tpu.matmul %360, %419, %cst_195 {dimension_numbers = #tpu.dot_dimension_numbers<[1], [0], [0], [1], [0, 0, 1, 1], [], []>} : vector<16x32xf32>, vector<32x8xf32>, vector<16x8xf32> -> vector<16x8xf32>
    %c41 = arith.constant 41 : index
    %c0_196 = arith.constant 0 : index
    %427 = vector.load %arg5[%c41, %c0_196] : memref<70x128xf32, #tpu.memory_space<vmem>>, vector<1x8xf32>
    %428 = vector.broadcast %427 : vector<1x8xf32> to vector<16x8xf32>
    %429 = arith.addf %426, %428 : vector<16x8xf32>
    %430 = vector.shape_cast %429 : vector<16x8xf32> to vector<2x8x8xf32>
    %cst_197 = arith.constant dense<0.000000e+00> : vector<16x8xf32>
    %431 = tpu.matmul %360, %420, %cst_197 {dimension_numbers = #tpu.dot_dimension_numbers<[1], [0], [0], [1], [0, 0, 1, 1], [], []>} : vector<16x32xf32>, vector<32x8xf32>, vector<16x8xf32> -> vector<16x8xf32>
    %c45 = arith.constant 45 : index
    %c0_198 = arith.constant 0 : index
    %432 = vector.load %arg5[%c45, %c0_198] : memref<70x128xf32, #tpu.memory_space<vmem>>, vector<1x8xf32>
    %433 = vector.broadcast %432 : vector<1x8xf32> to vector<16x8xf32>
    %434 = arith.addf %431, %433 : vector<16x8xf32>
    %435 = vector.shape_cast %434 : vector<16x8xf32> to vector<2x8x8xf32>
    "tpu.trace_start"() <{level = 10 : i32, message = "bqd,bkd->bqk"}> : () -> ()
    %cst_199 = arith.constant dense<0.000000e+00> : vector<2x8x8xf32>
    %436 = tpu.matmul %425, %430, %cst_199 {dimension_numbers = #tpu.dot_dimension_numbers<[2], [2], [1], [1], [0, 0, 0, 1, 1, 1], [0], [0]>} : vector<2x8x8xf32>, vector<2x8x8xf32>, vector<2x8x8xf32> -> vector<2x8x8xf32>
    "tpu.trace_stop"() : () -> ()
    %437 = vector.shape_cast %379 : vector<2x8x8xf32> to vector<1x2x8x8xf32>
    %438 = vector.shape_cast %398 : vector<2x8x8xf32> to vector<1x2x8x8xf32>
    %439 = vector.shape_cast %417 : vector<2x8x8xf32> to vector<1x2x8x8xf32>
    %440 = vector.shape_cast %436 : vector<2x8x8xf32> to vector<1x2x8x8xf32>
    %441 = tpu.concatenate %437, %438, %439, %440 in 0 : vector<1x2x8x8xf32>, vector<1x2x8x8xf32>, vector<1x2x8x8xf32>, vector<1x2x8x8xf32> -> vector<4x2x8x8xf32>
    %cst_200 = arith.constant 0.353553385 : f32
    %442 = vector.broadcast %cst_200 : f32 to vector<4x2x8x8xf32>
    %443 = arith.mulf %441, %442 : vector<4x2x8x8xf32>
    %444 = vector.shape_cast %3 : vector<2x8x8xf32> to vector<1x2x8x8xf32>
    %445 = vector.broadcast %444 : vector<1x2x8x8xf32> to vector<4x2x8x8xf32>
    %446 = arith.addf %443, %445 : vector<4x2x8x8xf32>
    %cst_201 = arith.constant dense<0xFF800000> : vector<4x2x8xf32>
    %447 = vector.multi_reduction <maximumf>, %446, %cst_201 [3] : vector<4x2x8x8xf32> to vector<4x2x8xf32>
    %448 = vector.shape_cast %447 : vector<4x2x8xf32> to vector<4x2x8x1xf32>
    %449 = vector.broadcast %448 : vector<4x2x8x1xf32> to vector<4x2x8x8xf32>
    %450 = arith.subf %446, %449 : vector<4x2x8x8xf32>
    %451 = math.exp %450 : vector<4x2x8x8xf32>
    %cst_202 = arith.constant dense<0.000000e+00> : vector<4x2x8xf32>
    %452 = vector.multi_reduction <add>, %451, %cst_202 [3] : vector<4x2x8x8xf32> to vector<4x2x8xf32>
    %453 = vector.shape_cast %452 : vector<4x2x8xf32> to vector<4x2x8x1xf32>
    %454 = vector.broadcast %453 : vector<4x2x8x1xf32> to vector<4x2x8x8xf32>
    %455 = arith.divf %451, %454 : vector<4x2x8x8xf32>
    %cst_203 = arith.constant 0.000000e+00 : f32
    %456 = vector.broadcast %cst_203 : f32 to vector<16x32xf32>
    %457 = vector.extract_strided_slice %455 {offsets = [0, 0, 0, 0], sizes = [1, 2, 8, 8], strides = [1, 1, 1, 1]} : vector<4x2x8x8xf32> to vector<1x2x8x8xf32>
    %458 = vector.shape_cast %457 : vector<1x2x8x8xf32> to vector<2x8x8xf32>
    "tpu.trace_start"() <{level = 10 : i32, message = "bqk,bkd->bqd"}> : () -> ()
    %cst_204 = arith.constant dense<0.000000e+00> : vector<2x8x8xf32>
    %459 = tpu.matmul %458, %378, %cst_204 {dimension_numbers = #tpu.dot_dimension_numbers<[2], [1], [1], [2], [0, 0, 0, 1, 1, 2], [0], [0]>} : vector<2x8x8xf32>, vector<2x8x8xf32>, vector<2x8x8xf32> -> vector<2x8x8xf32>
    "tpu.trace_stop"() : () -> ()
    %c1312 = arith.constant 1312 : index
    %c0_205 = arith.constant 0 : index
    %460 = vector.load %arg4[%c1312, %c0_205] : memref<1856x128xf32, #tpu.memory_space<vmem>>, vector<8x32xf32>
    %461 = vector.shape_cast %459 : vector<2x8x8xf32> to vector<16x8xf32>
    %cst_206 = arith.constant dense<0.000000e+00> : vector<16x32xf32>
    %462 = tpu.matmul %461, %460, %cst_206 {dimension_numbers = #tpu.dot_dimension_numbers<[1], [0], [0], [1], [0, 0, 1, 1], [], []>} : vector<16x8xf32>, vector<8x32xf32>, vector<16x32xf32> -> vector<16x32xf32>
    %463 = arith.addf %456, %462 : vector<16x32xf32>
    %464 = vector.extract_strided_slice %455 {offsets = [1, 0, 0, 0], sizes = [1, 2, 8, 8], strides = [1, 1, 1, 1]} : vector<4x2x8x8xf32> to vector<1x2x8x8xf32>
    %465 = vector.shape_cast %464 : vector<1x2x8x8xf32> to vector<2x8x8xf32>
    "tpu.trace_start"() <{level = 10 : i32, message = "bqk,bkd->bqd"}> : () -> ()
    %cst_207 = arith.constant dense<0.000000e+00> : vector<2x8x8xf32>
    %466 = tpu.matmul %465, %397, %cst_207 {dimension_numbers = #tpu.dot_dimension_numbers<[2], [1], [1], [2], [0, 0, 0, 1, 1, 2], [0], [0]>} : vector<2x8x8xf32>, vector<2x8x8xf32>, vector<2x8x8xf32> -> vector<2x8x8xf32>
    "tpu.trace_stop"() : () -> ()
    %c1320 = arith.constant 1320 : index
    %c0_208 = arith.constant 0 : index
    %467 = vector.load %arg4[%c1320, %c0_208] : memref<1856x128xf32, #tpu.memory_space<vmem>>, vector<8x32xf32>
    %468 = vector.shape_cast %466 : vector<2x8x8xf32> to vector<16x8xf32>
    %cst_209 = arith.constant dense<0.000000e+00> : vector<16x32xf32>
    %469 = tpu.matmul %468, %467, %cst_209 {dimension_numbers = #tpu.dot_dimension_numbers<[1], [0], [0], [1], [0, 0, 1, 1], [], []>} : vector<16x8xf32>, vector<8x32xf32>, vector<16x32xf32> -> vector<16x32xf32>
    %470 = arith.addf %463, %469 : vector<16x32xf32>
    %471 = vector.extract_strided_slice %455 {offsets = [2, 0, 0, 0], sizes = [1, 2, 8, 8], strides = [1, 1, 1, 1]} : vector<4x2x8x8xf32> to vector<1x2x8x8xf32>
    %472 = vector.shape_cast %471 : vector<1x2x8x8xf32> to vector<2x8x8xf32>
    "tpu.trace_start"() <{level = 10 : i32, message = "bqk,bkd->bqd"}> : () -> ()
    %cst_210 = arith.constant dense<0.000000e+00> : vector<2x8x8xf32>
    %473 = tpu.matmul %472, %416, %cst_210 {dimension_numbers = #tpu.dot_dimension_numbers<[2], [1], [1], [2], [0, 0, 0, 1, 1, 2], [0], [0]>} : vector<2x8x8xf32>, vector<2x8x8xf32>, vector<2x8x8xf32> -> vector<2x8x8xf32>
    "tpu.trace_stop"() : () -> ()
    %c1328 = arith.constant 1328 : index
    %c0_211 = arith.constant 0 : index
    %474 = vector.load %arg4[%c1328, %c0_211] : memref<1856x128xf32, #tpu.memory_space<vmem>>, vector<8x32xf32>
    %475 = vector.shape_cast %473 : vector<2x8x8xf32> to vector<16x8xf32>
    %cst_212 = arith.constant dense<0.000000e+00> : vector<16x32xf32>
    %476 = tpu.matmul %475, %474, %cst_212 {dimension_numbers = #tpu.dot_dimension_numbers<[1], [0], [0], [1], [0, 0, 1, 1], [], []>} : vector<16x8xf32>, vector<8x32xf32>, vector<16x32xf32> -> vector<16x32xf32>
    %477 = arith.addf %470, %476 : vector<16x32xf32>
    %478 = vector.extract_strided_slice %455 {offsets = [3, 0, 0, 0], sizes = [1, 2, 8, 8], strides = [1, 1, 1, 1]} : vector<4x2x8x8xf32> to vector<1x2x8x8xf32>
    %479 = vector.shape_cast %478 : vector<1x2x8x8xf32> to vector<2x8x8xf32>
    "tpu.trace_start"() <{level = 10 : i32, message = "bqk,bkd->bqd"}> : () -> ()
    %cst_213 = arith.constant dense<0.000000e+00> : vector<2x8x8xf32>
    %480 = tpu.matmul %479, %435, %cst_213 {dimension_numbers = #tpu.dot_dimension_numbers<[2], [1], [1], [2], [0, 0, 0, 1, 1, 2], [0], [0]>} : vector<2x8x8xf32>, vector<2x8x8xf32>, vector<2x8x8xf32> -> vector<2x8x8xf32>
    "tpu.trace_stop"() : () -> ()
    %c1336 = arith.constant 1336 : index
    %c0_214 = arith.constant 0 : index
    %481 = vector.load %arg4[%c1336, %c0_214] : memref<1856x128xf32, #tpu.memory_space<vmem>>, vector<8x32xf32>
    %482 = vector.shape_cast %480 : vector<2x8x8xf32> to vector<16x8xf32>
    %cst_215 = arith.constant dense<0.000000e+00> : vector<16x32xf32>
    %483 = tpu.matmul %482, %481, %cst_215 {dimension_numbers = #tpu.dot_dimension_numbers<[1], [0], [0], [1], [0, 0, 1, 1], [], []>} : vector<16x8xf32>, vector<8x32xf32>, vector<16x32xf32> -> vector<16x32xf32>
    %484 = arith.addf %477, %483 : vector<16x32xf32>
    %c58 = arith.constant 58 : index
    %c0_216 = arith.constant 0 : index
    %485 = vector.load %arg5[%c58, %c0_216] : memref<70x128xf32, #tpu.memory_space<vmem>>, vector<1x32xf32>
    %486 = vector.broadcast %485 : vector<1x32xf32> to vector<16x32xf32>
    %487 = arith.addf %484, %486 : vector<16x32xf32>
    %488 = arith.addf %338, %487 : vector<16x32xf32>
    %c64_217 = arith.constant 64 : index
    %c0_218 = arith.constant 0 : index
    %489 = vector.load %arg5[%c64_217, %c0_218] : memref<70x128xf32, #tpu.memory_space<vmem>>, vector<1x32xf32>
    %c65 = arith.constant 65 : index
    %c0_219 = arith.constant 0 : index
    %490 = vector.load %arg5[%c65, %c0_219] : memref<70x128xf32, #tpu.memory_space<vmem>>, vector<1x32xf32>
    %cst_220 = arith.constant dense<0.000000e+00> : vector<16xf32>
    %491 = vector.multi_reduction <add>, %488, %cst_220 [1] : vector<16x32xf32> to vector<16xf32>
    %492 = vector.shape_cast %491 : vector<16xf32> to vector<16x1xf32>
    %cst_221 = arith.constant 3.200000e+01 : f32
    %493 = vector.broadcast %cst_221 : f32 to vector<16x1xf32>
    %494 = arith.divf %492, %493 : vector<16x1xf32>
    %495 = vector.broadcast %494 : vector<16x1xf32> to vector<16x32xf32>
    %496 = arith.subf %488, %495 : vector<16x32xf32>
    %497 = arith.mulf %496, %496 : vector<16x32xf32>
    %cst_222 = arith.constant dense<0.000000e+00> : vector<16xf32>
    %498 = vector.multi_reduction <add>, %497, %cst_222 [1] : vector<16x32xf32> to vector<16xf32>
    %499 = vector.shape_cast %498 : vector<16xf32> to vector<16x1xf32>
    %cst_223 = arith.constant 3.100000e+01 : f32
    %500 = vector.broadcast %cst_223 : f32 to vector<16x1xf32>
    %501 = arith.divf %499, %500 : vector<16x1xf32>
    %502 = vector.broadcast %489 : vector<1x32xf32> to vector<16x32xf32>
    %503 = arith.mulf %502, %496 : vector<16x32xf32>
    %cst_224 = arith.constant 9.99999997E-7 : f32
    %504 = vector.broadcast %cst_224 : f32 to vector<16x1xf32>
    %505 = arith.addf %501, %504 : vector<16x1xf32>
    %506 = math.rsqrt %505 : vector<16x1xf32>
    %507 = vector.broadcast %506 : vector<16x1xf32> to vector<16x32xf32>
    %508 = arith.mulf %503, %507 : vector<16x32xf32>
    %509 = vector.broadcast %490 : vector<1x32xf32> to vector<16x32xf32>
    %510 = arith.addf %508, %509 : vector<16x32xf32>
    %c1344 = arith.constant 1344 : index
    %c0_225 = arith.constant 0 : index
    %511 = vector.load %arg4[%c1344, %c0_225] : memref<1856x128xf32, #tpu.memory_space<vmem>>, vector<32x8xf32>
    %c1472 = arith.constant 1472 : index
    %c0_226 = arith.constant 0 : index
    %512 = vector.load %arg4[%c1472, %c0_226] : memref<1856x128xf32, #tpu.memory_space<vmem>>, vector<32x8xf32>
    %c1600 = arith.constant 1600 : index
    %c0_227 = arith.constant 0 : index
    %513 = vector.load %arg4[%c1600, %c0_227] : memref<1856x128xf32, #tpu.memory_space<vmem>>, vector<32x8xf32>
    %cst_228 = arith.constant dense<0.000000e+00> : vector<16x8xf32>
    %514 = tpu.matmul %510, %511, %cst_228 {dimension_numbers = #tpu.dot_dimension_numbers<[1], [0], [0], [1], [0, 0, 1, 1], [], []>} : vector<16x32xf32>, vector<32x8xf32>, vector<16x8xf32> -> vector<16x8xf32>
    %c46 = arith.constant 46 : index
    %c0_229 = arith.constant 0 : index
    %515 = vector.load %arg5[%c46, %c0_229] : memref<70x128xf32, #tpu.memory_space<vmem>>, vector<1x8xf32>
    %516 = vector.broadcast %515 : vector<1x8xf32> to vector<16x8xf32>
    %517 = arith.addf %514, %516 : vector<16x8xf32>
    %518 = vector.shape_cast %517 : vector<16x8xf32> to vector<2x8x8xf32>
    %cst_230 = arith.constant dense<0.000000e+00> : vector<16x8xf32>
    %519 = tpu.matmul %1, %512, %cst_230 {dimension_numbers = #tpu.dot_dimension_numbers<[1], [0], [0], [1], [0, 0, 1, 1], [], []>} : vector<16x32xf32>, vector<32x8xf32>, vector<16x8xf32> -> vector<16x8xf32>
    %c50 = arith.constant 50 : index
    %c0_231 = arith.constant 0 : index
    %520 = vector.load %arg5[%c50, %c0_231] : memref<70x128xf32, #tpu.memory_space<vmem>>, vector<1x8xf32>
    %521 = vector.broadcast %520 : vector<1x8xf32> to vector<16x8xf32>
    %522 = arith.addf %519, %521 : vector<16x8xf32>
    %523 = vector.shape_cast %522 : vector<16x8xf32> to vector<2x8x8xf32>
    %cst_232 = arith.constant dense<0.000000e+00> : vector<16x8xf32>
    %524 = tpu.matmul %1, %513, %cst_232 {dimension_numbers = #tpu.dot_dimension_numbers<[1], [0], [0], [1], [0, 0, 1, 1], [], []>} : vector<16x32xf32>, vector<32x8xf32>, vector<16x8xf32> -> vector<16x8xf32>
    %c54 = arith.constant 54 : index
    %c0_233 = arith.constant 0 : index
    %525 = vector.load %arg5[%c54, %c0_233] : memref<70x128xf32, #tpu.memory_space<vmem>>, vector<1x8xf32>
    %526 = vector.broadcast %525 : vector<1x8xf32> to vector<16x8xf32>
    %527 = arith.addf %524, %526 : vector<16x8xf32>
    %528 = vector.shape_cast %527 : vector<16x8xf32> to vector<2x8x8xf32>
    "tpu.trace_start"() <{level = 10 : i32, message = "bqd,bkd->bqk"}> : () -> ()
    %cst_234 = arith.constant dense<0.000000e+00> : vector<2x8x8xf32>
    %529 = tpu.matmul %518, %523, %cst_234 {dimension_numbers = #tpu.dot_dimension_numbers<[2], [2], [1], [1], [0, 0, 0, 1, 1, 1], [0], [0]>} : vector<2x8x8xf32>, vector<2x8x8xf32>, vector<2x8x8xf32> -> vector<2x8x8xf32>
    "tpu.trace_stop"() : () -> ()
    %c1376 = arith.constant 1376 : index
    %c0_235 = arith.constant 0 : index
    %530 = vector.load %arg4[%c1376, %c0_235] : memref<1856x128xf32, #tpu.memory_space<vmem>>, vector<32x8xf32>
    %c1504 = arith.constant 1504 : index
    %c0_236 = arith.constant 0 : index
    %531 = vector.load %arg4[%c1504, %c0_236] : memref<1856x128xf32, #tpu.memory_space<vmem>>, vector<32x8xf32>
    %c1632 = arith.constant 1632 : index
    %c0_237 = arith.constant 0 : index
    %532 = vector.load %arg4[%c1632, %c0_237] : memref<1856x128xf32, #tpu.memory_space<vmem>>, vector<32x8xf32>
    %cst_238 = arith.constant dense<0.000000e+00> : vector<16x8xf32>
    %533 = tpu.matmul %510, %530, %cst_238 {dimension_numbers = #tpu.dot_dimension_numbers<[1], [0], [0], [1], [0, 0, 1, 1], [], []>} : vector<16x32xf32>, vector<32x8xf32>, vector<16x8xf32> -> vector<16x8xf32>
    %c47 = arith.constant 47 : index
    %c0_239 = arith.constant 0 : index
    %534 = vector.load %arg5[%c47, %c0_239] : memref<70x128xf32, #tpu.memory_space<vmem>>, vector<1x8xf32>
    %535 = vector.broadcast %534 : vector<1x8xf32> to vector<16x8xf32>
    %536 = arith.addf %533, %535 : vector<16x8xf32>
    %537 = vector.shape_cast %536 : vector<16x8xf32> to vector<2x8x8xf32>
    %cst_240 = arith.constant dense<0.000000e+00> : vector<16x8xf32>
    %538 = tpu.matmul %1, %531, %cst_240 {dimension_numbers = #tpu.dot_dimension_numbers<[1], [0], [0], [1], [0, 0, 1, 1], [], []>} : vector<16x32xf32>, vector<32x8xf32>, vector<16x8xf32> -> vector<16x8xf32>
    %c51 = arith.constant 51 : index
    %c0_241 = arith.constant 0 : index
    %539 = vector.load %arg5[%c51, %c0_241] : memref<70x128xf32, #tpu.memory_space<vmem>>, vector<1x8xf32>
    %540 = vector.broadcast %539 : vector<1x8xf32> to vector<16x8xf32>
    %541 = arith.addf %538, %540 : vector<16x8xf32>
    %542 = vector.shape_cast %541 : vector<16x8xf32> to vector<2x8x8xf32>
    %cst_242 = arith.constant dense<0.000000e+00> : vector<16x8xf32>
    %543 = tpu.matmul %1, %532, %cst_242 {dimension_numbers = #tpu.dot_dimension_numbers<[1], [0], [0], [1], [0, 0, 1, 1], [], []>} : vector<16x32xf32>, vector<32x8xf32>, vector<16x8xf32> -> vector<16x8xf32>
    %c55 = arith.constant 55 : index
    %c0_243 = arith.constant 0 : index
    %544 = vector.load %arg5[%c55, %c0_243] : memref<70x128xf32, #tpu.memory_space<vmem>>, vector<1x8xf32>
    %545 = vector.broadcast %544 : vector<1x8xf32> to vector<16x8xf32>
    %546 = arith.addf %543, %545 : vector<16x8xf32>
    %547 = vector.shape_cast %546 : vector<16x8xf32> to vector<2x8x8xf32>
    "tpu.trace_start"() <{level = 10 : i32, message = "bqd,bkd->bqk"}> : () -> ()
    %cst_244 = arith.constant dense<0.000000e+00> : vector<2x8x8xf32>
    %548 = tpu.matmul %537, %542, %cst_244 {dimension_numbers = #tpu.dot_dimension_numbers<[2], [2], [1], [1], [0, 0, 0, 1, 1, 1], [0], [0]>} : vector<2x8x8xf32>, vector<2x8x8xf32>, vector<2x8x8xf32> -> vector<2x8x8xf32>
    "tpu.trace_stop"() : () -> ()
    %c1408 = arith.constant 1408 : index
    %c0_245 = arith.constant 0 : index
    %549 = vector.load %arg4[%c1408, %c0_245] : memref<1856x128xf32, #tpu.memory_space<vmem>>, vector<32x8xf32>
    %c1536 = arith.constant 1536 : index
    %c0_246 = arith.constant 0 : index
    %550 = vector.load %arg4[%c1536, %c0_246] : memref<1856x128xf32, #tpu.memory_space<vmem>>, vector<32x8xf32>
    %c1664 = arith.constant 1664 : index
    %c0_247 = arith.constant 0 : index
    %551 = vector.load %arg4[%c1664, %c0_247] : memref<1856x128xf32, #tpu.memory_space<vmem>>, vector<32x8xf32>
    %cst_248 = arith.constant dense<0.000000e+00> : vector<16x8xf32>
    %552 = tpu.matmul %510, %549, %cst_248 {dimension_numbers = #tpu.dot_dimension_numbers<[1], [0], [0], [1], [0, 0, 1, 1], [], []>} : vector<16x32xf32>, vector<32x8xf32>, vector<16x8xf32> -> vector<16x8xf32>
    %c48 = arith.constant 48 : index
    %c0_249 = arith.constant 0 : index
    %553 = vector.load %arg5[%c48, %c0_249] : memref<70x128xf32, #tpu.memory_space<vmem>>, vector<1x8xf32>
    %554 = vector.broadcast %553 : vector<1x8xf32> to vector<16x8xf32>
    %555 = arith.addf %552, %554 : vector<16x8xf32>
    %556 = vector.shape_cast %555 : vector<16x8xf32> to vector<2x8x8xf32>
    %cst_250 = arith.constant dense<0.000000e+00> : vector<16x8xf32>
    %557 = tpu.matmul %1, %550, %cst_250 {dimension_numbers = #tpu.dot_dimension_numbers<[1], [0], [0], [1], [0, 0, 1, 1], [], []>} : vector<16x32xf32>, vector<32x8xf32>, vector<16x8xf32> -> vector<16x8xf32>
    %c52 = arith.constant 52 : index
    %c0_251 = arith.constant 0 : index
    %558 = vector.load %arg5[%c52, %c0_251] : memref<70x128xf32, #tpu.memory_space<vmem>>, vector<1x8xf32>
    %559 = vector.broadcast %558 : vector<1x8xf32> to vector<16x8xf32>
    %560 = arith.addf %557, %559 : vector<16x8xf32>
    %561 = vector.shape_cast %560 : vector<16x8xf32> to vector<2x8x8xf32>
    %cst_252 = arith.constant dense<0.000000e+00> : vector<16x8xf32>
    %562 = tpu.matmul %1, %551, %cst_252 {dimension_numbers = #tpu.dot_dimension_numbers<[1], [0], [0], [1], [0, 0, 1, 1], [], []>} : vector<16x32xf32>, vector<32x8xf32>, vector<16x8xf32> -> vector<16x8xf32>
    %c56 = arith.constant 56 : index
    %c0_253 = arith.constant 0 : index
    %563 = vector.load %arg5[%c56, %c0_253] : memref<70x128xf32, #tpu.memory_space<vmem>>, vector<1x8xf32>
    %564 = vector.broadcast %563 : vector<1x8xf32> to vector<16x8xf32>
    %565 = arith.addf %562, %564 : vector<16x8xf32>
    %566 = vector.shape_cast %565 : vector<16x8xf32> to vector<2x8x8xf32>
    "tpu.trace_start"() <{level = 10 : i32, message = "bqd,bkd->bqk"}> : () -> ()
    %cst_254 = arith.constant dense<0.000000e+00> : vector<2x8x8xf32>
    %567 = tpu.matmul %556, %561, %cst_254 {dimension_numbers = #tpu.dot_dimension_numbers<[2], [2], [1], [1], [0, 0, 0, 1, 1, 1], [0], [0]>} : vector<2x8x8xf32>, vector<2x8x8xf32>, vector<2x8x8xf32> -> vector<2x8x8xf32>
    "tpu.trace_stop"() : () -> ()
    %c1440 = arith.constant 1440 : index
    %c0_255 = arith.constant 0 : index
    %568 = vector.load %arg4[%c1440, %c0_255] : memref<1856x128xf32, #tpu.memory_space<vmem>>, vector<32x8xf32>
    %c1568 = arith.constant 1568 : index
    %c0_256 = arith.constant 0 : index
    %569 = vector.load %arg4[%c1568, %c0_256] : memref<1856x128xf32, #tpu.memory_space<vmem>>, vector<32x8xf32>
    %c1696 = arith.constant 1696 : index
    %c0_257 = arith.constant 0 : index
    %570 = vector.load %arg4[%c1696, %c0_257] : memref<1856x128xf32, #tpu.memory_space<vmem>>, vector<32x8xf32>
    %cst_258 = arith.constant dense<0.000000e+00> : vector<16x8xf32>
    %571 = tpu.matmul %510, %568, %cst_258 {dimension_numbers = #tpu.dot_dimension_numbers<[1], [0], [0], [1], [0, 0, 1, 1], [], []>} : vector<16x32xf32>, vector<32x8xf32>, vector<16x8xf32> -> vector<16x8xf32>
    %c49 = arith.constant 49 : index
    %c0_259 = arith.constant 0 : index
    %572 = vector.load %arg5[%c49, %c0_259] : memref<70x128xf32, #tpu.memory_space<vmem>>, vector<1x8xf32>
    %573 = vector.broadcast %572 : vector<1x8xf32> to vector<16x8xf32>
    %574 = arith.addf %571, %573 : vector<16x8xf32>
    %575 = vector.shape_cast %574 : vector<16x8xf32> to vector<2x8x8xf32>
    %cst_260 = arith.constant dense<0.000000e+00> : vector<16x8xf32>
    %576 = tpu.matmul %1, %569, %cst_260 {dimension_numbers = #tpu.dot_dimension_numbers<[1], [0], [0], [1], [0, 0, 1, 1], [], []>} : vector<16x32xf32>, vector<32x8xf32>, vector<16x8xf32> -> vector<16x8xf32>
    %c53 = arith.constant 53 : index
    %c0_261 = arith.constant 0 : index
    %577 = vector.load %arg5[%c53, %c0_261] : memref<70x128xf32, #tpu.memory_space<vmem>>, vector<1x8xf32>
    %578 = vector.broadcast %577 : vector<1x8xf32> to vector<16x8xf32>
    %579 = arith.addf %576, %578 : vector<16x8xf32>
    %580 = vector.shape_cast %579 : vector<16x8xf32> to vector<2x8x8xf32>
    %cst_262 = arith.constant dense<0.000000e+00> : vector<16x8xf32>
    %581 = tpu.matmul %1, %570, %cst_262 {dimension_numbers = #tpu.dot_dimension_numbers<[1], [0], [0], [1], [0, 0, 1, 1], [], []>} : vector<16x32xf32>, vector<32x8xf32>, vector<16x8xf32> -> vector<16x8xf32>
    %c57 = arith.constant 57 : index
    %c0_263 = arith.constant 0 : index
    %582 = vector.load %arg5[%c57, %c0_263] : memref<70x128xf32, #tpu.memory_space<vmem>>, vector<1x8xf32>
    %583 = vector.broadcast %582 : vector<1x8xf32> to vector<16x8xf32>
    %584 = arith.addf %581, %583 : vector<16x8xf32>
    %585 = vector.shape_cast %584 : vector<16x8xf32> to vector<2x8x8xf32>
    "tpu.trace_start"() <{level = 10 : i32, message = "bqd,bkd->bqk"}> : () -> ()
    %cst_264 = arith.constant dense<0.000000e+00> : vector<2x8x8xf32>
    %586 = tpu.matmul %575, %580, %cst_264 {dimension_numbers = #tpu.dot_dimension_numbers<[2], [2], [1], [1], [0, 0, 0, 1, 1, 1], [0], [0]>} : vector<2x8x8xf32>, vector<2x8x8xf32>, vector<2x8x8xf32> -> vector<2x8x8xf32>
    "tpu.trace_stop"() : () -> ()
    %587 = vector.shape_cast %529 : vector<2x8x8xf32> to vector<1x2x8x8xf32>
    %588 = vector.shape_cast %548 : vector<2x8x8xf32> to vector<1x2x8x8xf32>
    %589 = vector.shape_cast %567 : vector<2x8x8xf32> to vector<1x2x8x8xf32>
    %590 = vector.shape_cast %586 : vector<2x8x8xf32> to vector<1x2x8x8xf32>
    %591 = tpu.concatenate %587, %588, %589, %590 in 0 : vector<1x2x8x8xf32>, vector<1x2x8x8xf32>, vector<1x2x8x8xf32>, vector<1x2x8x8xf32> -> vector<4x2x8x8xf32>
    %cst_265 = arith.constant 0.353553385 : f32
    %592 = vector.broadcast %cst_265 : f32 to vector<4x2x8x8xf32>
    %593 = arith.mulf %591, %592 : vector<4x2x8x8xf32>
    %594 = vector.shape_cast %2 : vector<2x1x8xf32> to vector<1x2x1x8xf32>
    %595 = vector.broadcast %594 : vector<1x2x1x8xf32> to vector<4x2x8x8xf32>
    %596 = arith.addf %593, %595 : vector<4x2x8x8xf32>
    %cst_266 = arith.constant dense<0xFF800000> : vector<4x2x8xf32>
    %597 = vector.multi_reduction <maximumf>, %596, %cst_266 [3] : vector<4x2x8x8xf32> to vector<4x2x8xf32>
    %598 = vector.shape_cast %597 : vector<4x2x8xf32> to vector<4x2x8x1xf32>
    %599 = vector.broadcast %598 : vector<4x2x8x1xf32> to vector<4x2x8x8xf32>
    %600 = arith.subf %596, %599 : vector<4x2x8x8xf32>
    %601 = math.exp %600 : vector<4x2x8x8xf32>
    %cst_267 = arith.constant dense<0.000000e+00> : vector<4x2x8xf32>
    %602 = vector.multi_reduction <add>, %601, %cst_267 [3] : vector<4x2x8x8xf32> to vector<4x2x8xf32>
    %603 = vector.shape_cast %602 : vector<4x2x8xf32> to vector<4x2x8x1xf32>
    %604 = vector.broadcast %603 : vector<4x2x8x1xf32> to vector<4x2x8x8xf32>
    %605 = arith.divf %601, %604 : vector<4x2x8x8xf32>
    %cst_268 = arith.constant 0.000000e+00 : f32
    %606 = vector.broadcast %cst_268 : f32 to vector<16x32xf32>
    %607 = vector.extract_strided_slice %605 {offsets = [0, 0, 0, 0], sizes = [1, 2, 8, 8], strides = [1, 1, 1, 1]} : vector<4x2x8x8xf32> to vector<1x2x8x8xf32>
    %608 = vector.shape_cast %607 : vector<1x2x8x8xf32> to vector<2x8x8xf32>
    "tpu.trace_start"() <{level = 10 : i32, message = "bqk,bkd->bqd"}> : () -> ()
    %cst_269 = arith.constant dense<0.000000e+00> : vector<2x8x8xf32>
    %609 = tpu.matmul %608, %528, %cst_269 {dimension_numbers = #tpu.dot_dimension_numbers<[2], [1], [1], [2], [0, 0, 0, 1, 1, 2], [0], [0]>} : vector<2x8x8xf32>, vector<2x8x8xf32>, vector<2x8x8xf32> -> vector<2x8x8xf32>
    "tpu.trace_stop"() : () -> ()
    %c1728 = arith.constant 1728 : index
    %c0_270 = arith.constant 0 : index
    %610 = vector.load %arg4[%c1728, %c0_270] : memref<1856x128xf32, #tpu.memory_space<vmem>>, vector<8x32xf32>
    %611 = vector.shape_cast %609 : vector<2x8x8xf32> to vector<16x8xf32>
    %cst_271 = arith.constant dense<0.000000e+00> : vector<16x32xf32>
    %612 = tpu.matmul %611, %610, %cst_271 {dimension_numbers = #tpu.dot_dimension_numbers<[1], [0], [0], [1], [0, 0, 1, 1], [], []>} : vector<16x8xf32>, vector<8x32xf32>, vector<16x32xf32> -> vector<16x32xf32>
    %613 = arith.addf %606, %612 : vector<16x32xf32>
    %614 = vector.extract_strided_slice %605 {offsets = [1, 0, 0, 0], sizes = [1, 2, 8, 8], strides = [1, 1, 1, 1]} : vector<4x2x8x8xf32> to vector<1x2x8x8xf32>
    %615 = vector.shape_cast %614 : vector<1x2x8x8xf32> to vector<2x8x8xf32>
    "tpu.trace_start"() <{level = 10 : i32, message = "bqk,bkd->bqd"}> : () -> ()
    %cst_272 = arith.constant dense<0.000000e+00> : vector<2x8x8xf32>
    %616 = tpu.matmul %615, %547, %cst_272 {dimension_numbers = #tpu.dot_dimension_numbers<[2], [1], [1], [2], [0, 0, 0, 1, 1, 2], [0], [0]>} : vector<2x8x8xf32>, vector<2x8x8xf32>, vector<2x8x8xf32> -> vector<2x8x8xf32>
    "tpu.trace_stop"() : () -> ()
    %c1736 = arith.constant 1736 : index
    %c0_273 = arith.constant 0 : index
    %617 = vector.load %arg4[%c1736, %c0_273] : memref<1856x128xf32, #tpu.memory_space<vmem>>, vector<8x32xf32>
    %618 = vector.shape_cast %616 : vector<2x8x8xf32> to vector<16x8xf32>
    %cst_274 = arith.constant dense<0.000000e+00> : vector<16x32xf32>
    %619 = tpu.matmul %618, %617, %cst_274 {dimension_numbers = #tpu.dot_dimension_numbers<[1], [0], [0], [1], [0, 0, 1, 1], [], []>} : vector<16x8xf32>, vector<8x32xf32>, vector<16x32xf32> -> vector<16x32xf32>
    %620 = arith.addf %613, %619 : vector<16x32xf32>
    %621 = vector.extract_strided_slice %605 {offsets = [2, 0, 0, 0], sizes = [1, 2, 8, 8], strides = [1, 1, 1, 1]} : vector<4x2x8x8xf32> to vector<1x2x8x8xf32>
    %622 = vector.shape_cast %621 : vector<1x2x8x8xf32> to vector<2x8x8xf32>
    "tpu.trace_start"() <{level = 10 : i32, message = "bqk,bkd->bqd"}> : () -> ()
    %cst_275 = arith.constant dense<0.000000e+00> : vector<2x8x8xf32>
    %623 = tpu.matmul %622, %566, %cst_275 {dimension_numbers = #tpu.dot_dimension_numbers<[2], [1], [1], [2], [0, 0, 0, 1, 1, 2], [0], [0]>} : vector<2x8x8xf32>, vector<2x8x8xf32>, vector<2x8x8xf32> -> vector<2x8x8xf32>
    "tpu.trace_stop"() : () -> ()
    %c1744 = arith.constant 1744 : index
    %c0_276 = arith.constant 0 : index
    %624 = vector.load %arg4[%c1744, %c0_276] : memref<1856x128xf32, #tpu.memory_space<vmem>>, vector<8x32xf32>
    %625 = vector.shape_cast %623 : vector<2x8x8xf32> to vector<16x8xf32>
    %cst_277 = arith.constant dense<0.000000e+00> : vector<16x32xf32>
    %626 = tpu.matmul %625, %624, %cst_277 {dimension_numbers = #tpu.dot_dimension_numbers<[1], [0], [0], [1], [0, 0, 1, 1], [], []>} : vector<16x8xf32>, vector<8x32xf32>, vector<16x32xf32> -> vector<16x32xf32>
    %627 = arith.addf %620, %626 : vector<16x32xf32>
    %628 = vector.extract_strided_slice %605 {offsets = [3, 0, 0, 0], sizes = [1, 2, 8, 8], strides = [1, 1, 1, 1]} : vector<4x2x8x8xf32> to vector<1x2x8x8xf32>
    %629 = vector.shape_cast %628 : vector<1x2x8x8xf32> to vector<2x8x8xf32>
    "tpu.trace_start"() <{level = 10 : i32, message = "bqk,bkd->bqd"}> : () -> ()
    %cst_278 = arith.constant dense<0.000000e+00> : vector<2x8x8xf32>
    %630 = tpu.matmul %629, %585, %cst_278 {dimension_numbers = #tpu.dot_dimension_numbers<[2], [1], [1], [2], [0, 0, 0, 1, 1, 2], [0], [0]>} : vector<2x8x8xf32>, vector<2x8x8xf32>, vector<2x8x8xf32> -> vector<2x8x8xf32>
    "tpu.trace_stop"() : () -> ()
    %c1752 = arith.constant 1752 : index
    %c0_279 = arith.constant 0 : index
    %631 = vector.load %arg4[%c1752, %c0_279] : memref<1856x128xf32, #tpu.memory_space<vmem>>, vector<8x32xf32>
    %632 = vector.shape_cast %630 : vector<2x8x8xf32> to vector<16x8xf32>
    %cst_280 = arith.constant dense<0.000000e+00> : vector<16x32xf32>
    %633 = tpu.matmul %632, %631, %cst_280 {dimension_numbers = #tpu.dot_dimension_numbers<[1], [0], [0], [1], [0, 0, 1, 1], [], []>} : vector<16x8xf32>, vector<8x32xf32>, vector<16x32xf32> -> vector<16x32xf32>
    %634 = arith.addf %627, %633 : vector<16x32xf32>
    %c59 = arith.constant 59 : index
    %c0_281 = arith.constant 0 : index
    %635 = vector.load %arg5[%c59, %c0_281] : memref<70x128xf32, #tpu.memory_space<vmem>>, vector<1x32xf32>
    %636 = vector.broadcast %635 : vector<1x32xf32> to vector<16x32xf32>
    %637 = arith.addf %634, %636 : vector<16x32xf32>
    %638 = arith.addf %488, %637 : vector<16x32xf32>
    %c66 = arith.constant 66 : index
    %c0_282 = arith.constant 0 : index
    %639 = vector.load %arg5[%c66, %c0_282] : memref<70x128xf32, #tpu.memory_space<vmem>>, vector<1x32xf32>
    %c67 = arith.constant 67 : index
    %c0_283 = arith.constant 0 : index
    %640 = vector.load %arg5[%c67, %c0_283] : memref<70x128xf32, #tpu.memory_space<vmem>>, vector<1x32xf32>
    %cst_284 = arith.constant dense<0.000000e+00> : vector<16xf32>
    %641 = vector.multi_reduction <add>, %638, %cst_284 [1] : vector<16x32xf32> to vector<16xf32>
    %642 = vector.shape_cast %641 : vector<16xf32> to vector<16x1xf32>
    %cst_285 = arith.constant 3.200000e+01 : f32
    %643 = vector.broadcast %cst_285 : f32 to vector<16x1xf32>
    %644 = arith.divf %642, %643 : vector<16x1xf32>
    %645 = vector.broadcast %644 : vector<16x1xf32> to vector<16x32xf32>
    %646 = arith.subf %638, %645 : vector<16x32xf32>
    %647 = arith.mulf %646, %646 : vector<16x32xf32>
    %cst_286 = arith.constant dense<0.000000e+00> : vector<16xf32>
    %648 = vector.multi_reduction <add>, %647, %cst_286 [1] : vector<16x32xf32> to vector<16xf32>
    %649 = vector.shape_cast %648 : vector<16xf32> to vector<16x1xf32>
    %cst_287 = arith.constant 3.100000e+01 : f32
    %650 = vector.broadcast %cst_287 : f32 to vector<16x1xf32>
    %651 = arith.divf %649, %650 : vector<16x1xf32>
    %652 = vector.broadcast %639 : vector<1x32xf32> to vector<16x32xf32>
    %653 = arith.mulf %652, %646 : vector<16x32xf32>
    %cst_288 = arith.constant 9.99999997E-7 : f32
    %654 = vector.broadcast %cst_288 : f32 to vector<16x1xf32>
    %655 = arith.addf %651, %654 : vector<16x1xf32>
    %656 = math.rsqrt %655 : vector<16x1xf32>
    %657 = vector.broadcast %656 : vector<16x1xf32> to vector<16x32xf32>
    %658 = arith.mulf %653, %657 : vector<16x32xf32>
    %659 = vector.broadcast %640 : vector<1x32xf32> to vector<16x32xf32>
    %660 = arith.addf %658, %659 : vector<16x32xf32>
    %c1760 = arith.constant 1760 : index
    %c0_289 = arith.constant 0 : index
    %661 = vector.load %arg4[%c1760, %c0_289] : memref<1856x128xf32, #tpu.memory_space<vmem>>, vector<32x64xf32>
    %cst_290 = arith.constant dense<0.000000e+00> : vector<16x64xf32>
    %662 = tpu.matmul %660, %661, %cst_290 {dimension_numbers = #tpu.dot_dimension_numbers<[1], [0], [0], [1], [0, 0, 1, 1], [], []>} : vector<16x32xf32>, vector<32x64xf32>, vector<16x64xf32> -> vector<16x64xf32>
    %c60 = arith.constant 60 : index
    %c0_291 = arith.constant 0 : index
    %663 = vector.load %arg5[%c60, %c0_291] : memref<70x128xf32, #tpu.memory_space<vmem>>, vector<1x64xf32>
    %664 = vector.broadcast %663 : vector<1x64xf32> to vector<16x64xf32>
    %665 = arith.addf %662, %664 : vector<16x64xf32>
    %cst_292 = arith.constant 0.000000e+00 : f32
    %666 = vector.broadcast %cst_292 : f32 to vector<16x64xf32>
    %667 = arith.maximumf %665, %666 : vector<16x64xf32>
    %c1792 = arith.constant 1792 : index
    %c0_293 = arith.constant 0 : index
    %668 = vector.load %arg4[%c1792, %c0_293] : memref<1856x128xf32, #tpu.memory_space<vmem>>, vector<64x32xf32>
    %cst_294 = arith.constant dense<0.000000e+00> : vector<16x32xf32>
    %669 = tpu.matmul %667, %668, %cst_294 {dimension_numbers = #tpu.dot_dimension_numbers<[1], [0], [0], [1], [0, 0, 1, 1], [], []>} : vector<16x64xf32>, vector<64x32xf32>, vector<16x32xf32> -> vector<16x32xf32>
    %670 = arith.addf %638, %669 : vector<16x32xf32>
    %c61 = arith.constant 61 : index
    %c0_295 = arith.constant 0 : index
    %671 = vector.load %arg5[%c61, %c0_295] : memref<70x128xf32, #tpu.memory_space<vmem>>, vector<1x32xf32>
    %672 = vector.broadcast %671 : vector<1x32xf32> to vector<16x32xf32>
    %673 = arith.addf %670, %672 : vector<16x32xf32>
    %c68 = arith.constant 68 : index
    %c0_296 = arith.constant 0 : index
    %674 = vector.load %arg5[%c68, %c0_296] : memref<70x128xf32, #tpu.memory_space<vmem>>, vector<1x32xf32>
    %c69 = arith.constant 69 : index
    %c0_297 = arith.constant 0 : index
    %675 = vector.load %arg5[%c69, %c0_297] : memref<70x128xf32, #tpu.memory_space<vmem>>, vector<1x32xf32>
    %cst_298 = arith.constant dense<0.000000e+00> : vector<16xf32>
    %676 = vector.multi_reduction <add>, %673, %cst_298 [1] : vector<16x32xf32> to vector<16xf32>
    %677 = vector.shape_cast %676 : vector<16xf32> to vector<16x1xf32>
    %cst_299 = arith.constant 3.200000e+01 : f32
    %678 = vector.broadcast %cst_299 : f32 to vector<16x1xf32>
    %679 = arith.divf %677, %678 : vector<16x1xf32>
    %680 = vector.broadcast %679 : vector<16x1xf32> to vector<16x32xf32>
    %681 = arith.subf %673, %680 : vector<16x32xf32>
    %682 = arith.mulf %681, %681 : vector<16x32xf32>
    %cst_300 = arith.constant dense<0.000000e+00> : vector<16xf32>
    %683 = vector.multi_reduction <add>, %682, %cst_300 [1] : vector<16x32xf32> to vector<16xf32>
    %684 = vector.shape_cast %683 : vector<16xf32> to vector<16x1xf32>
    %cst_301 = arith.constant 3.100000e+01 : f32
    %685 = vector.broadcast %cst_301 : f32 to vector<16x1xf32>
    %686 = arith.divf %684, %685 : vector<16x1xf32>
    %687 = vector.broadcast %674 : vector<1x32xf32> to vector<16x32xf32>
    %688 = arith.mulf %687, %681 : vector<16x32xf32>
    %cst_302 = arith.constant 9.99999997E-7 : f32
    %689 = vector.broadcast %cst_302 : f32 to vector<16x1xf32>
    %690 = arith.addf %686, %689 : vector<16x1xf32>
    %691 = math.rsqrt %690 : vector<16x1xf32>
    %692 = vector.broadcast %691 : vector<16x1xf32> to vector<16x32xf32>
    %693 = arith.mulf %688, %692 : vector<16x32xf32>
    %694 = vector.broadcast %675 : vector<1x32xf32> to vector<16x32xf32>
    %695 = arith.addf %693, %694 : vector<16x32xf32>
    %c0_303 = arith.constant 0 : index
    %c0_304 = arith.constant 0 : index
    %696 = vector.load %arg6[%c0_303, %c0_304] : memref<16x32xf32, #tpu.memory_space<vmem>>, vector<16x32xf32>
    tpu.vector_store %arg6[%c0_303, %c0_304], %695 {strides = array<i32>} : memref<16x32xf32, #tpu.memory_space<vmem>>, vector<16x32xf32>,
    return
  }
}

</mosaic_0001>

<bundles_post_ra>
// kernel: decoder_forward.1
= control target key start
LH: loop header
LB: loop body
LE: loop exit
PB: predicated region body
PF: predicated region fallthrough
CT: control target
= control target key end

     0   :  { %11 = vsyncpa [#allocation3], 0  ;;  %s14930_s0 = inlined_call_operand.vmem [shape: f32[16,32], index: 0, kind: input, shape index: {}]   ;;  %s14931_s1 = inlined_call_operand.vmem [shape: f32[16,32], index: 1, kind: input, shape index: {}]   ;;  %s14932_s2 = inlined_call_operand.vmem [shape: f32[2,1,8], index: 2, kind: input, shape index: {}]   ;;  %s14933_s3 = inlined_call_operand.vmem [shape: f32[2,8,8], index: 3, kind: input, shape index: {}]   ;;  %s14934_s4 = inlined_call_operand.hbm [shape: f32[1856,128], index: 4, kind: input, shape index: {}]   ;;  %s14935_s5 = inlined_call_operand.hbm [shape: f32[70,128], index: 5, kind: input, shape index: {}]   ;;  %s14936_s6 = inlined_call_operand.hbm [shape: f32[16,32], index: 6, kind: output, shape index: {}]  }
   0x1   :  { %12 = vsyncpa [#allocation6], 0 }
   0x2   :  { %13 = vsyncpa [#allocation4], 0  ;;  %s13852_s21 = smov [#allocation2]   ;;  %s13780_s25 = scalar_lea.hbm %s14934_s4, 29696 }
   0x3   :  { %s27_s22 = sshll.u32 %s13852_s21, 4  ;;  %p13781_p0 = scmp.ne.s32.totalorder %s14934_s4, %s13780_s25  ;;  %s28_s22 = int_to_ptr.vmem [resolvable:$true] %s27_s22 }
   0x4   :  { %p13784_p1 = scmp.lt.u32.totalorder %s13780_s25, %s14934_s4 }
   0x6   :  { %p13786_p2 = pnand %p13784_p1, %p13781_p0 }
   0x8   :  { %13789 = shalt.err (!%p13786_p2)
}
   0x9   :  { %s13790_s30 = scalar_lea.vmem %s28_s22, 29696  ;;  %p13795_p4 = scmp.lt.s32.totalorder %s28_s22, %s28_s22 }
   0xa   :  { %p13791_p3 = scmp.ne.s32.totalorder %s28_s22, %s13790_s30  ;;  %p13796_p5 = scmp.lt.s32.totalorder %s13790_s30, %s13790_s30 }
   0xc   :  { %p13797_p6 = por %p13796_p5, %p13795_p4 }
   0xe   :  { %p13798_p7 = pnand %p13797_p6, %p13791_p3 }
  0x10   :  { %13801 = shalt.err (!%p13798_p7)
}
  0x11   :  { %s13853_s7 = smov 128   ;;  %s13854_s8 = smov 8  }
  0x12   :  { %33 = dma.hbm_to_vmem [thread:$0]  %s14934_s4, 29696, %s28_s22, [#allocation3], %s13853_s7, %s13853_s7, %s13854_s8  }
  0x13   :  { %s13855_s11 = smov [#allocation5]   ;;  %s13802_s15 = scalar_lea.hbm %s14935_s5, 1152 }
  0x14   :  { %s39_s12 = sshll.u32 %s13855_s11, 4  ;;  %p13803_p8 = scmp.ne.s32.totalorder %s14935_s5, %s13802_s15  ;;  %s40_s12 = int_to_ptr.vmem [resolvable:$true] %s39_s12 }
  0x15   :  { %p13806_p9 = scmp.lt.u32.totalorder %s13802_s15, %s14935_s5 }
  0x17   :  { %p13808_p10 = pnand %p13806_p9, %p13803_p8 }
  0x19   :  { %13811 = shalt.err (!%p13808_p10)
}
  0x1a   :  { %s13812_s20 = scalar_lea.vmem %s40_s12, 1152  ;;  %p13817_p12 = scmp.lt.s32.totalorder %s40_s12, %s40_s12 }
  0x1b   :  { %p13813_p11 = scmp.ne.s32.totalorder %s40_s12, %s13812_s20  ;;  %p13818_p13 = scmp.lt.s32.totalorder %s13812_s20, %s13812_s20 }
  0x1d   :  { %p13819_p0 = por %p13818_p13, %p13817_p12 }
  0x1f   :  { %p13820_p1 = pnand %p13819_p0, %p13813_p11 }
  0x21   :  { %13823 = shalt.err (!%p13820_p1)
}
  0x22   :  { %45 = dma.hbm_to_vmem [thread:$0]  %s14935_s5, 1152, %s40_s12, [#allocation6], %s13853_s7, %s13853_s7, %s13854_s8  }
  0x23   :  { %13846 = dma.done.wait [#allocation3], 29696  }
  0x24   :  { %13847 = vsyncadd [#allocation3], 4294937600 }
  0x25   :  { %13848 = dma.done.wait [#allocation6], 1152  }
  0x26   :  { %13849 = vsyncadd [#allocation6], 4294966144  ;;  %vm62_vm0 = vcmask 261120   ;;  %v13927_v0 = vld [vmem:[%s14930_s0] sm:$0xff]  ;;  %v13932_v1 = vld [vmem:[%s14930_s0 + $0x8] sm:$0xff]  ;;  %vm13857_vm1 = vmmov 0  }
  0x27   :  { %v63_v2 = vsel %vm62_vm0, %v13927_v0, 0.0  ;;  %v66_v3 = vsel %vm62_vm0, %v13932_v1, 0.0  ;;  %v103_v14 = vld [vmem:[#allocation2] sm:$0xff]  ;;  %v104_v15 = vld [vmem:[#allocation2 + $0x8] sm:$0xff]  ;;  %v105_v20 = vld [vmem:[#allocation2 + $0x10] sm:$0xff]  ;;  %vm361_vm2 = vcmask 64512  }
  0x28   :  { %64 = vadd.xlane.f32.xlu0 %v63_v2  ;;  %v111_v16 = vld [vmem:[#allocation2 + $0x100] sm:$0xff]  ;;  %v13155_v17 = vpack.c.bf16 %v104_v15, %v103_v14  ;;  %v112_v18 = vld [vmem:[#allocation2 + $0x108] sm:$0xff]  ;;  %v106_v21 = vld [vmem:[#allocation2 + $0x18] sm:$0xff]  ;;  %vm5604_vm3 = vcmask 523264  }
  0x29   :  { %v13171_v19 = vpack.c.bf16 %v112_v18, %v111_v16  ;;  %v113_v22 = vld [vmem:[#allocation2 + $0x110] sm:$0xff]  ;;  %v13159_v23 = vpack.c.bf16 %v106_v21, %v105_v20  ;;  %v114_v24 = vld [vmem:[#allocation2 + $0x118] sm:$0xff]  ;;  %v107_v26 = vld [vmem:[#allocation2 + $0x80] sm:$0xff] }
  0x2a   :  { %13156 = vmatprep.subr.bf16.mxu1 %v13155_v17  ;;  %v13175_v25 = vpack.c.bf16 %v114_v24, %v113_v22  ;;  %v108_v27 = vld [vmem:[#allocation2 + $0x88] sm:$0xff]  ;;  %v514_v28 = vld [vmem:[#allocation2 + $0x20] sm:$0xff]  ;;  %v11367_v38 = vld [vmem:[#allocation5 + $0x1c] ss:$0 sm:$0xff]  ;;  %v13856_v22 = vmov 0.0  }
  0x2b   :  { %13172 = vmatprep.subr.bf16.mxu0 %v13171_v19  ;;  %13158 = vmatpush3.bf16.msra.mxu1 %v13155_v17  ;;  %v13163_v29 = vpack.c.bf16 %v108_v27, %v107_v26  ;;  %v515_v30 = vld [vmem:[#allocation2 + $0x28] sm:$0xff]  ;;  %v11368_v41 = vld [vmem:[#allocation5 + $0x1d] ss:$0 sm:$0xff]  ;;  %v109_v46 = vld [vmem:[#allocation2 + $0x90] sm:$0xff] }
  0x2c   :  { %67 = vadd.xlane.f32.xlu0 %v66_v3  ;;  %13174 = vmatpush3.bf16.msra.mxu0 %v13171_v19  ;;  %v13179_v31 = vpack.c.bf16 %v515_v30, %v514_v28  ;;  %v110_v48 = vld [vmem:[#allocation2 + $0x98] sm:$0xff]  ;;  %v516_v49 = vld [vmem:[#allocation2 + $0x30] sm:$0xff]  ;;  %v522_v54 = vld [vmem:[#allocation2 + $0x120] sm:$0xff] }
  0x2d   :  { %13160 = vmatprep.subr.bf16.mxu1 %v13159_v23  ;;  %13176 = vmatprep.subr.bf16.mxu0 %v13175_v25  ;;  %v517_v50 = vld [vmem:[#allocation2 + $0x38] sm:$0xff]  ;;  %v13167_v52 = vpack.c.bf16 %v110_v48, %v109_v46  ;;  %v523_v55 = vld [vmem:[#allocation2 + $0x128] sm:$0xff]  ;;  %v524_v57 = vld [vmem:[#allocation2 + $0x130] sm:$0xff] }
  0x2e   :  { %v13183_v53 = vpack.c.bf16 %v517_v50, %v516_v49  ;;  %v13195_v56 = vpack.c.bf16 %v523_v55, %v522_v54  ;;  %v525_v58 = vld [vmem:[#allocation2 + $0x138] sm:$0xff]  ;;  %v918_v60 = vld [vmem:[#allocation2 + $0x40] sm:$0xff]  ;;  %v919_v61 = vld [vmem:[#allocation2 + $0x48] sm:$0xff] }
  0x2f   :  { %13162 = vmatpush3.bf16.msra.mxu1 %v13159_v23  ;;  %v13199_v59 = vpack.c.bf16 %v525_v58, %v524_v57  ;;  %v13203_v62 = vpack.c.bf16 %v919_v61, %v918_v60  ;;  %v920_v63 = vld [vmem:[#allocation2 + $0x50] sm:$0xff]  ;;  %v921_v2 = vld [vmem:[#allocation2 + $0x58] sm:$0xff]  ;;  %v1330_v16 = vld [vmem:[#allocation2 + $0x160] sm:$0xff] }
  0x30   :  { %13178 = vmatpush3.bf16.msra.mxu0 %v13175_v25  ;;  %13164 = vmatprep.subr.bf16.mxu1 %v13163_v29  ;;  %v13207_v3 = vpack.c.bf16 %v921_v2, %v920_v63  ;;  %v1325_v14 = vld [vmem:[#allocation2 + $0x78] sm:$0xff]  ;;  %v1331_v17 = vld [vmem:[#allocation2 + $0x168] sm:$0xff]  ;;  %v1332_v19 = vld [vmem:[#allocation2 + $0x170] sm:$0xff] }
  0x31   :  { %13180 = vmatprep.subr.bf16.mxu0 %v13179_v31  ;;  %v13243_v18 = vpack.c.bf16 %v1331_v17, %v1330_v16  ;;  %v1333_v20 = vld [vmem:[#allocation2 + $0x178] sm:$0xff]  ;;  %v11375_v23 = vld [vmem:[#allocation5 + $0x8] ss:$0 sm:$0xff]  ;;  %v11372_v30 = vld [vmem:[#allocation5 + $0x4] ss:$0 sm:$0xff] }
  0x32   :  { %v13247_v21 = vpack.c.bf16 %v1333_v20, %v1332_v19  ;;  %v14028_v58 = vld [vmem:[#allocation5 + $0xb] ss:$0 sm:$0xff]  ;;  %v14038_v63 = vld [vmem:[%s14933_s3] sm:$0xff] }
  0x33   :  { %v922_v17 = vld [vmem:[#allocation2 + $0xc0] sm:$0xff] }
  0xb5   :  { %v65_v4 = vpop.xlane.xlu0 %64 }
  0xb6   :  { %v70_v5 = vmul.f32 0.03125, %v65_v4  ;;  %v926_v4 = vld [vmem:[#allocation2 + $0x140] sm:$0xff] }
  0xb8   :  { %v72_v6 = vsub.f32 %v13927_v0, %v70_v5  ;;  %v927_v5 = vld [vmem:[#allocation2 + $0x148] sm:$0xff] }
  0xb9   :  { %v68_v7 = vpop.xlane.xlu0 %67 }
  0xba   :  { %v71_v8 = vmul.f32 0.03125, %v68_v7  ;;  %v74_v9 = vmul.f32 %v72_v6, %v72_v6  ;;  %v89_v39 = vmul.f32 %v11367_v38, %v72_v6  ;;  %v13219_v6 = vpack.c.bf16 %v927_v5, %v926_v4  ;;  %v928_v7 = vld [vmem:[#allocation2 + $0x150] sm:$0xff] }
  0xbc   :  { %v73_v10 = vsub.f32 %v13932_v1, %v71_v8  ;;  %v76_v11 = vsel %vm62_vm0, %v74_v9, 0.0  ;;  %v929_v8 = vld [vmem:[#allocation2 + $0x158] sm:$0xff] }
  0xbd   :  { %77 = vadd.xlane.f32.xlu1 %v76_v11  ;;  %v13223_v9 = vpack.c.bf16 %v929_v8, %v928_v7  ;;  %v1323_v11 = vld [vmem:[#allocation2 + $0x68] sm:$0xff] }
  0xbe   :  { %v75_v12 = vmul.f32 %v73_v10, %v73_v10  ;;  %v90_v43 = vmul.f32 %v11367_v38, %v73_v10  ;;  %v1322_v10 = vld [vmem:[#allocation2 + $0x60] sm:$0xff]  ;;  %v519_v38 = vld [vmem:[#allocation2 + $0xa8] sm:$0xff] }
  0xc0   :  { %v79_v13 = vsel %vm62_vm0, %v75_v12, 0.0  ;;  %v13227_v12 = vpack.c.bf16 %v1323_v11, %v1322_v10 }
  0xc1   :  { %80 = vadd.xlane.f32.xlu1 %v79_v13  ;;  %v1324_v13 = vld [vmem:[#allocation2 + $0x70] sm:$0xff] }
  0xc2   :  { %v13231_v15 = vpack.c.bf16 %v1325_v14, %v1324_v13 }
 0x14a   :  { %v78_v32 = vpop.xlane.xlu1 %77 }
 0x14b   :  { %v83_v33 = vmul.f32 0.032258064, %v78_v32 }
 0x14d   :  { %v91_v34 = vadd.f32 1e-06, %v83_v33 }
 0x14e   :  { %v81_v35 = vpop.xlane.xlu1 %80 }
 0x14f   :  { %13618 = vrsqrt.f32 %v91_v34  ;;  %v84_v36 = vmul.f32 0.032258064, %v81_v35  ;;  %v11369_v35 = vld [vmem:[#allocation5] ss:$0 sm:$0xff] }
 0x151   :  { %v92_v37 = vadd.f32 1e-06, %v84_v36 }
 0x153   :  { %13620 = vrsqrt.f32 %v92_v37  ;;  %v518_v37 = vld [vmem:[#allocation2 + $0xa0] sm:$0xff] }
 0x159   :  { %v13619_v40 = vpop.eup %13618 }
 0x15a   :  { %v95_v42 = vmul.f32 %v13619_v40, %v89_v39  ;;  %v13187_v40 = vpack.c.bf16 %v519_v38, %v518_v37  ;;  %v11398_v38 = vld [vmem:[#allocation5 + $0x6] ss:$0 sm:$0xff] }
 0x15c   :  { %v13942_v44 = vadd.f32 %v11368_v41, %v95_v42  ;;  %v520_v42 = vld [vmem:[#allocation2 + $0xb0] sm:$0xff] }
 0x15d   :  { %v13621_v45 = vpop.eup %13620 }
 0x15e   :  { %v96_v47 = vmul.f32 %v13621_v45, %v90_v43  ;;  %12175 = vmatprep.mubr.msk.f32.mxu1 %vm62_vm0, %v13942_v44  ;;  %12197 = vmatprep.mubr.msk.f32.mxu0 %vm62_vm0, %v13942_v44  ;;  %v521_v43 = vld [vmem:[#allocation2 + $0xb8] sm:$0xff] }
 0x15f   :  { %v13191_v48 = vpack.c.bf16 %v521_v43, %v520_v42  ;;  %v1326_v43 = vld [vmem:[#allocation2 + $0xe0] sm:$0xff] }
 0x160   :  { %v13948_v51 = vadd.f32 %v11368_v41, %v96_v47 }
 0x162   :  { %12176 = vmatmul.mubr.msk.f32.vlgmr.msra.gmra.mrb[0].mxu1 %vm62_vm0, %v13948_v51  ;;  %12198 = vmatmul.mubr.msk.f32.vlgmr.msra.gmra.mrb[0].mxu0 %vm62_vm0, %v13948_v51 }
 0x163   :  { %13166 = vmatpush3.bf16.msra.mxu1 %v13163_v29  ;;  %13182 = vmatpush3.bf16.msra.mxu0 %v13179_v31 }
 0x164   :  { %12186 = vmatprep.mubr.msk.f32.mxu1 %vm62_vm0, %v13942_v44  ;;  %12218 = vmatprep.mubr.msk.f32.mxu0 %vm62_vm0, %v13942_v44 }
 0x165   :  { %13168 = vmatprep.subr.bf16.mxu1 %v13167_v52  ;;  %13184 = vmatprep.subr.bf16.mxu0 %v13183_v53 }
 0x167   :  { %13170 = vmatpush3.bf16.msra.mxu1 %v13167_v52  ;;  %13186 = vmatpush3.bf16.msra.mxu0 %v13183_v53  ;;  %v14017_v52 = vld [vmem:[#allocation5 + $0xa] ss:$0 sm:$0xff] }
 0x168   :  { %13196 = vmatprep.subr.bf16.mxu0 %v13195_v56  ;;  %12200 = vmatprep.subr.mxu1 %v13856_v22 }
 0x16a   :  { %12187 = vmatmul.mubr.msk.f32.vlgmr.msra.gmra.mrb[2].mxu1 %vm62_vm0, %v13948_v51  ;;  %12219 = vmatmul.mubr.msk.f32.vlgmr.msra.gmra.mrb[2].mxu0 %vm62_vm0, %v13948_v51 }
 0x16b   :  { %13198 = vmatpush3.bf16.msra.mxu0 %v13195_v56  ;;  %12240 = vmatprep.mubr.msk.f32.mxu0 %vm62_vm0, %v13942_v44 }
 0x16c   :  { %13200 = vmatprep.subr.bf16.mxu0 %v13199_v59  ;;  %12202 = vmatprep.mubr.msk.f32.mxu1 %vm13857_vm1, %v13856_v22 }
 0x16f   :  { %13202 = vmatpush3.bf16.msra.mxu0 %v13199_v59 }
 0x170   :  { %13204 = vmatprep.subr.bf16.mxu0 %v13203_v62 }
 0x172   :  { %12241 = vmatmul.mubr.msk.f32.vlgmr.msra.gmra.mrb[4].mxu0 %vm62_vm0, %v13948_v51 }
 0x173   :  { %13206 = vmatpush3.bf16.msra.mxu0 %v13203_v62  ;;  %12261 = vmatprep.mubr.msk.f32.mxu0 %vm62_vm0, %v13942_v44 }
 0x174   :  { %13208 = vmatprep.subr.bf16.mxu0 %v13207_v3 }
 0x177   :  { %13210 = vmatpush3.bf16.msra.mxu0 %v13207_v3 }
 0x178   :  { %13220 = vmatprep.subr.bf16.mxu0 %v13219_v6 }
 0x17a   :  { %12262 = vmatmul.mubr.msk.f32.vlgmr.msra.gmra.mrb[6].mxu0 %vm62_vm0, %v13948_v51 }
 0x17b   :  { %13222 = vmatpush3.bf16.msra.mxu0 %v13219_v6  ;;  %12283 = vmatprep.mubr.msk.f32.mxu0 %vm62_vm0, %v13942_v44  ;;  %v14046_v6 = vld [vmem:[%s14933_s3 + $0x8] sm:$0xff] }
 0x17c   :  { %13224 = vmatprep.subr.bf16.mxu0 %v13223_v9 }
 0x17f   :  { %13226 = vmatpush3.bf16.msra.mxu0 %v13223_v9 }
 0x180   :  { %13228 = vmatprep.subr.bf16.mxu0 %v13227_v12 }
 0x182   :  { %12284 = vmatmul.mubr.msk.f32.vlgmr.msra.gmra.mrb[8].mxu0 %vm62_vm0, %v13948_v51 }
 0x183   :  { %13230 = vmatpush3.bf16.msra.mxu0 %v13227_v12  ;;  %12304 = vmatprep.mubr.msk.f32.mxu0 %vm62_vm0, %v13942_v44  ;;  %v11385_v12 = vld [vmem:[#allocation5 + $0x5] ss:$0 sm:$0xff] }
 0x184   :  { %13232 = vmatprep.subr.bf16.mxu0 %v13231_v15 }
 0x187   :  { %13234 = vmatpush3.bf16.msra.mxu0 %v13231_v15  ;;  %v11382_v15 = vld [vmem:[#allocation5 + $0x1] ss:$0 sm:$0xff] }
 0x188   :  { %13244 = vmatprep.subr.bf16.mxu0 %v13243_v18 }
 0x18a   :  { %12305 = vmatmul.mubr.msk.f32.vlgmr.msra.gmra.mrb[10].mxu0 %vm62_vm0, %v13948_v51 }
 0x18b   :  { %13246 = vmatpush3.bf16.msra.mxu0 %v13243_v18  ;;  %12326 = vmatprep.mubr.msk.f32.mxu0 %vm62_vm0, %v13942_v44  ;;  %v923_v18 = vld [vmem:[#allocation2 + $0xc8] sm:$0xff] }
 0x18c   :  { %13248 = vmatprep.subr.bf16.mxu0 %v13247_v21  ;;  %v13211_v20 = vpack.c.bf16 %v923_v18, %v922_v17 }
 0x18f   :  { %13250 = vmatpush3.bf16.msra.mxu0 %v13247_v21 }
 0x190   :  { %12339 = vmatprep.subr.mxu0 %v13856_v22 }
 0x192   :  { %12327 = vmatmul.mubr.msk.f32.vlgmr.msra.gmra.mrb[12].mxu0 %vm62_vm0, %v13948_v51 }
 0x193   :  { %12341 = vmatprep.mubr.msk.f32.mxu0 %vm13857_vm1, %v13856_v22 }
 0x235   :  { %v12177_v24 = vpop.f32.mrb[0].mxu1  ;;  %v12199_v25 = vpop.f32.mrb[0].mxu0 }
 0x236   :  { %v13988_v26 = vadd.f32 %v12199_v25, %v11375_v23  ;;  %v192_v27 = vpop.f32.mrb[1].mxu1  ;;  %v352_v28 = vpop.f32.mrb[1].mxu0  ;;  %v198_v46 = vadd.f32 %v12177_v24, %v11369_v35  ;;  %v925_v24 = vld [vmem:[#allocation2 + $0xd8] sm:$0xff] }
 0x237   :  { %v353_v29 = vadd.f32 %v11375_v23, %v352_v28  ;;  %v193_v39 = vadd.f32 %v11369_v35, %v192_v27  ;;  %v924_v23 = vld [vmem:[#allocation2 + $0xd0] sm:$0xff] }
 0x238   :  { %v13215_v27 = vpack.c.bf16 %v925_v24, %v924_v23 }
 0x239   :  { %12340 = vmatpush3.msra.mxu0 %v353_v29 }
 0x23a   :  { %12349 = vmatprep.subr.mxu0 %v13856_v22 }
 0x23d   :  { %v12188_v31 = vpop.f32.mrb[2].mxu1  ;;  %v13991_v32 = vpop.f32.mrb[2].mxu0 }
 0x23e   :  { %v272_v33 = vpop.f32.mrb[3].mxu1  ;;  %v13993_v34 = vpop.f32.mrb[3].mxu0  ;;  %v278_v41 = vadd.f32 %v12188_v31, %v11372_v30  ;;  %v603_v25 = vadd.f32 %v13991_v32, %v11382_v15 }
 0x23f   :  { %v273_v36 = vadd.f32 %v11372_v30, %v272_v33  ;;  %v598_v19 = vadd.f32 %v11382_v15, %v13993_v34 }
 0x241   :  { %12201 = vmatpush3.xpose.msk.msra.mxu1 %vm361_vm2, %v273_v36 }
 0x242   :  { %12205 = vmatprep.subr.mxu1 %v13856_v22 }
 0x244   :  { %12203 = vmatmul.mubr.msk.f32.vlgmr.msra.gmra.mrb[4].mxu1 %vm361_vm2, %v193_v39 }
 0x245   :  { %12206 = vmatpush3.xpose.msk.msra.mxu1 %vm361_vm2, %v278_v41  ;;  %v13999_v45 = vpop.f32.mrb[4].mxu0  ;;  %12207 = vmatprep.mubr.msk.f32.mxu1 %vm13857_vm1, %v13856_v22  ;;  %v11395_v41 = vld [vmem:[#allocation5 + $0x2] ss:$0 sm:$0xff] }
 0x246   :  { %v14003_v47 = vpop.f32.mrb[5].mxu0  ;;  %13188 = vmatprep.subr.bf16.mxu1 %v13187_v40 }
 0x248   :  { %12208 = vmatmul.mubr.msk.f32.vlgmr.msra.gmra.mrb[6].mxu1 %vm361_vm2, %v198_v46  ;;  %v1327_v46 = vld [vmem:[#allocation2 + $0xe8] sm:$0xff] }
 0x249   :  { %13190 = vmatpush3.bf16.msra.mxu1 %v13187_v40  ;;  %12229 = vmatprep.mubr.msk.f32.mxu1 %vm62_vm0, %v13942_v44 }
 0x24a   :  { %13192 = vmatprep.subr.bf16.mxu1 %v13191_v48 }
 0x24d   :  { %13194 = vmatpush3.bf16.msra.mxu1 %v13191_v48  ;;  %v14008_v49 = vpop.f32.mrb[6].mxu0 }
 0x24e   :  { %v14010_v50 = vpop.f32.mrb[7].mxu0  ;;  %12243 = vmatprep.subr.mxu1 %v13856_v22 }
 0x24f   :  { %v1002_v48 = vadd.f32 %v11395_v41, %v14010_v50 }
 0x250   :  { %12230 = vmatmul.mubr.msk.f32.vlgmr.msra.gmra.mrb[8].mxu1 %vm62_vm0, %v13948_v51 }
 0x251   :  { %12245 = vmatprep.mubr.msk.f32.mxu1 %vm13857_vm1, %v13856_v22 }
 0x255   :  { %v12285_v53 = vpop.f32.mrb[8].mxu0 }
 0x256   :  { %v14020_v54 = vadd.f32 %v12285_v53, %v14017_v52  ;;  %v14022_v55 = vpop.f32.mrb[9].mxu0  ;;  %v13235_v53 = vpack.c.bf16 %v1327_v46, %v1326_v43 }
 0x25d   :  { %v14024_v56 = vpop.f32.mrb[10].mxu0 }
 0x25e   :  { %v14026_v57 = vpop.f32.mrb[11].mxu0 }
 0x265   :  { %v12328_v59 = vpop.f32.mrb[12].mxu0 }
 0x266   :  { %v14031_v60 = vadd.f32 %v12328_v59, %v14028_v58  ;;  %v14033_v61 = vpop.f32.mrb[13].mxu0 }
 0x317   :  { %v434_v62 = vpop.f32.mrb[4].mxu1 }
 0x318   :  { %v1726_v2 = vmul.f32 0.35355338, %v434_v62  ;;  %v12204_v3 = vpop.f32.mrb[5].mxu1  ;;  %v1328_v62 = vld [vmem:[#allocation2 + $0xf0] sm:$0xff] }
 0x319   :  { %v1007_v3 = vadd.f32 %v14008_v49, %v11395_v41 }
 0x31a   :  { %v14041_v4 = vadd.f32 %v1726_v2, %v14038_v63  ;;  %v1329_v2 = vld [vmem:[#allocation2 + $0xf8] sm:$0xff] }
 0x31b   :  { %v510_v5 = vpop.f32.mrb[6].mxu1 }
 0x31c   :  { %v1727_v7 = vmul.f32 0.35355338, %v510_v5  ;;  %v12209_v8 = vpop.f32.mrb[7].mxu1  ;;  %v1742_v9 = vsel %vm361_vm2, %v14041_v4, -inf  ;;  %v13239_v5 = vpack.c.bf16 %v1329_v2, %v1328_v62 }
 0x31d   :  { %1743 = vmax.xlane.f32.xlu0 %v1742_v9 }
 0x31e   :  { %v14051_v10 = vadd.f32 %v1727_v7, %v14046_v6 }
 0x320   :  { %v1745_v11 = vsel %vm361_vm2, %v14051_v10, -inf }
 0x321   :  { %1746 = vmax.xlane.f32.xlu1 %v1745_v11 }
 0x323   :  { %v12231_v13 = vpop.f32.mrb[8].mxu1 }
 0x324   :  { %v677_v14 = vpop.f32.mrb[9].mxu1  ;;  %v683_v21 = vadd.f32 %v12231_v13, %v11385_v12 }
 0x325   :  { %v678_v16 = vadd.f32 %v11385_v12, %v677_v14 }
 0x327   :  { %12244 = vmatpush3.xpose.msk.msra.mxu1 %vm361_vm2, %v678_v16 }
 0x328   :  { %12248 = vmatprep.subr.mxu1 %v13856_v22 }
 0x32a   :  { %12246 = vmatmul.mubr.msk.f32.vlgmr.msra.gmra.mrb[10].mxu1 %vm361_vm2, %v598_v19 }
 0x32b   :  { %12249 = vmatpush3.xpose.msk.msra.mxu1 %vm361_vm2, %v683_v21  ;;  %12250 = vmatprep.mubr.msk.f32.mxu1 %vm13857_vm1, %v13856_v22 }
 0x32c   :  { %13212 = vmatprep.subr.bf16.mxu1 %v13211_v20 }
 0x32e   :  { %12251 = vmatmul.mubr.msk.f32.vlgmr.msra.gmra.mrb[12].mxu1 %vm361_vm2, %v603_v25 }
 0x32f   :  { %13214 = vmatpush3.bf16.msra.mxu1 %v13211_v20  ;;  %12272 = vmatprep.mubr.msk.f32.mxu1 %vm62_vm0, %v13942_v44 }
 0x330   :  { %13216 = vmatprep.subr.bf16.mxu1 %v13215_v27 }
 0x333   :  { %13218 = vmatpush3.bf16.msra.mxu1 %v13215_v27 }
 0x334   :  { %12286 = vmatprep.subr.mxu1 %v13856_v22 }
 0x336   :  { %12273 = vmatmul.mubr.msk.f32.vlgmr.msra.gmra.mrb[14].mxu1 %vm62_vm0, %v13948_v51 }
 0x337   :  { %12288 = vmatprep.mubr.msk.f32.mxu1 %vm13857_vm1, %v13856_v22 }
 0x3aa   :  { %v1744_v50 = vpop.xlane.xlu0 %1743 }
 0x3ab   :  { %v1766_v49 = vsub.f32 %v14041_v4, %v1744_v50 }
 0x3ad   :  { %v1774_v11 = vmul.f32 1.442695, %v1766_v49 }
 0x3ae   :  { %v1747_v7 = vpop.xlane.xlu1 %1746 }
 0x3af   :  { %v1767_v9 = vsub.f32 %v14051_v10, %v1747_v7  ;;  %13622 = vpow2.f32 %v1774_v11 }
 0x3b1   :  { %v1776_v13 = vmul.f32 1.442695, %v1767_v9 }
 0x3b3   :  { %13624 = vpow2.f32 %v1776_v13 }
 0x3b9   :  { %v13623_v23 = vpop.eup %13622 }
 0x3ba   :  { %v1790_v27 = vsel %vm361_vm2, %v13623_v23, 0.0 }
 0x3bd   :  { %v14096_v25 = vpop.eup %13624 }
 0x3fd   :  { %v838_v28 = vpop.f32.mrb[10].mxu1 }
 0x3fe   :  { %v1728_v29 = vmul.f32 0.35355338, %v838_v28  ;;  %v12247_v30 = vpop.f32.mrb[11].mxu1 }
 0x3ff   :  { %v11411_v30 = vld [vmem:[#allocation5 + $0x7] ss:$0 sm:$0xff] }
 0x400   :  { %v1736_v31 = vadd.f32 %v1728_v29, %v14038_v63 }
 0x401   :  { %v914_v32 = vpop.f32.mrb[12].mxu1 }
 0x402   :  { %v1729_v33 = vmul.f32 0.35355338, %v914_v32  ;;  %v12252_v34 = vpop.f32.mrb[13].mxu1  ;;  %v1748_v35 = vsel %vm361_vm2, %v1736_v31, -inf }
 0x403   :  { %1749 = vmax.xlane.f32.xlu0 %v1748_v35  ;;  %v1793_v34 = vsel %vm361_vm2, %v14096_v25, 0.0 }
 0x404   :  { %v1737_v36 = vadd.f32 %v1729_v33, %v14046_v6 }
 0x406   :  { %v1751_v37 = vsel %vm361_vm2, %v1737_v36, -inf }
 0x407   :  { %1752 = vmax.xlane.f32.xlu1 %v1751_v37 }
 0x409   :  { %v12274_v39 = vpop.f32.mrb[14].mxu1 }
 0x40a   :  { %v1081_v40 = vpop.f32.mrb[15].mxu1  ;;  %v1087_v59 = vadd.f32 %v12274_v39, %v11398_v38 }
 0x40b   :  { %v1082_v42 = vadd.f32 %v11398_v38, %v1081_v40 }
 0x40d   :  { %12287 = vmatpush3.xpose.msk.msra.mxu1 %vm361_vm2, %v1082_v42 }
 0x40e   :  { %12291 = vmatprep.subr.mxu1 %v13856_v22 }
 0x410   :  { %12289 = vmatmul.mubr.msk.f32.vlgmr.msra.gmra.mrb[16].mxu1 %vm361_vm2, %v1002_v48 }
 0x411   :  { %12292 = vmatpush3.xpose.msk.msra.mxu1 %vm361_vm2, %v1087_v59  ;;  %12293 = vmatprep.mubr.msk.f32.mxu1 %vm13857_vm1, %v13856_v22 }
 0x412   :  { %13236 = vmatprep.subr.bf16.mxu1 %v13235_v53 }
 0x414   :  { %12294 = vmatmul.mubr.msk.f32.vlgmr.msra.gmra.mrb[18].mxu1 %vm361_vm2, %v1007_v3  ;;  %v11388_v3 = vld [vmem:[#allocation5 + $0x9] ss:$0 sm:$0xff] }
 0x415   :  { %13238 = vmatpush3.bf16.msra.mxu1 %v13235_v53  ;;  %12315 = vmatprep.mubr.msk.f32.mxu1 %vm62_vm0, %v13942_v44  ;;  %v758_v7 = vadd.f32 %v11388_v3, %v14003_v47 }
 0x416   :  { %13240 = vmatprep.subr.bf16.mxu1 %v13239_v5 }
 0x419   :  { %13242 = vmatpush3.bf16.msra.mxu1 %v13239_v5 }
 0x41a   :  { %12329 = vmatprep.subr.mxu1 %v13856_v22 }
 0x41c   :  { %12316 = vmatmul.mubr.msk.f32.vlgmr.msra.gmra.mrb[20].mxu1 %vm62_vm0, %v13948_v51 }
 0x41d   :  { %12331 = vmatprep.mubr.msk.f32.mxu1 %vm13857_vm1, %v13856_v22 }
 0x490   :  { %v1750_v8 = vpop.xlane.xlu0 %1749 }
 0x491   :  { %v1768_v12 = vsub.f32 %v1736_v31, %v1750_v8 }
 0x493   :  { %v1778_v14 = vmul.f32 1.442695, %v1768_v12 }
 0x494   :  { %v1753_v44 = vpop.xlane.xlu1 %1752 }
 0x495   :  { %v1769_v15 = vsub.f32 %v1737_v36, %v1753_v44  ;;  %13626 = vpow2.f32 %v1778_v14  ;;  %v11408_v36 = vld [vmem:[#allocation5 + $0x3] ss:$0 sm:$0xff] }
 0x496   :  { %v1406_v38 = vadd.f32 %v11408_v36, %v14026_v57  ;;  %v1411_v41 = vadd.f32 %v14024_v56, %v11408_v36 }
 0x497   :  { %v1780_v51 = vmul.f32 1.442695, %v1769_v15  ;;  %v763_v15 = vadd.f32 %v13999_v45, %v11388_v3 }
 0x499   :  { %13628 = vpow2.f32 %v1780_v51  ;;  %v1162_v51 = vadd.f32 %v14017_v52, %v14022_v55 }
 0x49f   :  { %v13627_v29 = vpop.eup %13626 }
 0x4a0   :  { %v1796_v33 = vsel %vm361_vm2, %v13627_v29, 0.0 }
 0x4a3   :  { %v13629_v35 = vpop.eup %13628 }
 0x4a4   :  { %v1799_v39 = vsel %vm361_vm2, %v13629_v35, 0.0 }
 0x4e3   :  { %v1242_v16 = vpop.f32.mrb[16].mxu1 }
 0x4e4   :  { %v1730_v17 = vmul.f32 0.35355338, %v1242_v16  ;;  %v12290_v18 = vpop.f32.mrb[17].mxu1 }
 0x4e6   :  { %v1738_v19 = vadd.f32 %v1730_v17, %v14038_v63 }
 0x4e7   :  { %v1318_v4 = vpop.f32.mrb[18].mxu1 }
 0x4e8   :  { %v1731_v20 = vmul.f32 0.35355338, %v1318_v4  ;;  %v12295_v21 = vpop.f32.mrb[19].mxu1  ;;  %v1754_v10 = vsel %vm361_vm2, %v1738_v19, -inf }
 0x4e9   :  { %1755 = vmax.xlane.f32.xlu0 %v1754_v10  ;;  %v2123_v10 = vld [vmem:[#allocation2 + $0x188] sm:$0xff] }
 0x4ea   :  { %v1739_v24 = vadd.f32 %v1731_v20, %v14046_v6 }
 0x4ec   :  { %v1757_v28 = vsel %vm361_vm2, %v1739_v24, -inf }
 0x4ed   :  { %1791 = vadd.xlane.f32.xlu0 %v1790_v27  ;;  %1758 = vmax.xlane.f32.xlu1 %v1757_v28 }
 0x4ef   :  { %v12317_v31 = vpop.f32.mrb[20].mxu1 }
 0x4f0   :  { %v1485_v32 = vpop.f32.mrb[21].mxu1  ;;  %v1491_v40 = vadd.f32 %v12317_v31, %v11411_v30 }
 0x4f1   :  { %v1486_v37 = vadd.f32 %v11411_v30, %v1485_v32  ;;  %1797 = vadd.xlane.f32.xlu0 %v1796_v33  ;;  %1794 = vadd.xlane.f32.xlu1 %v1793_v34 }
 0x4f3   :  { %12330 = vmatpush3.xpose.msk.msra.mxu1 %vm361_vm2, %v1486_v37 }
 0x4f4   :  { %12334 = vmatprep.subr.mxu1 %v13856_v22 }
 0x4f5   :  { %1800 = vadd.xlane.f32.xlu1 %v1799_v39 }
 0x4f6   :  { %12332 = vmatmul.mubr.msk.f32.vlgmr.msra.gmra.mrb[22].mxu1 %vm361_vm2, %v1406_v38 }
 0x4f7   :  { %12335 = vmatpush3.xpose.msk.msra.mxu1 %vm361_vm2, %v1491_v40  ;;  %12336 = vmatprep.mubr.msk.f32.mxu1 %vm13857_vm1, %v13856_v22 }
 0x4f8   :  { %12344 = vmatprep.subr.mxu1 %v13856_v22 }
 0x4fa   :  { %12337 = vmatmul.mubr.msk.f32.vlgmr.msra.gmra.mrb[24].mxu1 %vm361_vm2, %v1411_v41 }
 0x4fb   :  { %12345 = vmatpush3.msra.mxu1 %v13988_v26  ;;  %12346 = vmatprep.mubr.msk.f32.mxu1 %vm13857_vm1, %v13856_v22 }
 0x4fc   :  { %12354 = vmatprep.subr.mxu1 %v13856_v22 }
 0x576   :  { %v1756_v57 = vpop.xlane.xlu0 %1755 }
 0x577   :  { %v1770_v42 = vsub.f32 %v1738_v19, %v1756_v57 }
 0x579   :  { %v1782_v43 = vmul.f32 1.442695, %v1770_v42 }
 0x57a   :  { %v1792_v46 = vpop.xlane.xlu0 %1791  ;;  %v1759_v48 = vpop.xlane.xlu1 %1758 }
 0x57b   :  { %13630 = vpow2.f32 %v1782_v43  ;;  %v1771_v53 = vsub.f32 %v1739_v24, %v1759_v48 }
 0x57c   :  { %13632 = vrcp.f32 %v1792_v46  ;;  %v2432_v46 = vld [vmem:[#allocation2 + $0x190] sm:$0xff] }
 0x57d   :  { %v1784_v56 = vmul.f32 1.442695, %v1771_v53 }
 0x57e   :  { %v1798_v59 = vpop.xlane.xlu0 %1797  ;;  %v1795_v62 = vpop.xlane.xlu1 %1794 }
 0x57f   :  { %13634 = vpow2.f32 %v1784_v56 }
 0x580   :  { %13636 = vrcp.f32 %v1798_v59 }
 0x581   :  { %13638 = vrcp.f32 %v1795_v62 }
 0x582   :  { %v1801_v26 = vpop.xlane.xlu1 %1800 }
 0x583   :  { %13640 = vrcp.f32 %v1801_v26 }
 0x585   :  { %v13631_v2 = vpop.eup %13630 }
 0x586   :  { %v13633_v5 = vpop.eup %13632  ;;  %v1802_v50 = vsel %vm361_vm2, %v13631_v2, 0.0 }
 0x587   :  { %v1815_v49 = vmul.f32 %v13633_v5, %v13623_v23  ;;  %1803 = vadd.xlane.f32.xlu0 %v1802_v50  ;;  %v1976_v23 = vld [vmem:[#allocation2 + $0x180] sm:$0xff] }
 0x589   :  { %v13635_v8 = vpop.eup %13634  ;;  %12342 = vmatmul.mubr.msk.f32.vlgmr.msra.gmra.mrb[14].mxu0 %vm361_vm2, %v1815_v49  ;;  %v2662_v49 = vld [vmem:[#allocation2 + $0x198] sm:$0xff] }
 0x58a   :  { %v13637_v9 = vpop.eup %13636  ;;  %12350 = vmatpush3.msra.mxu0 %v758_v7  ;;  %12351 = vmatprep.mubr.msk.f32.mxu0 %vm13857_vm1, %v13856_v22  ;;  %v1805_v11 = vsel %vm361_vm2, %v13635_v8, 0.0 }
 0x58b   :  { %v13639_v12 = vpop.eup %13638  ;;  %v1819_v44 = vmul.f32 %v13637_v9, %v13627_v29  ;;  %1806 = vadd.xlane.f32.xlu1 %v1805_v11  ;;  %12359 = vmatprep.subr.mxu0 %v2123_v10  ;;  %v1566_v29 = vadd.f32 %v14028_v58, %v14033_v61  ;;  %v11437_v11 = vld [vmem:[#allocation5 + $0x18] ss:$0 sm:$0xff] }
 0x58c   :  { %v1817_v13 = vmul.f32 %v13639_v12, %v14096_v25 }
 0x58d   :  { %v13641_v14 = vpop.eup %13640  ;;  %12352 = vmatmul.mubr.msk.f32.vlgmr.msra.gmra.mrb[16].mxu0 %vm361_vm2, %v1819_v44 }
 0x58e   :  { %v1821_v47 = vmul.f32 %v13641_v14, %v13629_v35  ;;  %12347 = vmatmul.mubr.msk.f32.vlgmr.msra.gmra.mrb[26].mxu1 %vm361_vm2, %v1817_v13  ;;  %12360 = vmatpush3.msra.mxu0 %v2123_v10  ;;  %v2800_v10 = vld [vmem:[#allocation2 + $0x228] sm:$0xff] }
 0x58f   :  { %12355 = vmatpush3.msra.mxu1 %v763_v15  ;;  %12356 = vmatprep.mubr.msk.f32.mxu1 %vm13857_vm1, %v13856_v22 }
 0x590   :  { %12369 = vmatprep.subr.mxu1 %v13856_v22  ;;  %12364 = vmatprep.subr.mxu0 %v1976_v23 }
 0x592   :  { %12357 = vmatmul.mubr.msk.f32.vlgmr.msra.gmra.mrb[28].mxu1 %vm361_vm2, %v1821_v47 }
 0x593   :  { %12370 = vmatpush3.msra.mxu1 %v1162_v51  ;;  %12371 = vmatprep.mubr.msk.f32.mxu1 %vm13857_vm1, %v13856_v22 }
 0x594   :  { %12374 = vmatprep.subr.mxu1 %v13856_v22 }
 0x5c9   :  { %v1646_v45 = vpop.f32.mrb[22].mxu1 }
 0x5ca   :  { %v1732_v16 = vmul.f32 0.35355338, %v1646_v45  ;;  %v12333_v17 = vpop.f32.mrb[23].mxu1 }
 0x5cc   :  { %v1740_v18 = vadd.f32 %v1732_v16, %v14038_v63 }
 0x5cd   :  { %v1722_v19 = vpop.f32.mrb[24].mxu1 }
 0x5ce   :  { %v1733_v4 = vmul.f32 0.35355338, %v1722_v19  ;;  %v12338_v20 = vpop.f32.mrb[25].mxu1  ;;  %v1760_v21 = vsel %vm361_vm2, %v1740_v18, -inf }
 0x5cf   :  { %1761 = vmax.xlane.f32.xlu0 %v1760_v21 }
 0x5d0   :  { %v1741_v52 = vadd.f32 %v1733_v4, %v14046_v6 }
 0x5d2   :  { %v1763_v55 = vsel %vm361_vm2, %v1741_v52, -inf }
 0x5d3   :  { %1764 = vmax.xlane.f32.xlu1 %v1763_v55  ;;  %v2799_v55 = vld [vmem:[#allocation2 + $0x220] sm:$0xff] }
 0x614   :  { %v1804_v24 = vpop.xlane.xlu0 %1803 }
 0x615   :  { %13642 = vrcp.f32 %v1804_v24  ;;  %v13259_v24 = vpack.c.bf16 %v2800_v10, %v2799_v55  ;;  %v14219_v55 = vld [vmem:[#allocation5 + $0x14] ss:$0 sm:$0xff] }
 0x616   :  { %v3221_v10 = vld [vmem:[#allocation2 + $0x2d0] sm:$0xff] }
 0x618   :  { %v1807_v25 = vpop.xlane.xlu1 %1806 }
 0x619   :  { %13644 = vrcp.f32 %v1807_v25  ;;  %v2802_v25 = vld [vmem:[#allocation2 + $0x238] sm:$0xff] }
 0x61f   :  { %v13643_v63 = vpop.eup %13642 }
 0x620   :  { %v1823_v27 = vmul.f32 %v13643_v63, %v13631_v2  ;;  %v2795_v63 = vld [vmem:[#allocation2 + $0x1a0] sm:$0xff] }
 0x622   :  { %12372 = vmatmul.mubr.msk.f32.vlgmr.msra.gmra.mrb[30].mxu1 %vm361_vm2, %v1823_v27  ;;  %v2796_v27 = vld [vmem:[#allocation2 + $0x1a8] sm:$0xff] }
 0x623   :  { %v13645_v28 = vpop.eup %13644  ;;  %12375 = vmatpush3.msra.mxu1 %v14020_v54  ;;  %12376 = vmatprep.mubr.msk.f32.mxu1 %vm13857_vm1, %v13856_v22 }
 0x624   :  { %v1825_v6 = vmul.f32 %v13645_v28, %v13635_v8  ;;  %12384 = vmatprep.subr.mxu1 %v13856_v22 }
 0x626   :  { %12377 = vmatmul.mubr.msk.f32.vlgmr.msra.gmra.mrb[32].mxu1 %vm361_vm2, %v1825_v6  ;;  %v13251_v6 = vpack.c.bf16 %v2796_v27, %v2795_v63 }
 0x627   :  { %12385 = vmatpush3.msra.mxu1 %v1566_v29  ;;  %12386 = vmatprep.mubr.msk.f32.mxu1 %vm13857_vm1, %v13856_v22  ;;  %v14184_v29 = vld [vmem:[%s14931_s1] sm:$0xff] }
 0x628   :  { %13252 = vmatprep.subr.bf16.mxu1 %v13251_v6 }
 0x65c   :  { %v1899_v30 = vpop.f32.mrb[14].mxu0  ;;  %v1762_v31 = vpop.xlane.xlu0 %1761 }
 0x65d   :  { %v12343_v32 = vpop.f32.mrb[15].mxu0  ;;  %v1772_v33 = vsub.f32 %v1740_v18, %v1762_v31  ;;  %v2798_v31 = vld [vmem:[#allocation2 + $0x1b8] sm:$0xff] }
 0x65f   :  { %v1786_v54 = vmul.f32 1.442695, %v1772_v33  ;;  %v14191_v33 = vld [vmem:[%s14931_s1 + $0x8] sm:$0xff] }
 0x660   :  { %v2046_v34 = vpop.f32.mrb[16].mxu0  ;;  %v1765_v35 = vpop.xlane.xlu1 %1764 }
 0x661   :  { %13646 = vpow2.f32 %v1786_v54  ;;  %v1972_v36 = vpop.f32.mrb[26].mxu1  ;;  %v12353_v37 = vpop.f32.mrb[17].mxu0  ;;  %12361 = vmatprep.mubr.msk.f32.mxu0 %vm361_vm2, %v2046_v34  ;;  %v1773_v38 = vsub.f32 %v1741_v52, %v1765_v35  ;;  %v2803_v54 = vld [vmem:[#allocation2 + $0x2a0] sm:$0xff]  ;;  %v2804_v34 = vld [vmem:[#allocation2 + $0x2a8] sm:$0xff] }
 0x662   :  { %v12348_v58 = vpop.f32.mrb[27].mxu1  ;;  %v13267_v35 = vpack.c.bf16 %v2804_v34, %v2803_v54  ;;  %v3623_v34 = vld [vmem:[#allocation2 + $0x2e0] sm:$0xff] }
 0x663   :  { %v1788_v61 = vmul.f32 1.442695, %v1773_v38 }
 0x665   :  { %13648 = vpow2.f32 %v1788_v61  ;;  %v2119_v39 = vpop.f32.mrb[28].mxu1 }
 0x666   :  { %v12358_v40 = vpop.f32.mrb[29].mxu1  ;;  %12362 = vmatmul.mubr.msk.f32.vlgmr.msra.gmra.mrb[18].mxu0 %vm361_vm2, %v2119_v39 }
 0x667   :  { %12366 = vmatprep.mubr.msk.f32.mxu0 %vm361_vm2, %v1899_v30  ;;  %12365 = vmatpush3.msra.mxu0 %v1976_v23  ;;  %v2801_v23 = vld [vmem:[#allocation2 + $0x230] sm:$0xff]  ;;  %v11438_v40 = vld [vmem:[#allocation5 + $0x1e] ss:$0 sm:$0xff] }
 0x668   :  { %12379 = vmatprep.subr.mxu0 %v2432_v46  ;;  %v13263_v28 = vpack.c.bf16 %v2802_v25, %v2801_v23  ;;  %v2797_v30 = vld [vmem:[#allocation2 + $0x1b0] sm:$0xff]  ;;  %v3222_v23 = vld [vmem:[#allocation2 + $0x2d8] sm:$0xff] }
 0x669   :  { %v13255_v32 = vpack.c.bf16 %v2798_v31, %v2797_v30  ;;  %v13295_v27 = vpack.c.bf16 %v3222_v23, %v3221_v10  ;;  %v3617_v31 = vld [vmem:[#allocation2 + $0x1f0] sm:$0xff] }
 0x66b   :  { %v13647_v41 = vpop.eup %13646 }
 0x66c   :  { %v1808_v57 = vsel %vm361_vm2, %v13647_v41, 0.0 }
 0x66d   :  { %1809 = vadd.xlane.f32.xlu0 %v1808_v57 }
 0x66e   :  { %12367 = vmatmul.mubr.msk.f32.vlgmr.msra.gmra.mrb[18].mxu0 %vm361_vm2, %v1972_v36 }
 0x66f   :  { %v13649_v42 = vpop.eup %13648  ;;  %12380 = vmatpush3.msra.mxu0 %v2432_v46  ;;  %v11439_v46 = vld [vmem:[#allocation5 + $0x1f] ss:$0 sm:$0xff] }
 0x670   :  { %v1811_v43 = vsel %vm361_vm2, %v13649_v42, 0.0  ;;  %12389 = vmatprep.subr.mxu0 %v13856_v22 }
 0x671   :  { %1812 = vadd.xlane.f32.xlu1 %v1811_v43 }
 0x6f5   :  { %v2355_v48 = vpop.f32.mrb[30].mxu1 }
 0x6f6   :  { %v12373_v53 = vpop.f32.mrb[31].mxu1  ;;  %12381 = vmatprep.mubr.msk.f32.mxu0 %vm361_vm2, %v2355_v48 }
 0x6f9   :  { %v2428_v56 = vpop.f32.mrb[32].mxu1 }
 0x6fa   :  { %v1810_v59 = vpop.xlane.xlu0 %1809  ;;  %v12378_v62 = vpop.f32.mrb[33].mxu1  ;;  %12382 = vmatmul.mubr.msk.f32.vlgmr.msra.gmra.mrb[18].mxu0 %vm361_vm2, %v2428_v56  ;;  %v2805_v56 = vld [vmem:[#allocation2 + $0x2b0] sm:$0xff] }
 0x6fb   :  { %13650 = vrcp.f32 %v1810_v59  ;;  %12390 = vmatpush3.msra.mxu0 %v14031_v60  ;;  %12391 = vmatprep.mubr.msk.f32.mxu0 %vm13857_vm1, %v13856_v22  ;;  %v2806_v59 = vld [vmem:[#allocation2 + $0x2b8] sm:$0xff] }
 0x6fc   :  { %12394 = vmatprep.subr.mxu0 %v2662_v49 }
 0x6fe   :  { %v1813_v26 = vpop.xlane.xlu1 %1812 }
 0x6ff   :  { %13652 = vrcp.f32 %v1813_v26 }
 0x705   :  { %v13651_v2 = vpop.eup %13650 }
 0x706   :  { %v1827_v3 = vmul.f32 %v13651_v2, %v13647_v41  ;;  %v13271_v2 = vpack.c.bf16 %v2806_v59, %v2805_v56  ;;  %v4030_v56 = vld [vmem:[#allocation2 + $0x318] sm:$0xff] }
 0x708   :  { %12387 = vmatmul.mubr.msk.f32.vlgmr.msra.gmra.mrb[34].mxu1 %vm361_vm2, %v1827_v3  ;;  %v11443_v3 = vld [vmem:[#allocation5 + $0x10] ss:$0 sm:$0xff] }
 0x709   :  { %v13653_v5 = vpop.eup %13652  ;;  %13254 = vmatpush3.bf16.msra.mxu1 %v13251_v6  ;;  %v3616_v6 = vld [vmem:[#allocation2 + $0x1e8] sm:$0xff] }
 0x70a   :  { %v1829_v50 = vmul.f32 %v13653_v5, %v13649_v42  ;;  %13256 = vmatprep.subr.bf16.mxu1 %v13255_v32 }
 0x70c   :  { %12392 = vmatmul.mubr.msk.f32.vlgmr.msra.gmra.mrb[20].mxu0 %vm361_vm2, %v1829_v50 }
 0x70d   :  { %12395 = vmatpush3.msra.mxu0 %v2662_v49  ;;  %13258 = vmatpush3.bf16.msra.mxu1 %v13255_v32  ;;  %v3618_v32 = vld [vmem:[#allocation2 + $0x1f8] sm:$0xff] }
 0x70e   :  { %13260 = vmatprep.subr.bf16.mxu0 %v13259_v24  ;;  %13268 = vmatprep.subr.bf16.mxu1 %v13267_v35  ;;  %v13303_v54 = vpack.c.bf16 %v3618_v32, %v3617_v31 }
 0x7db   :  { %v2585_v7 = vpop.f32.mrb[34].mxu1 }
 0x7dc   :  { %v12388_v8 = vpop.f32.mrb[35].mxu1  ;;  %12396 = vmatprep.mubr.msk.f32.mxu0 %vm361_vm2, %v2585_v7 }
 0x7dd   :  { %v3215_v8 = vld [vmem:[#allocation2 + $0x240] sm:$0xff] }
 0x7df   :  { %v2658_v60 = vpop.f32.mrb[20].mxu0 }
 0x7e0   :  { %v12393_v9 = vpop.f32.mrb[21].mxu0  ;;  %12397 = vmatmul.mubr.msk.f32.vlgmr.msra.gmra.mrb[18].mxu0 %vm361_vm2, %v2658_v60  ;;  %v3216_v60 = vld [vmem:[#allocation2 + $0x248] sm:$0xff] }
 0x7e1   :  { %12418 = vmatprep.mubr.msk.f32.mxu0 %vm62_vm0, %v14184_v29  ;;  %13262 = vmatpush3.bf16.msra.mxu0 %v13259_v24  ;;  %v13283_v9 = vpack.c.bf16 %v3216_v60, %v3215_v8 }
 0x7e2   :  { %13264 = vmatprep.subr.bf16.mxu0 %v13263_v28 }
 0x7e5   :  { %13266 = vmatpush3.bf16.msra.mxu0 %v13263_v28  ;;  %v3615_v28 = vld [vmem:[#allocation2 + $0x1e0] sm:$0xff] }
 0x7e6   :  { %12432 = vmatprep.subr.mxu0 %v13856_v22  ;;  %v13299_v30 = vpack.c.bf16 %v3616_v6, %v3615_v28 }
 0x7e8   :  { %12419 = vmatmul.mubr.msk.f32.vlgmr.msra.gmra.mrb[22].mxu0 %vm62_vm0, %v14191_v33 }
 0x7e9   :  { %12434 = vmatprep.mubr.msk.f32.mxu0 %vm13857_vm1, %v13856_v22 }
 0x8b3   :  { %v12398_v12 = vpop.f32.mrb[18].mxu0 }
 0x8b4   :  { %v2752_v44 = vadd.f32 %v12398_v12, %v11437_v11  ;;  %v2735_v13 = vpop.f32.mrb[19].mxu0  ;;  %v3212_v12 = vld [vmem:[#allocation2 + $0x1c8] sm:$0xff] }
 0x8b5   :  { %v2751_v14 = vadd.f32 %v11437_v11, %v2735_v13  ;;  %v3211_v11 = vld [vmem:[#allocation2 + $0x1c0] sm:$0xff]  ;;  %v11440_v13 = vld [vmem:[#allocation5 + $0xc] ss:$0 sm:$0xff] }
 0x8b6   :  { %v14168_v15 = vadd.f32 %v2752_v44, %v13932_v1  ;;  %v13275_v44 = vpack.c.bf16 %v3212_v12, %v3211_v11 }
 0x8b7   :  { %v14171_v47 = vadd.f32 %v2751_v14, %v13927_v0  ;;  %v3217_v14 = vld [vmem:[#allocation2 + $0x250] sm:$0xff] }
 0x8b8   :  { %v2760_v51 = vsel %vm62_vm0, %v14168_v15, 0.0 }
 0x8b9   :  { %2761 = vadd.xlane.f32.xlu1 %v2760_v51  ;;  %v2757_v45 = vsel %vm62_vm0, %v14171_v47, 0.0  ;;  %v3218_v51 = vld [vmem:[#allocation2 + $0x258] sm:$0xff] }
 0x8ba   :  { %2758 = vadd.xlane.f32.xlu0 %v2757_v45  ;;  %v3213_v45 = vld [vmem:[#allocation2 + $0x1d0] sm:$0xff] }
 0x8bb   :  { %v12420_v5 = vpop.f32.mrb[22].mxu0 }
 0x8bc   :  { %v2976_v50 = vadd.f32 %v12420_v5, %v11443_v3  ;;  %v2970_v49 = vpop.f32.mrb[23].mxu0 }
 0x8bd   :  { %v2971_v7 = vadd.f32 %v11443_v3, %v2970_v49  ;;  %v14266_v49 = vld [vmem:[%s14932_s2] ss:$0 sm:$0xff] }
 0x8bf   :  { %12433 = vmatpush3.xpose.msk.msra.mxu0 %vm361_vm2, %v2971_v7 }
 0x8c0   :  { %13276 = vmatprep.subr.bf16.mxu0 %v13275_v44 }
 0x946   :  { %v2762_v16 = vpop.xlane.xlu1 %2761 }
 0x947   :  { %v2764_v17 = vmul.f32 0.03125, %v2762_v16  ;;  %v2759_v18 = vpop.xlane.xlu0 %2758  ;;  %v3214_v16 = vld [vmem:[#allocation2 + $0x1d8] sm:$0xff] }
 0x948   :  { %v2763_v19 = vmul.f32 0.03125, %v2759_v18 }
 0x949   :  { %v2766_v4 = vsub.f32 %v14168_v15, %v2764_v17 }
 0x94a   :  { %v2765_v1 = vsub.f32 %v14171_v47, %v2763_v19 }
 0x94b   :  { %v2768_v20 = vmul.f32 %v2766_v4, %v2766_v4  ;;  %v2782_v41 = vmul.f32 %v11438_v40, %v2766_v4 }
 0x94c   :  { %v2767_v21 = vmul.f32 %v2765_v1, %v2765_v1  ;;  %v2781_v42 = vmul.f32 %v11438_v40, %v2765_v1  ;;  %v13287_v1 = vpack.c.bf16 %v3218_v51, %v3217_v14 }
 0x94d   :  { %v2772_v0 = vsel %vm62_vm0, %v2768_v20, 0.0  ;;  %v13279_v20 = vpack.c.bf16 %v3214_v16, %v3213_v45  ;;  %v11453_v45 = vld [vmem:[#allocation5 + $0xd] ss:$0 sm:$0xff] }
 0x94e   :  { %2773 = vadd.xlane.f32.xlu1 %v2772_v0  ;;  %v2769_v52 = vsel %vm62_vm0, %v2767_v21, 0.0  ;;  %v3219_v21 = vld [vmem:[#allocation2 + $0x2c0] sm:$0xff]  ;;  %v3220_v0 = vld [vmem:[#allocation2 + $0x2c8] sm:$0xff] }
 0x94f   :  { %2770 = vadd.xlane.f32.xlu0 %v2769_v52  ;;  %v13291_v52 = vpack.c.bf16 %v3220_v0, %v3219_v21  ;;  %v3621_v21 = vld [vmem:[#allocation2 + $0x270] sm:$0xff]  ;;  %v3622_v0 = vld [vmem:[#allocation2 + $0x278] sm:$0xff] }
 0x950   :  { %v13311_v10 = vpack.c.bf16 %v3622_v0, %v3621_v21 }
 0x9db   :  { %v2774_v36 = vpop.xlane.xlu1 %2773 }
 0x9dc   :  { %v2776_v37 = vmul.f32 0.032258064, %v2774_v36  ;;  %v2771_v38 = vpop.xlane.xlu0 %2770 }
 0x9dd   :  { %v2775_v58 = vmul.f32 0.032258064, %v2771_v38  ;;  %v3626_v38 = vld [vmem:[#allocation2 + $0x2f8] sm:$0xff] }
 0x9de   :  { %v2784_v61 = vadd.f32 1e-06, %v2776_v37  ;;  %v3625_v37 = vld [vmem:[#allocation2 + $0x2f0] sm:$0xff] }
 0x9df   :  { %v2783_v39 = vadd.f32 1e-06, %v2775_v58  ;;  %v13319_v58 = vpack.c.bf16 %v3626_v38, %v3625_v37 }
 0x9e0   :  { %13654 = vrsqrt.f32 %v2784_v61  ;;  %v4019_v61 = vld [vmem:[#allocation2 + $0x200] sm:$0xff] }
 0x9e1   :  { %13656 = vrsqrt.f32 %v2783_v39  ;;  %v4020_v39 = vld [vmem:[#allocation2 + $0x208] sm:$0xff] }
 0x9e2   :  { %v13323_v40 = vpack.c.bf16 %v4020_v39, %v4019_v61 }
 0x9ea   :  { %v13655_v57 = vpop.eup %13654 }
 0x9eb   :  { %v13657_v43 = vpop.eup %13656  ;;  %v2788_v48 = vmul.f32 %v13655_v57, %v2782_v41  ;;  %v4021_v41 = vld [vmem:[#allocation2 + $0x210] sm:$0xff]  ;;  %v4022_v57 = vld [vmem:[#allocation2 + $0x218] sm:$0xff] }
 0x9ec   :  { %v2787_v53 = vmul.f32 %v13657_v43, %v2781_v42  ;;  %v13327_v42 = vpack.c.bf16 %v4022_v57, %v4021_v41  ;;  %v4027_v43 = vld [vmem:[#allocation2 + $0x300] sm:$0xff]  ;;  %v11469_v41 = vld [vmem:[#allocation5 + $0x12] ss:$0 sm:$0xff] }
 0x9ed   :  { %v14200_v26 = vadd.f32 %v11439_v46, %v2788_v48 }
 0x9ee   :  { %v14198_v62 = vadd.f32 %v11439_v46, %v2787_v53  ;;  %v4028_v46 = vld [vmem:[#allocation2 + $0x308] sm:$0xff]  ;;  %v4029_v53 = vld [vmem:[#allocation2 + $0x310] sm:$0xff] }
 0x9ef   :  { %v13339_v48 = vpack.c.bf16 %v4028_v46, %v4027_v43  ;;  %v13343_v59 = vpack.c.bf16 %v4030_v56, %v4029_v53  ;;  %v11466_v43 = vld [vmem:[#allocation5 + $0xe] ss:$0 sm:$0xff] }
 0x9f0   :  { %12407 = vmatprep.mubr.msk.f32.mxu1 %vm62_vm0, %v14198_v62  ;;  %v4024_v53 = vld [vmem:[#allocation2 + $0x288] sm:$0xff] }
 0x9f1   :  { %12408 = vmatmul.mubr.msk.f32.vlgmr.msra.gmra.mrb[36].mxu1 %vm62_vm0, %v14200_v26 }
 0x9f2   :  { %13270 = vmatpush3.bf16.msra.mxu1 %v13267_v35  ;;  %12429 = vmatprep.mubr.msk.f32.mxu1 %vm62_vm0, %v14184_v29  ;;  %v3624_v35 = vld [vmem:[#allocation2 + $0x2e8] sm:$0xff] }
 0x9f3   :  { %13272 = vmatprep.subr.bf16.mxu1 %v13271_v2  ;;  %v13315_v36 = vpack.c.bf16 %v3624_v35, %v3623_v34 }
 0x9f6   :  { %13274 = vmatpush3.bf16.msra.mxu1 %v13271_v2 }
 0x9f7   :  { %12437 = vmatprep.subr.mxu1 %v13856_v22 }
 0x9f9   :  { %12430 = vmatmul.mubr.msk.f32.vlgmr.msra.gmra.mrb[38].mxu1 %vm62_vm0, %v14191_v33 }
 0x9fa   :  { %12439 = vmatprep.mubr.msk.f32.mxu1 %vm13857_vm1, %v13856_v22 }
 0x9ff   :  { %12438 = vmatpush3.xpose.msk.msra.mxu1 %vm361_vm2, %v2976_v50 }
 0xa00   :  { %13284 = vmatprep.subr.bf16.mxu1 %v13283_v9 }
 0xac4   :  { %v12409_v17 = vpop.f32.mrb[36].mxu1 }
 0xac5   :  { %v2890_v18 = vadd.f32 %v12409_v17, %v11440_v13  ;;  %v2884_v19 = vpop.f32.mrb[37].mxu1 }
 0xac6   :  { %v2885_v4 = vadd.f32 %v11440_v13, %v2884_v19  ;;  %v3620_v19 = vld [vmem:[#allocation2 + $0x268] sm:$0xff] }
 0xac7   :  { %12440 = vmatmul.mubr.msk.f32.vlgmr.msra.gmra.mrb[40].mxu1 %vm361_vm2, %v2890_v18  ;;  %v3619_v18 = vld [vmem:[#allocation2 + $0x260] sm:$0xff] }
 0xac8   :  { %13286 = vmatpush3.bf16.msra.mxu1 %v13283_v9  ;;  %12435 = vmatmul.mubr.msk.f32.vlgmr.msra.gmra.mrb[24].mxu0 %vm361_vm2, %v2885_v4 }
 0xac9   :  { %13278 = vmatpush3.bf16.msra.mxu0 %v13275_v44  ;;  %12450 = vmatprep.mubr.msk.f32.mxu0 %vm62_vm0, %v14198_v62  ;;  %v11456_v44 = vld [vmem:[#allocation5 + $0x11] ss:$0 sm:$0xff] }
 0xaca   :  { %13288 = vmatprep.subr.bf16.mxu1 %v13287_v1  ;;  %13280 = vmatprep.subr.bf16.mxu0 %v13279_v20 }
 0xacb   :  { %12461 = vmatprep.mubr.msk.f32.mxu1 %vm62_vm0, %v14184_v29 }
 0xacc   :  { %13290 = vmatpush3.bf16.msra.mxu1 %v13287_v1  ;;  %v12431_v24 = vpop.f32.mrb[38].mxu1  ;;  %v13307_v1 = vpack.c.bf16 %v3620_v19, %v3619_v18 }
 0xacd   :  { %13282 = vmatpush3.bf16.msra.mxu0 %v13279_v20  ;;  %v14224_v25 = vadd.f32 %v12431_v24, %v14219_v55  ;;  %v3050_v63 = vpop.f32.mrb[39].mxu1  ;;  %12475 = vmatprep.subr.mxu1 %v13856_v22 }
 0xace   :  { %13292 = vmatprep.subr.bf16.mxu0 %v13291_v52  ;;  %v3051_v2 = vadd.f32 %v14219_v55, %v3050_v63 }
 0xacf   :  { %12462 = vmatmul.mubr.msk.f32.vlgmr.msra.gmra.mrb[42].mxu1 %vm62_vm0, %v14191_v33 }
 0xad0   :  { %12451 = vmatmul.mubr.msk.f32.vlgmr.msra.gmra.mrb[26].mxu0 %vm62_vm0, %v14200_v26  ;;  %12477 = vmatprep.mubr.msk.f32.mxu1 %vm13857_vm1, %v13856_v22 }
 0xad1   :  { %13294 = vmatpush3.bf16.msra.mxu0 %v13291_v52  ;;  %12472 = vmatprep.mubr.msk.f32.mxu0 %vm62_vm0, %v14184_v29 }
 0xad2   :  { %13296 = vmatprep.subr.bf16.mxu0 %v13295_v27 }
 0xad5   :  { %13298 = vmatpush3.bf16.msra.mxu0 %v13295_v27  ;;  %v14296_v27 = vld [vmem:[#allocation5 + $0x16] ss:$0 sm:$0xff] }
 0xad6   :  { %13300 = vmatprep.subr.bf16.mxu0 %v13299_v30 }
 0xad8   :  { %12473 = vmatmul.mubr.msk.f32.vlgmr.msra.gmra.mrb[28].mxu0 %vm62_vm0, %v14191_v33 }
 0xad9   :  { %13302 = vmatpush3.bf16.msra.mxu0 %v13299_v30  ;;  %12493 = vmatprep.mubr.msk.f32.mxu0 %vm62_vm0, %v14198_v62 }
 0xada   :  { %13304 = vmatprep.subr.bf16.mxu0 %v13303_v54 }
 0xadd   :  { %13306 = vmatpush3.bf16.msra.mxu0 %v13303_v54 }
 0xade   :  { %13316 = vmatprep.subr.bf16.mxu0 %v13315_v36 }
 0xae0   :  { %12494 = vmatmul.mubr.msk.f32.vlgmr.msra.gmra.mrb[30].mxu0 %vm62_vm0, %v14200_v26 }
 0xae1   :  { %13318 = vmatpush3.bf16.msra.mxu0 %v13315_v36  ;;  %12515 = vmatprep.mubr.msk.f32.mxu0 %vm62_vm0, %v14184_v29 }
 0xae2   :  { %13320 = vmatprep.subr.bf16.mxu0 %v13319_v58 }
 0xae5   :  { %13322 = vmatpush3.bf16.msra.mxu0 %v13319_v58 }
 0xae6   :  { %13324 = vmatprep.subr.bf16.mxu0 %v13323_v40 }
 0xae8   :  { %12516 = vmatmul.mubr.msk.f32.vlgmr.msra.gmra.mrb[32].mxu0 %vm62_vm0, %v14191_v33 }
 0xae9   :  { %13326 = vmatpush3.bf16.msra.mxu0 %v13323_v40  ;;  %12536 = vmatprep.mubr.msk.f32.mxu0 %vm62_vm0, %v14198_v62 }
 0xaea   :  { %13328 = vmatprep.subr.bf16.mxu0 %v13327_v42 }
 0xaed   :  { %13330 = vmatpush3.bf16.msra.mxu0 %v13327_v42 }
 0xaee   :  { %13340 = vmatprep.subr.bf16.mxu0 %v13339_v48 }
 0xaf0   :  { %12537 = vmatmul.mubr.msk.f32.vlgmr.msra.gmra.mrb[34].mxu0 %vm62_vm0, %v14200_v26  ;;  %v14261_v26 = vld [vmem:[%s14932_s2 + $0x1] ss:$0 sm:$0xff] }
 0xaf1   :  { %13342 = vmatpush3.bf16.msra.mxu0 %v13339_v48  ;;  %12558 = vmatprep.mubr.msk.f32.mxu0 %vm62_vm0, %v14184_v29  ;;  %v4023_v48 = vld [vmem:[#allocation2 + $0x280] sm:$0xff] }
 0xaf2   :  { %13344 = vmatprep.subr.bf16.mxu0 %v13343_v59 }
 0xaf5   :  { %13346 = vmatpush3.bf16.msra.mxu0 %v13343_v59  ;;  %v13331_v59 = vpack.c.bf16 %v4024_v53, %v4023_v48 }
 0xaf6   :  { %12571 = vmatprep.subr.mxu0 %v13856_v22 }
 0xaf8   :  { %12559 = vmatmul.mubr.msk.f32.vlgmr.msra.gmra.mrb[36].mxu0 %vm62_vm0, %v14191_v33 }
 0xaf9   :  { %12572 = vmatpush3.msra.mxu0 %v3051_v2  ;;  %12573 = vmatprep.mubr.msk.f32.mxu0 %vm13857_vm1, %v13856_v22 }
 0xafa   :  { %12581 = vmatprep.subr.mxu0 %v13856_v22 }
 0xb9a   :  { %v3207_v62 = vpop.f32.mrb[40].mxu1 }
 0xb9b   :  { %v4424_v3 = vmul.f32 0.35355338, %v3207_v62  ;;  %v3131_v5 = vpop.f32.mrb[24].mxu0  ;;  %v12441_v50 = vpop.f32.mrb[41].mxu1  ;;  %v4025_v62 = vld [vmem:[#allocation2 + $0x290] sm:$0xff] }
 0xb9c   :  { %v4423_v7 = vmul.f32 0.35355338, %v3131_v5  ;;  %v12436_v8 = vpop.f32.mrb[25].mxu0 }
 0xb9d   :  { %v14269_v60 = vadd.f32 %v14261_v26, %v4424_v3  ;;  %v4026_v3 = vld [vmem:[#allocation2 + $0x298] sm:$0xff] }
 0xb9e   :  { %v14272_v9 = vadd.f32 %v14266_v49, %v4423_v7  ;;  %v13335_v50 = vpack.c.bf16 %v4026_v3, %v4025_v62 }
 0xb9f   :  { %v4454_v11 = vsel %vm361_vm2, %v14269_v60, -inf }
 0xba0   :  { %4455 = vmax.xlane.f32.xlu1 %v4454_v11  ;;  %v4451_v12 = vsel %vm361_vm2, %v14272_v9, -inf }
 0xba1   :  { %4452 = vmax.xlane.f32.xlu0 %v4451_v12 }
 0xba2   :  { %v12463_v13 = vpop.f32.mrb[42].mxu1 }
 0xba3   :  { %v12452_v14 = vpop.f32.mrb[26].mxu0  ;;  %v3374_v51 = vpop.f32.mrb[43].mxu1  ;;  %v3380_v20 = vadd.f32 %v12463_v13, %v11456_v44 }
 0xba4   :  { %v3375_v16 = vadd.f32 %v11456_v44, %v3374_v51  ;;  %v3294_v17 = vpop.f32.mrb[27].mxu0  ;;  %v3300_v52 = vadd.f32 %v12452_v14, %v11453_v45 }
 0xba5   :  { %v3295_v4 = vadd.f32 %v11453_v45, %v3294_v17 }
 0xba6   :  { %12476 = vmatpush3.xpose.msk.msra.mxu1 %vm361_vm2, %v3375_v16 }
 0xba7   :  { %12480 = vmatprep.subr.mxu1 %v13856_v22 }
 0xba9   :  { %12478 = vmatmul.mubr.msk.f32.vlgmr.msra.gmra.mrb[44].mxu1 %vm361_vm2, %v3295_v4 }
 0xbaa   :  { %12481 = vmatpush3.xpose.msk.msra.mxu1 %vm361_vm2, %v3380_v20  ;;  %12482 = vmatprep.mubr.msk.f32.mxu1 %vm13857_vm1, %v13856_v22 }
 0xbab   :  { %13308 = vmatprep.subr.bf16.mxu1 %v13307_v1  ;;  %v14284_v55 = vpop.f32.mrb[28].mxu0 }
 0xbac   :  { %v14286_v23 = vpop.f32.mrb[29].mxu0 }
 0xbad   :  { %12483 = vmatmul.mubr.msk.f32.vlgmr.msra.gmra.mrb[46].mxu1 %vm361_vm2, %v3300_v52 }
 0xbae   :  { %13310 = vmatpush3.bf16.msra.mxu1 %v13307_v1  ;;  %12504 = vmatprep.mubr.msk.f32.mxu1 %vm62_vm0, %v14184_v29 }
 0xbaf   :  { %13312 = vmatprep.subr.bf16.mxu1 %v13311_v10 }
 0xbb2   :  { %13314 = vmatpush3.bf16.msra.mxu1 %v13311_v10 }
 0xbb3   :  { %v12495_v24 = vpop.f32.mrb[30].mxu0  ;;  %12518 = vmatprep.subr.mxu1 %v13856_v22 }
 0xbb4   :  { %v3698_v63 = vpop.f32.mrb[31].mxu0  ;;  %v3704_v5 = vadd.f32 %v12495_v24, %v11466_v43 }
 0xbb5   :  { %12505 = vmatmul.mubr.msk.f32.vlgmr.msra.gmra.mrb[48].mxu1 %vm62_vm0, %v14191_v33  ;;  %v3699_v56 = vadd.f32 %v11466_v43, %v3698_v63 }
 0xbb6   :  { %12520 = vmatprep.mubr.msk.f32.mxu1 %vm13857_vm1, %v13856_v22 }
 0xbbb   :  { %v12517_v28 = vpop.f32.mrb[32].mxu0 }
 0xbbc   :  { %v14299_v6 = vadd.f32 %v12517_v28, %v14296_v27  ;;  %v14301_v30 = vpop.f32.mrb[33].mxu0  ;;  %v11482_v28 = vld [vmem:[#allocation5 + $0x13] ss:$0 sm:$0xff] }
 0xbc3   :  { %v14303_v31 = vpop.f32.mrb[34].mxu0 }
 0xbc4   :  { %v14305_v32 = vpop.f32.mrb[35].mxu0 }
 0xc2d   :  { %v4456_v8 = vpop.xlane.xlu1 %4455 }
 0xc2e   :  { %v4453_v7 = vpop.xlane.xlu0 %4452  ;;  %v4476_v44 = vsub.f32 %v14269_v60, %v4456_v8 }
 0xc2f   :  { %v4475_v11 = vsub.f32 %v14272_v9, %v4453_v7 }
 0xc30   :  { %v4485_v51 = vmul.f32 1.442695, %v4476_v44 }
 0xc31   :  { %v4483_v13 = vmul.f32 1.442695, %v4475_v11 }
 0xc33   :  { %13658 = vpow2.f32 %v4483_v13 }
 0xc34   :  { %13660 = vpow2.f32 %v4485_v51  ;;  %v3859_v51 = vadd.f32 %v14296_v27, %v14301_v30 }
 0xc3d   :  { %v13659_v21 = vpop.eup %13658 }
 0xc3e   :  { %v14330_v52 = vpop.eup %13660  ;;  %v4499_v10 = vsel %vm361_vm2, %v13659_v21, 0.0 }
 0xc7c   :  { %v3535_v54 = vpop.f32.mrb[44].mxu1 }
 0xc7d   :  { %v4425_v34 = vmul.f32 0.35355338, %v3535_v54  ;;  %v12479_v35 = vpop.f32.mrb[45].mxu1 }
 0xc7f   :  { %v4445_v36 = vadd.f32 %v14266_v49, %v4425_v34 }
 0xc80   :  { %v3611_v37 = vpop.f32.mrb[46].mxu1 }
 0xc81   :  { %v4426_v38 = vmul.f32 0.35355338, %v3611_v37  ;;  %v12484_v58 = vpop.f32.mrb[47].mxu1  ;;  %v4457_v61 = vsel %vm361_vm2, %v4445_v36, -inf }
 0xc82   :  { %4458 = vmax.xlane.f32.xlu0 %v4457_v61 }
 0xc83   :  { %v4446_v39 = vadd.f32 %v14261_v26, %v4426_v38  ;;  %v11479_v38 = vld [vmem:[#allocation5 + $0xf] ss:$0 sm:$0xff] }
 0xc84   :  { %v4103_v61 = vadd.f32 %v11479_v38, %v14305_v32 }
 0xc85   :  { %v4460_v40 = vsel %vm361_vm2, %v4446_v39, -inf }
 0xc86   :  { %4461 = vmax.xlane.f32.xlu1 %v4460_v40 }
 0xc88   :  { %v12506_v57 = vpop.f32.mrb[48].mxu1 }
 0xc89   :  { %v3778_v42 = vpop.f32.mrb[49].mxu1  ;;  %v3784_v2 = vadd.f32 %v12506_v57, %v11469_v41 }
 0xc8a   :  { %v3779_v46 = vadd.f32 %v11469_v41, %v3778_v42  ;;  %v4108_v41 = vadd.f32 %v14303_v31, %v11479_v38 }
 0xc8c   :  { %12519 = vmatpush3.xpose.msk.msra.mxu1 %vm361_vm2, %v3779_v46 }
 0xc8d   :  { %12523 = vmatprep.subr.mxu1 %v13856_v22 }
 0xc8f   :  { %12521 = vmatmul.mubr.msk.f32.vlgmr.msra.gmra.mrb[50].mxu1 %vm361_vm2, %v3699_v56 }
 0xc90   :  { %12524 = vmatpush3.xpose.msk.msra.mxu1 %vm361_vm2, %v3784_v2  ;;  %12525 = vmatprep.mubr.msk.f32.mxu1 %vm13857_vm1, %v13856_v22  ;;  %v11459_v2 = vld [vmem:[#allocation5 + $0x15] ss:$0 sm:$0xff] }
 0xc91   :  { %13332 = vmatprep.subr.bf16.mxu1 %v13331_v59 }
 0xc93   :  { %12526 = vmatmul.mubr.msk.f32.vlgmr.msra.gmra.mrb[52].mxu1 %vm361_vm2, %v3704_v5 }
 0xc94   :  { %13334 = vmatpush3.bf16.msra.mxu1 %v13331_v59  ;;  %12547 = vmatprep.mubr.msk.f32.mxu1 %vm62_vm0, %v14184_v29 }
 0xc95   :  { %13336 = vmatprep.subr.bf16.mxu1 %v13335_v50 }
 0xc98   :  { %13338 = vmatpush3.bf16.msra.mxu1 %v13335_v50  ;;  %v3455_v50 = vadd.f32 %v11459_v2, %v14286_v23 }
 0xc99   :  { %12561 = vmatprep.subr.mxu1 %v13856_v22 }
 0xc9b   :  { %12548 = vmatmul.mubr.msk.f32.vlgmr.msra.gmra.mrb[54].mxu1 %vm62_vm0, %v14191_v33 }
 0xc9c   :  { %12563 = vmatprep.mubr.msk.f32.mxu1 %vm13857_vm1, %v13856_v22 }
 0xd0f   :  { %v4459_v12 = vpop.xlane.xlu0 %4458 }
 0xd10   :  { %v4477_v14 = vsub.f32 %v4445_v36, %v4459_v12  ;;  %v4502_v36 = vsel %vm361_vm2, %v14330_v52, 0.0 }
 0xd12   :  { %v4487_v45 = vmul.f32 1.442695, %v4477_v14 }
 0xd13   :  { %v4462_v29 = vpop.xlane.xlu1 %4461 }
 0xd14   :  { %v4478_v16 = vsub.f32 %v4446_v39, %v4462_v29  ;;  %13662 = vpow2.f32 %v4487_v45  ;;  %v3460_v29 = vadd.f32 %v14284_v55, %v11459_v2  ;;  %v12560_v55 = vpop.f32.mrb[36].mxu0  ;;  %v11485_v45 = vld [vmem:[#allocation5 + $0x17] ss:$0 sm:$0xff] }
 0xd16   :  { %v4489_v33 = vmul.f32 1.442695, %v4478_v16  ;;  %v14371_v16 = vadd.f32 %v12560_v55, %v11485_v45 }
 0xd18   :  { %13664 = vpow2.f32 %v4489_v33  ;;  %v4262_v33 = vpop.f32.mrb[37].mxu0 }
 0xd1e   :  { %v13663_v63 = vpop.eup %13662 }
 0xd1f   :  { %v4505_v35 = vsel %vm361_vm2, %v13663_v63, 0.0 }
 0xd22   :  { %v13665_v37 = vpop.eup %13664 }
 0xd23   :  { %v4508_v39 = vsel %vm361_vm2, %v13665_v37, 0.0 }
 0xd62   :  { %v3939_v17 = vpop.f32.mrb[50].mxu1 }
 0xd63   :  { %v4427_v18 = vmul.f32 0.35355338, %v3939_v17  ;;  %v12522_v19 = vpop.f32.mrb[51].mxu1 }
 0xd65   :  { %v4447_v4 = vadd.f32 %v14266_v49, %v4427_v18 }
 0xd66   :  { %v4015_v9 = vpop.f32.mrb[52].mxu1 }
 0xd67   :  { %v4428_v1 = vmul.f32 0.35355338, %v4015_v9  ;;  %v12527_v20 = vpop.f32.mrb[53].mxu1  ;;  %v4463_v60 = vsel %vm361_vm2, %v4447_v4, -inf }
 0xd68   :  { %4464 = vmax.xlane.f32.xlu0 %v4463_v60 }
 0xd69   :  { %v4448_v0 = vadd.f32 %v14261_v26, %v4428_v1 }
 0xd6b   :  { %v4466_v24 = vsel %vm361_vm2, %v4448_v0, -inf }
 0xd6c   :  { %4500 = vadd.xlane.f32.xlu0 %v4499_v10  ;;  %4467 = vmax.xlane.f32.xlu1 %v4466_v24 }
 0xd6e   :  { %v12549_v54 = vpop.f32.mrb[54].mxu1 }
 0xd6f   :  { %v4182_v34 = vpop.f32.mrb[55].mxu1  ;;  %v4188_v40 = vadd.f32 %v12549_v54, %v11482_v28 }
 0xd70   :  { %v4183_v58 = vadd.f32 %v11482_v28, %v4182_v34  ;;  %4506 = vadd.xlane.f32.xlu0 %v4505_v35  ;;  %4503 = vadd.xlane.f32.xlu1 %v4502_v36 }
 0xd72   :  { %12562 = vmatpush3.xpose.msk.msra.mxu1 %vm361_vm2, %v4183_v58 }
 0xd73   :  { %12566 = vmatprep.subr.mxu1 %v13856_v22 }
 0xd74   :  { %4509 = vadd.xlane.f32.xlu1 %v4508_v39 }
 0xd75   :  { %12564 = vmatmul.mubr.msk.f32.vlgmr.msra.gmra.mrb[56].mxu1 %vm361_vm2, %v4103_v61 }
 0xd76   :  { %12567 = vmatpush3.xpose.msk.msra.mxu1 %vm361_vm2, %v4188_v40  ;;  %12568 = vmatprep.mubr.msk.f32.mxu1 %vm13857_vm1, %v13856_v22 }
 0xd77   :  { %12576 = vmatprep.subr.mxu1 %v13856_v22 }
 0xd79   :  { %12569 = vmatmul.mubr.msk.f32.vlgmr.msra.gmra.mrb[58].mxu1 %vm361_vm2, %v4108_v41 }
 0xd7a   :  { %12577 = vmatpush3.msra.mxu1 %v14224_v25  ;;  %12578 = vmatprep.mubr.msk.f32.mxu1 %vm13857_vm1, %v13856_v22 }
 0xd7b   :  { %12586 = vmatprep.subr.mxu1 %v13856_v22 }
 0xdf5   :  { %v4465_v32 = vpop.xlane.xlu0 %4464 }
 0xdf6   :  { %v4479_v57 = vsub.f32 %v4447_v4, %v4465_v32 }
 0xdf8   :  { %v4491_v42 = vmul.f32 1.442695, %v4479_v57 }
 0xdf9   :  { %v4501_v43 = vpop.xlane.xlu0 %4500  ;;  %v4468_v46 = vpop.xlane.xlu1 %4467 }
 0xdfa   :  { %13666 = vpow2.f32 %v4491_v42  ;;  %v4480_v48 = vsub.f32 %v4448_v0, %v4468_v46  ;;  %v4685_v0 = vld [vmem:[#allocation2 + $0x320] sm:$0xff] }
 0xdfb   :  { %13668 = vrcp.f32 %v4501_v43 }
 0xdfc   :  { %v4493_v31 = vmul.f32 1.442695, %v4480_v48 }
 0xdfd   :  { %v4507_v53 = vpop.xlane.xlu0 %4506  ;;  %v4504_v56 = vpop.xlane.xlu1 %4503 }
 0xdfe   :  { %13670 = vpow2.f32 %v4493_v31  ;;  %v5141_v31 = vld [vmem:[#allocation2 + $0x330] sm:$0xff] }
 0xdff   :  { %13672 = vrcp.f32 %v4507_v53 }
 0xe00   :  { %13674 = vrcp.f32 %v4504_v56 }
 0xe01   :  { %v4510_v25 = vpop.xlane.xlu1 %4509 }
 0xe02   :  { %13676 = vrcp.f32 %v4510_v25 }
 0xe04   :  { %v13667_v59 = vpop.eup %13666 }
 0xe05   :  { %v13669_v62 = vpop.eup %13668  ;;  %v4511_v3 = vsel %vm361_vm2, %v13667_v59, 0.0 }
 0xe06   :  { %v4524_v5 = vmul.f32 %v13669_v62, %v13659_v21  ;;  %4512 = vadd.xlane.f32.xlu0 %v4511_v3  ;;  %v4832_v21 = vld [vmem:[#allocation2 + $0x328] sm:$0xff] }
 0xe08   :  { %v13671_v7 = vpop.eup %13670  ;;  %12574 = vmatmul.mubr.msk.f32.vlgmr.msra.gmra.mrb[38].mxu0 %vm361_vm2, %v4524_v5 }
 0xe09   :  { %v13673_v8 = vpop.eup %13672  ;;  %12582 = vmatpush3.msra.mxu0 %v3455_v50  ;;  %12583 = vmatprep.mubr.msk.f32.mxu0 %vm13857_vm1, %v13856_v22  ;;  %v4514_v11 = vsel %vm361_vm2, %v13671_v7, 0.0 }
 0xe0a   :  { %v13675_v12 = vpop.eup %13674  ;;  %v4528_v44 = vmul.f32 %v13673_v8, %v13663_v63  ;;  %4515 = vadd.xlane.f32.xlu1 %v4514_v11  ;;  %12591 = vmatprep.subr.mxu0 %v4832_v21  ;;  %v5371_v8 = vld [vmem:[#allocation2 + $0x338] sm:$0xff] }
 0xe0b   :  { %v4526_v13 = vmul.f32 %v13675_v12, %v14330_v52 }
 0xe0c   :  { %v13677_v14 = vpop.eup %13676  ;;  %12584 = vmatmul.mubr.msk.f32.vlgmr.msra.gmra.mrb[40].mxu0 %vm361_vm2, %v4528_v44 }
 0xe0d   :  { %v4530_v23 = vmul.f32 %v13677_v14, %v13665_v37  ;;  %12579 = vmatmul.mubr.msk.f32.vlgmr.msra.gmra.mrb[60].mxu1 %vm361_vm2, %v4526_v13  ;;  %12592 = vmatpush3.msra.mxu0 %v4832_v21  ;;  %v11510_v14 = vld [vmem:[#allocation5 + $0x19] ss:$0 sm:$0xff]  ;;  %v5505_v21 = vld [vmem:[#allocation2 + $0x348] sm:$0xff] }
 0xe0e   :  { %12587 = vmatpush3.msra.mxu1 %v3460_v29  ;;  %12588 = vmatprep.mubr.msk.f32.mxu1 %vm13857_vm1, %v13856_v22 }
 0xe0f   :  { %12601 = vmatprep.subr.mxu1 %v13856_v22  ;;  %12596 = vmatprep.subr.mxu0 %v4685_v0 }
 0xe11   :  { %12589 = vmatmul.mubr.msk.f32.vlgmr.msra.gmra.mrb[62].mxu1 %vm361_vm2, %v4530_v23 }
 0xe12   :  { %12602 = vmatpush3.msra.mxu1 %v3859_v51  ;;  %12603 = vmatprep.mubr.msk.f32.mxu1 %vm13857_vm1, %v13856_v22 }
 0xe13   :  { %12606 = vmatprep.subr.mxu1 %v13856_v22 }
 0xe48   :  { %v4343_v17 = vpop.f32.mrb[56].mxu1 }
 0xe49   :  { %v4429_v18 = vmul.f32 0.35355338, %v4343_v17  ;;  %v12565_v19 = vpop.f32.mrb[57].mxu1 }
 0xe4b   :  { %v4449_v4 = vadd.f32 %v14266_v49, %v4429_v18 }
 0xe4c   :  { %v4419_v9 = vpop.f32.mrb[58].mxu1 }
 0xe4d   :  { %v4430_v27 = vmul.f32 0.35355338, %v4419_v9  ;;  %v12570_v30 = vpop.f32.mrb[59].mxu1  ;;  %v4469_v1 = vsel %vm361_vm2, %v4449_v4, -inf }
 0xe4e   :  { %4470 = vmax.xlane.f32.xlu0 %v4469_v1 }
 0xe4f   :  { %v4450_v20 = vadd.f32 %v14261_v26, %v4430_v27  ;;  %v4263_v26 = vadd.f32 %v11485_v45, %v4262_v33 }
 0xe51   :  { %v4472_v60 = vsel %vm361_vm2, %v4450_v20, -inf }
 0xe52   :  { %4473 = vmax.xlane.f32.xlu1 %v4472_v60  ;;  %v5504_v60 = vld [vmem:[#allocation2 + $0x340] sm:$0xff] }
 0xe93   :  { %v4513_v52 = vpop.xlane.xlu0 %4512 }
 0xe94   :  { %13678 = vrcp.f32 %v4513_v52  ;;  %v13347_v52 = vpack.c.bf16 %v5505_v21, %v5504_v60  ;;  %v5744_v21 = vld [vmem:[#allocation2 + $0x4a8] sm:$0xff] }
 0xe97   :  { %v4516_v10 = vpop.xlane.xlu1 %4515 }
 0xe98   :  { %13680 = vrcp.f32 %v4516_v10  ;;  %v5507_v10 = vld [vmem:[#allocation2 + $0x358] sm:$0xff] }
 0xe9e   :  { %v13679_v49 = vpop.eup %13678 }
 0xe9f   :  { %v4532_v24 = vmul.f32 %v13679_v49, %v13667_v59 }
 0xea1   :  { %12604 = vmatmul.mubr.msk.f32.vlgmr.msra.gmra.mrb[64].mxu1 %vm361_vm2, %v4532_v24  ;;  %v5596_v24 = vld [vmem:[#allocation2 + $0x360] sm:$0xff] }
 0xea2   :  { %v13681_v63 = vpop.eup %13680  ;;  %12607 = vmatpush3.msra.mxu1 %v14299_v6  ;;  %12608 = vmatprep.mubr.msk.f32.mxu1 %vm13857_vm1, %v13856_v22 }
 0xea3   :  { %v4534_v28 = vmul.f32 %v13681_v63, %v13671_v7  ;;  %12616 = vmatprep.subr.mxu1 %v13856_v22  ;;  %v5597_v63 = vld [vmem:[#allocation2 + $0x368] sm:$0xff] }
 0xea5   :  { %12609 = vmatmul.mubr.msk.f32.vlgmr.msra.gmra.mrb[66].mxu1 %vm361_vm2, %v4534_v28  ;;  %v13355_v28 = vpack.c.bf16 %v5597_v63, %v5596_v24  ;;  %v5746_v63 = vld [vmem:[#allocation2 + $0x4b8] sm:$0xff] }
 0xea6   :  { %12617 = vmatpush3.msra.mxu1 %v4263_v26  ;;  %12618 = vmatprep.mubr.msk.f32.mxu1 %vm13857_vm1, %v13856_v22  ;;  %v5598_v26 = vld [vmem:[#allocation2 + $0x370] sm:$0xff] }
 0xea7   :  { %13348 = vmatprep.subr.bf16.mxu1 %v13347_v52 }
 0xedb   :  { %v4608_v54 = vpop.f32.mrb[38].mxu0  ;;  %v4471_v34 = vpop.xlane.xlu0 %4470 }
 0xedc   :  { %v12575_v35 = vpop.f32.mrb[39].mxu0  ;;  %v4481_v36 = vsub.f32 %v4449_v4, %v4471_v34 }
 0xedd   :  { %v5600_v35 = vld [vmem:[#allocation2 + $0x380] sm:$0xff] }
 0xede   :  { %v4495_v37 = vmul.f32 1.442695, %v4481_v36  ;;  %v5601_v36 = vld [vmem:[#allocation2 + $0x388] sm:$0xff] }
 0xedf   :  { %v4755_v38 = vpop.f32.mrb[40].mxu0  ;;  %v4474_v6 = vpop.xlane.xlu1 %4473 }
 0xee0   :  { %13682 = vpow2.f32 %v4495_v37  ;;  %v4681_v58 = vpop.f32.mrb[60].mxu1  ;;  %v12585_v61 = vpop.f32.mrb[41].mxu0  ;;  %12593 = vmatprep.mubr.msk.f32.mxu0 %vm361_vm2, %v4755_v38  ;;  %v4482_v39 = vsub.f32 %v4450_v20, %v4474_v6  ;;  %v13363_v37 = vpack.c.bf16 %v5601_v36, %v5600_v35  ;;  %v6146_v36 = vld [vmem:[#allocation2 + $0x3c8] sm:$0xff] }
 0xee1   :  { %v12580_v40 = vpop.f32.mrb[61].mxu1 }
 0xee2   :  { %v4497_v41 = vmul.f32 1.442695, %v4482_v39 }
 0xee4   :  { %13684 = vpow2.f32 %v4497_v41  ;;  %v4828_v32 = vpop.f32.mrb[62].mxu1  ;;  %v11511_v41 = vld [vmem:[#allocation5 + $0x20] ss:$0 sm:$0xff] }
 0xee5   :  { %v12590_v57 = vpop.f32.mrb[63].mxu1  ;;  %12594 = vmatmul.mubr.msk.f32.vlgmr.msra.gmra.mrb[42].mxu0 %vm361_vm2, %v4828_v32 }
 0xee6   :  { %12598 = vmatprep.mubr.msk.f32.mxu0 %vm361_vm2, %v4608_v54  ;;  %12597 = vmatpush3.msra.mxu0 %v4685_v0  ;;  %v5506_v0 = vld [vmem:[#allocation2 + $0x350] sm:$0xff]  ;;  %v5599_v54 = vld [vmem:[#allocation2 + $0x378] sm:$0xff] }
 0xee7   :  { %12611 = vmatprep.subr.mxu0 %v5141_v31  ;;  %v13351_v49 = vpack.c.bf16 %v5507_v10, %v5506_v0  ;;  %v13359_v34 = vpack.c.bf16 %v5599_v54, %v5598_v26  ;;  %v5738_v10 = vld [vmem:[#allocation2 + $0x3b8] sm:$0xff]  ;;  %v5740_v54 = vld [vmem:[#allocation2 + $0x428] sm:$0xff] }
 0xeea   :  { %v13683_v42 = vpop.eup %13682 }
 0xeeb   :  { %v4517_v43 = vsel %vm361_vm2, %v13683_v42, 0.0 }
 0xeec   :  { %4518 = vadd.xlane.f32.xlu0 %v4517_v43 }
 0xeed   :  { %12599 = vmatmul.mubr.msk.f32.vlgmr.msra.gmra.mrb[42].mxu0 %vm361_vm2, %v4681_v58 }
 0xeee   :  { %v13685_v46 = vpop.eup %13684  ;;  %12612 = vmatpush3.msra.mxu0 %v5141_v31 }
 0xeef   :  { %v4520_v48 = vsel %vm361_vm2, %v13685_v46, 0.0  ;;  %12621 = vmatprep.subr.mxu0 %v13856_v22 }
 0xef0   :  { %4521 = vadd.xlane.f32.xlu1 %v4520_v48 }
 0xf74   :  { %v5064_v53 = vpop.f32.mrb[64].mxu1 }
 0xf75   :  { %v12605_v56 = vpop.f32.mrb[65].mxu1  ;;  %12613 = vmatprep.mubr.msk.f32.mxu0 %vm361_vm2, %v5064_v53 }
 0xf78   :  { %v5137_v25 = vpop.f32.mrb[66].mxu1 }
 0xf79   :  { %v4519_v59 = vpop.xlane.xlu0 %4518  ;;  %v12610_v2 = vpop.f32.mrb[67].mxu1  ;;  %12614 = vmatmul.mubr.msk.f32.vlgmr.msra.gmra.mrb[42].mxu0 %vm361_vm2, %v5137_v25  ;;  %v5602_v25 = vld [vmem:[#allocation2 + $0x390] sm:$0xff] }
 0xf7a   :  { %13686 = vrcp.f32 %v4519_v59  ;;  %12622 = vmatpush3.msra.mxu0 %v14371_v16  ;;  %12623 = vmatprep.mubr.msk.f32.mxu0 %vm13857_vm1, %v13856_v22  ;;  %v5603_v59 = vld [vmem:[#allocation2 + $0x398] sm:$0xff] }
 0xf7b   :  { %12626 = vmatprep.subr.mxu0 %v5371_v8  ;;  %v13367_v2 = vpack.c.bf16 %v5603_v59, %v5602_v25  ;;  %v6147_v25 = vld [vmem:[#allocation2 + $0x3d0] sm:$0xff]  ;;  %v6148_v59 = vld [vmem:[#allocation2 + $0x3d8] sm:$0xff] }
 0xf7d   :  { %v4522_v62 = vpop.xlane.xlu1 %4521 }
 0xf7e   :  { %13688 = vrcp.f32 %v4522_v62  ;;  %v11513_v62 = vld [vmem:[#allocation5 + $0x1a] ss:$0 sm:$0xff] }
 0xf84   :  { %v13687_v3 = vpop.eup %13686 }
 0xf85   :  { %v4536_v5 = vmul.f32 %v13687_v3, %v13683_v42 }
 0xf87   :  { %12619 = vmatmul.mubr.msk.f32.vlgmr.msra.gmra.mrb[68].mxu1 %vm361_vm2, %v4536_v5 }
 0xf88   :  { %v13689_v50 = vpop.eup %13688  ;;  %13350 = vmatpush3.bf16.msra.mxu1 %v13347_v52  ;;  %v5737_v52 = vld [vmem:[#allocation2 + $0x3b0] sm:$0xff] }
 0xf89   :  { %v4538_v7 = vmul.f32 %v13689_v50, %v13685_v46  ;;  %13352 = vmatprep.subr.bf16.mxu1 %v13351_v49  ;;  %v11512_v46 = vld [vmem:[#allocation5 + $0x21] ss:$0 sm:$0xff]  ;;  %v13375_v24 = vpack.c.bf16 %v5738_v10, %v5737_v52  ;;  %v6963_v52 = vld [vmem:[#allocation2 + $0x510] sm:$0xff]  ;;  %v6964_v10 = vld [vmem:[#allocation2 + $0x518] sm:$0xff] }
 0xf8b   :  { %12624 = vmatmul.mubr.msk.f32.vlgmr.msra.gmra.mrb[44].mxu0 %vm361_vm2, %v4538_v7 }
 0xf8c   :  { %12627 = vmatpush3.msra.mxu0 %v5371_v8  ;;  %13354 = vmatpush3.bf16.msra.mxu1 %v13351_v49  ;;  %v5745_v49 = vld [vmem:[#allocation2 + $0x4b0] sm:$0xff] }
 0xf8d   :  { %13356 = vmatprep.subr.bf16.mxu0 %v13355_v28  ;;  %v13391_v26 = vpack.c.bf16 %v5746_v63, %v5745_v49  ;;  %v13463_v49 = vpack.c.bf16 %v6964_v10, %v6963_v52 }
0x105a   :  { %v5294_v11 = vpop.f32.mrb[68].mxu1 }
0x105b   :  { %v12620_v12 = vpop.f32.mrb[69].mxu1  ;;  %12628 = vmatprep.mubr.msk.f32.mxu0 %vm361_vm2, %v5294_v11 }
0x105e   :  { %v5367_v44 = vpop.f32.mrb[44].mxu0 }
0x105f   :  { %v12625_v13 = vpop.f32.mrb[45].mxu0  ;;  %12629 = vmatmul.mubr.msk.f32.vlgmr.msra.gmra.mrb[42].mxu0 %vm361_vm2, %v5367_v44  ;;  %v11518_v44 = vld [vmem:[#allocation5 + $0x1b] ss:$0 sm:$0xff] }
0x1060   :  { %13358 = vmatpush3.bf16.msra.mxu0 %v13355_v28  ;;  %v5739_v28 = vld [vmem:[#allocation2 + $0x420] sm:$0xff] }
0x1061   :  { %13360 = vmatprep.subr.bf16.mxu0 %v13359_v34  ;;  %v13379_v35 = vpack.c.bf16 %v5740_v54, %v5739_v28 }
0x1064   :  { %13362 = vmatpush3.bf16.msra.mxu0 %v13359_v34  ;;  %v6145_v34 = vld [vmem:[#allocation2 + $0x3c0] sm:$0xff] }
0x1065   :  { %13364 = vmatprep.subr.bf16.mxu0 %v13363_v37 }
0x1068   :  { %13366 = vmatpush3.bf16.msra.mxu0 %v13363_v37  ;;  %v13395_v37 = vpack.c.bf16 %v6146_v36, %v6145_v34  ;;  %v11524_v36 = vld [vmem:[#allocation5 + $0x26] ss:$0 sm:$0xff] }
0x1069   :  { %13368 = vmatprep.subr.bf16.mxu0 %v13367_v2 }
0x106c   :  { %13370 = vmatpush3.bf16.msra.mxu0 %v13367_v2 }
0x1132   :  { %v12630_v29 = vpop.f32.mrb[42].mxu0 }
0x1133   :  { %v5461_v23 = vadd.f32 %v12630_v29, %v11510_v14  ;;  %v5444_v51 = vpop.f32.mrb[43].mxu0 }
0x1134   :  { %v5460_v55 = vadd.f32 %v11510_v14, %v5444_v51 }
0x1135   :  { %v14402_v45 = vadd.f32 %v5461_v23, %v14168_v15 }
0x1136   :  { %v14405_v16 = vadd.f32 %v5460_v55, %v14171_v47 }
0x1137   :  { %v5469_v33 = vsel %vm62_vm0, %v14402_v45, 0.0 }
0x1138   :  { %5470 = vadd.xlane.f32.xlu1 %v5469_v33  ;;  %v5466_v17 = vsel %vm62_vm0, %v14405_v16, 0.0 }
0x1139   :  { %5467 = vadd.xlane.f32.xlu0 %v5466_v17 }
0x11c5   :  { %v5471_v18 = vpop.xlane.xlu1 %5470 }
0x11c6   :  { %v5473_v19 = vmul.f32 0.03125, %v5471_v18  ;;  %v5468_v4 = vpop.xlane.xlu0 %5467 }
0x11c7   :  { %v5472_v9 = vmul.f32 0.03125, %v5468_v4 }
0x11c8   :  { %v5475_v27 = vsub.f32 %v14402_v45, %v5473_v19 }
0x11c9   :  { %v5474_v15 = vsub.f32 %v14405_v16, %v5472_v9 }
0x11ca   :  { %v5477_v30 = vmul.f32 %v5475_v27, %v5475_v27  ;;  %v5491_v32 = vmul.f32 %v11511_v41, %v5475_v27 }
0x11cb   :  { %v5476_v1 = vmul.f32 %v5474_v15, %v5474_v15  ;;  %v5490_v42 = vmul.f32 %v11511_v41, %v5474_v15  ;;  %v11519_v41 = vld [vmem:[#allocation5 + $0x3e] ss:$0 sm:$0xff] }
0x11cc   :  { %v5481_v47 = vsel %vm62_vm0, %v5477_v30, 0.0 }
0x11cd   :  { %5482 = vadd.xlane.f32.xlu1 %v5481_v47  ;;  %v5478_v20 = vsel %vm62_vm0, %v5476_v1, 0.0  ;;  %v5735_v1 = vld [vmem:[#allocation2 + $0x3a0] sm:$0xff]  ;;  %v5736_v47 = vld [vmem:[#allocation2 + $0x3a8] sm:$0xff] }
0x11ce   :  { %5479 = vadd.xlane.f32.xlu0 %v5478_v20  ;;  %v5743_v20 = vld [vmem:[#allocation2 + $0x4a0] sm:$0xff]  ;;  %v13371_v60 = vpack.c.bf16 %v5736_v47, %v5735_v1  ;;  %v6955_v1 = vld [vmem:[#allocation2 + $0x410] sm:$0xff]  ;;  %v6956_v47 = vld [vmem:[#allocation2 + $0x418] sm:$0xff] }
0x11cf   :  { %v13387_v0 = vpack.c.bf16 %v5744_v21, %v5743_v20  ;;  %v13447_v20 = vpack.c.bf16 %v6956_v47, %v6955_v1  ;;  %v6962_v21 = vld [vmem:[#allocation2 + $0x508] sm:$0xff] }
0x11d0   :  { %13372 = vmatprep.subr.bf16.mxu1 %v13371_v60 }
0x11d1   :  { %13388 = vmatprep.subr.bf16.mxu0 %v13387_v0 }
0x125a   :  { %v5483_v38 = vpop.xlane.xlu1 %5482 }
0x125b   :  { %v5485_v6 = vmul.f32 0.032258064, %v5483_v38  ;;  %v5480_v58 = vpop.xlane.xlu0 %5479 }
0x125c   :  { %v5484_v61 = vmul.f32 0.032258064, %v5480_v58 }
0x125d   :  { %v5493_v39 = vadd.f32 1e-06, %v5485_v6 }
0x125e   :  { %v5492_v40 = vadd.f32 1e-06, %v5484_v61 }
0x125f   :  { %13690 = vrsqrt.f32 %v5493_v39 }
0x1260   :  { %13692 = vrsqrt.f32 %v5492_v40 }
0x1269   :  { %v13691_v57 = vpop.eup %13690 }
0x126a   :  { %v13693_v43 = vpop.eup %13692  ;;  %v5497_v48 = vmul.f32 %v13691_v57, %v5491_v32 }
0x126b   :  { %v5496_v31 = vmul.f32 %v13693_v43, %v5490_v42 }
0x126c   :  { %v5503_v56 = vadd.f32 %v11512_v46, %v5497_v48 }
0x126d   :  { %v5502_v53 = vadd.f32 %v11512_v46, %v5496_v31  ;;  %v11520_v46 = vld [vmem:[#allocation5 + $0x3f] ss:$0 sm:$0xff] }
0x126f   :  { %12639 = vmatprep.mubr.msk.f32.mxu1 %vm62_vm0, %v5502_v53  ;;  %v5741_v53 = vld [vmem:[#allocation2 + $0x430] sm:$0xff] }
0x1270   :  { %12640 = vmatmul.mubr.msk.f32.vlgmr.msra.gmra.mrb[70].mxu1 %vm62_vm0, %v5503_v56  ;;  %v5742_v56 = vld [vmem:[#allocation2 + $0x438] sm:$0xff] }
0x1271   :  { %13374 = vmatpush3.bf16.msra.mxu1 %v13371_v60  ;;  %v6961_v60 = vld [vmem:[#allocation2 + $0x500] sm:$0xff] }
0x1272   :  { %13376 = vmatprep.subr.bf16.mxu1 %v13375_v24 }
0x1275   :  { %13378 = vmatpush3.bf16.msra.mxu1 %v13375_v24  ;;  %v11527_v24 = vld [vmem:[#allocation5 + $0x2a] ss:$0 sm:$0xff] }
0x1276   :  { %13380 = vmatprep.subr.bf16.mxu1 %v13379_v35 }
0x1343   :  { %v12641_v3 = vpop.f32.mrb[70].mxu1 }
0x1344   :  { %v5591_v5 = vadd.f32 %v12641_v3, %v11513_v62  ;;  %v5585_v50 = vpop.f32.mrb[71].mxu1  ;;  %v13383_v3 = vpack.c.bf16 %v5742_v56, %v5741_v53 }
0x1345   :  { %v5586_v7 = vadd.f32 %v11513_v62, %v5585_v50  ;;  %v6153_v50 = vld [vmem:[#allocation2 + $0x4c0] sm:$0xff] }
0x1346   :  { %v5595_v11 = vmax.f32 %v5591_v5, 0.0  ;;  %v13399_v5 = vpack.c.bf16 %v6148_v59, %v6147_v25 }
0x1347   :  { %v5594_v8 = vmax.f32 %v5586_v7, 0.0  ;;  %v6154_v7 = vld [vmem:[#allocation2 + $0x4c8] sm:$0xff] }
0x1349   :  { %12658 = vmatprep.mubr.msk.f32.mxu0 %vm5604_vm3, %v5594_v8  ;;  %v13411_v8 = vpack.c.bf16 %v6154_v7, %v6153_v50 }
0x134a   :  { %12659 = vmatmul.mubr.msk.f32.vlgmr.msra.gmra.mrb[46].mxu0 %vm5604_vm3, %v5595_v11  ;;  %v6155_v11 = vld [vmem:[#allocation2 + $0x4d0] sm:$0xff] }
0x134b   :  { %13390 = vmatpush3.bf16.msra.mxu0 %v13387_v0  ;;  %v13459_v0 = vpack.c.bf16 %v6962_v21, %v6961_v60  ;;  %v6553_v21 = vld [vmem:[#allocation2 + $0x460] sm:$0xff] }
0x134c   :  { %13392 = vmatprep.subr.bf16.mxu0 %v13391_v26 }
0x134f   :  { %13394 = vmatpush3.bf16.msra.mxu0 %v13391_v26 }
0x1350   :  { %13396 = vmatprep.subr.bf16.mxu0 %v13395_v37 }
0x141d   :  { %v12660_v12 = vpop.f32.mrb[46].mxu0 }
0x141e   :  { %v5687_v13 = vadd.f32 %v12660_v12, %v14402_v45  ;;  %v5677_v14 = vpop.f32.mrb[47].mxu0  ;;  %v6156_v12 = vld [vmem:[#allocation2 + $0x4d8] sm:$0xff] }
0x141f   :  { %v5686_v29 = vadd.f32 %v5677_v14, %v14405_v16  ;;  %v6550_v14 = vld [vmem:[#allocation2 + $0x3e8] sm:$0xff] }
0x1420   :  { %v14421_v23 = vadd.f32 %v11518_v44, %v5687_v13  ;;  %v6549_v13 = vld [vmem:[#allocation2 + $0x3e0] sm:$0xff] }
0x1421   :  { %v14423_v51 = vadd.f32 %v11518_v44, %v5686_v29  ;;  %v13415_v44 = vpack.c.bf16 %v6156_v12, %v6155_v11  ;;  %v13419_v29 = vpack.c.bf16 %v6550_v14, %v6549_v13  ;;  %v14517_v12 = vld [vmem:[#allocation5 + $0x2d] ss:$0 sm:$0xff] }
0x1422   :  { %v5700_v55 = vsel %vm62_vm0, %v14421_v23, 0.0 }
0x1423   :  { %5701 = vadd.xlane.f32.xlu1 %v5700_v55  ;;  %v5697_v33 = vsel %vm62_vm0, %v14423_v51, 0.0  ;;  %v6551_v55 = vld [vmem:[#allocation2 + $0x3f0] sm:$0xff] }
0x1424   :  { %5698 = vadd.xlane.f32.xlu0 %v5697_v33  ;;  %v6552_v33 = vld [vmem:[#allocation2 + $0x3f8] sm:$0xff] }
0x14b0   :  { %v5702_v17 = vpop.xlane.xlu1 %5701 }
0x14b1   :  { %v5704_v18 = vmul.f32 0.03125, %v5702_v17  ;;  %v5699_v19 = vpop.xlane.xlu0 %5698  ;;  %v13423_v17 = vpack.c.bf16 %v6552_v33, %v6551_v55 }
0x14b2   :  { %v5703_v4 = vmul.f32 0.03125, %v5699_v19  ;;  %v6558_v19 = vld [vmem:[#allocation2 + $0x4e8] sm:$0xff] }
0x14b3   :  { %v5706_v45 = vsub.f32 %v14421_v23, %v5704_v18  ;;  %v6557_v18 = vld [vmem:[#allocation2 + $0x4e0] sm:$0xff] }
0x14b4   :  { %v5705_v16 = vsub.f32 %v14423_v51, %v5703_v4  ;;  %v13435_v4 = vpack.c.bf16 %v6558_v19, %v6557_v18 }
0x14b5   :  { %v5708_v9 = vmul.f32 %v5706_v45, %v5706_v45  ;;  %v5722_v32 = vmul.f32 %v11519_v41, %v5706_v45  ;;  %v6559_v45 = vld [vmem:[#allocation2 + $0x4f0] sm:$0xff] }
0x14b6   :  { %v5707_v27 = vmul.f32 %v5705_v16, %v5705_v16  ;;  %v5721_v42 = vmul.f32 %v11519_v41, %v5705_v16  ;;  %v6560_v16 = vld [vmem:[#allocation2 + $0x4f8] sm:$0xff]  ;;  %v6150_v41 = vld [vmem:[#allocation2 + $0x448] sm:$0xff] }
0x14b7   :  { %v5712_v15 = vsel %vm62_vm0, %v5708_v9, 0.0  ;;  %v13439_v9 = vpack.c.bf16 %v6560_v16, %v6559_v45 }
0x14b8   :  { %5713 = vadd.xlane.f32.xlu1 %v5712_v15  ;;  %v5709_v30 = vsel %vm62_vm0, %v5707_v27, 0.0  ;;  %v6953_v27 = vld [vmem:[#allocation2 + $0x400] sm:$0xff]  ;;  %v6954_v15 = vld [vmem:[#allocation2 + $0x408] sm:$0xff] }
0x14b9   :  { %5710 = vadd.xlane.f32.xlu0 %v5709_v30  ;;  %v13443_v30 = vpack.c.bf16 %v6954_v15, %v6953_v27 }
0x1545   :  { %v5714_v38 = vpop.xlane.xlu1 %5713 }
0x1546   :  { %v5716_v6 = vmul.f32 0.032258064, %v5714_v38  ;;  %v5711_v58 = vpop.xlane.xlu0 %5710 }
0x1547   :  { %v5715_v61 = vmul.f32 0.032258064, %v5711_v58 }
0x1548   :  { %v5724_v39 = vadd.f32 1e-06, %v5716_v6 }
0x1549   :  { %v5723_v40 = vadd.f32 1e-06, %v5715_v61  ;;  %v11521_v61 = vld [vmem:[#allocation5 + $0x22] ss:$0 sm:$0xff] }
0x154a   :  { %13694 = vrsqrt.f32 %v5724_v39 }
0x154b   :  { %13696 = vrsqrt.f32 %v5723_v40  ;;  %v6149_v40 = vld [vmem:[#allocation2 + $0x440] sm:$0xff] }
0x1554   :  { %v13695_v57 = vpop.eup %13694 }
0x1555   :  { %v13697_v43 = vpop.eup %13696  ;;  %v5728_v48 = vmul.f32 %v13695_v57, %v5722_v32  ;;  %v13403_v57 = vpack.c.bf16 %v6150_v41, %v6149_v40  ;;  %v11550_v41 = vld [vmem:[#allocation5 + $0x28] ss:$0 sm:$0xff] }
0x1556   :  { %v5727_v31 = vmul.f32 %v13697_v43, %v5721_v42  ;;  %v6151_v43 = vld [vmem:[#allocation2 + $0x450] sm:$0xff] }
0x1557   :  { %v14435_v62 = vadd.f32 %v11520_v46, %v5728_v48 }
0x1558   :  { %v14433_v2 = vadd.f32 %v11520_v46, %v5727_v31  ;;  %v6152_v46 = vld [vmem:[#allocation2 + $0x458] sm:$0xff] }
0x1559   :  { %v13407_v56 = vpack.c.bf16 %v6152_v46, %v6151_v43  ;;  %v6957_v46 = vld [vmem:[#allocation2 + $0x480] sm:$0xff] }
0x155a   :  { %12669 = vmatprep.mubr.msk.f32.mxu1 %vm62_vm0, %v14433_v2  ;;  %12691 = vmatprep.mubr.msk.f32.mxu0 %vm62_vm0, %v14433_v2 }
0x155b   :  { %12670 = vmatmul.mubr.msk.f32.vlgmr.msra.gmra.mrb[72].mxu1 %vm62_vm0, %v14435_v62  ;;  %12692 = vmatmul.mubr.msk.f32.vlgmr.msra.gmra.mrb[48].mxu0 %vm62_vm0, %v14435_v62 }
0x155c   :  { %13382 = vmatpush3.bf16.msra.mxu1 %v13379_v35  ;;  %13398 = vmatpush3.bf16.msra.mxu0 %v13395_v37 }
0x155d   :  { %12680 = vmatprep.mubr.msk.f32.mxu1 %vm62_vm0, %v14433_v2  ;;  %12712 = vmatprep.mubr.msk.f32.mxu0 %vm62_vm0, %v14433_v2 }
0x155e   :  { %13384 = vmatprep.subr.bf16.mxu1 %v13383_v3  ;;  %13400 = vmatprep.subr.bf16.mxu0 %v13399_v5 }
0x1560   :  { %13386 = vmatpush3.bf16.msra.mxu1 %v13383_v3  ;;  %13402 = vmatpush3.bf16.msra.mxu0 %v13399_v5  ;;  %v14506_v3 = vld [vmem:[#allocation5 + $0x2c] ss:$0 sm:$0xff] }
0x1561   :  { %13412 = vmatprep.subr.bf16.mxu0 %v13411_v8  ;;  %12694 = vmatprep.subr.mxu1 %v13856_v22 }
0x1563   :  { %12681 = vmatmul.mubr.msk.f32.vlgmr.msra.gmra.mrb[74].mxu1 %vm62_vm0, %v14435_v62  ;;  %12713 = vmatmul.mubr.msk.f32.vlgmr.msra.gmra.mrb[50].mxu0 %vm62_vm0, %v14435_v62 }
0x1564   :  { %13414 = vmatpush3.bf16.msra.mxu0 %v13411_v8  ;;  %12734 = vmatprep.mubr.msk.f32.mxu0 %vm62_vm0, %v14433_v2 }
0x1565   :  { %13416 = vmatprep.subr.bf16.mxu0 %v13415_v44  ;;  %12696 = vmatprep.mubr.msk.f32.mxu1 %vm13857_vm1, %v13856_v22 }
0x1568   :  { %13418 = vmatpush3.bf16.msra.mxu0 %v13415_v44 }
0x1569   :  { %13420 = vmatprep.subr.bf16.mxu0 %v13419_v29 }
0x156b   :  { %12735 = vmatmul.mubr.msk.f32.vlgmr.msra.gmra.mrb[52].mxu0 %vm62_vm0, %v14435_v62 }
0x156c   :  { %13422 = vmatpush3.bf16.msra.mxu0 %v13419_v29  ;;  %12755 = vmatprep.mubr.msk.f32.mxu0 %vm62_vm0, %v14433_v2 }
0x156d   :  { %13424 = vmatprep.subr.bf16.mxu0 %v13423_v17 }
0x1570   :  { %13426 = vmatpush3.bf16.msra.mxu0 %v13423_v17  ;;  %v14527_v17 = vld [vmem:[%s14933_s3] sm:$0xff] }
0x1571   :  { %13436 = vmatprep.subr.bf16.mxu0 %v13435_v4 }
0x1573   :  { %12756 = vmatmul.mubr.msk.f32.vlgmr.msra.gmra.mrb[54].mxu0 %vm62_vm0, %v14435_v62 }
0x1574   :  { %13438 = vmatpush3.bf16.msra.mxu0 %v13435_v4  ;;  %12777 = vmatprep.mubr.msk.f32.mxu0 %vm62_vm0, %v14433_v2 }
0x1575   :  { %13440 = vmatprep.subr.bf16.mxu0 %v13439_v9 }
0x1578   :  { %13442 = vmatpush3.bf16.msra.mxu0 %v13439_v9  ;;  %v14537_v9 = vld [vmem:[%s14933_s3 + $0x8] sm:$0xff] }
0x1579   :  { %13444 = vmatprep.subr.bf16.mxu0 %v13443_v30 }
0x157b   :  { %12778 = vmatmul.mubr.msk.f32.vlgmr.msra.gmra.mrb[56].mxu0 %vm62_vm0, %v14435_v62 }
0x157c   :  { %13446 = vmatpush3.bf16.msra.mxu0 %v13443_v30  ;;  %12798 = vmatprep.mubr.msk.f32.mxu0 %vm62_vm0, %v14433_v2  ;;  %v11537_v30 = vld [vmem:[#allocation5 + $0x27] ss:$0 sm:$0xff] }
0x157d   :  { %13448 = vmatprep.subr.bf16.mxu0 %v13447_v20 }
0x1580   :  { %13450 = vmatpush3.bf16.msra.mxu0 %v13447_v20  ;;  %v11534_v20 = vld [vmem:[#allocation5 + $0x23] ss:$0 sm:$0xff] }
0x1581   :  { %13460 = vmatprep.subr.bf16.mxu0 %v13459_v0 }
0x1583   :  { %12799 = vmatmul.mubr.msk.f32.vlgmr.msra.gmra.mrb[58].mxu0 %vm62_vm0, %v14435_v62 }
0x1584   :  { %13462 = vmatpush3.bf16.msra.mxu0 %v13459_v0  ;;  %12820 = vmatprep.mubr.msk.f32.mxu0 %vm62_vm0, %v14433_v2  ;;  %v6554_v0 = vld [vmem:[#allocation2 + $0x468] sm:$0xff] }
0x1585   :  { %13464 = vmatprep.subr.bf16.mxu0 %v13463_v49  ;;  %v13427_v10 = vpack.c.bf16 %v6554_v0, %v6553_v21 }
0x1588   :  { %13466 = vmatpush3.bf16.msra.mxu0 %v13463_v49 }
0x1589   :  { %12833 = vmatprep.subr.mxu0 %v13856_v22 }
0x158b   :  { %12821 = vmatmul.mubr.msk.f32.vlgmr.msra.gmra.mrb[60].mxu0 %vm62_vm0, %v14435_v62 }
0x158c   :  { %12835 = vmatprep.mubr.msk.f32.mxu0 %vm13857_vm1, %v13856_v22 }
0x162e   :  { %v12671_v63 = vpop.f32.mrb[72].mxu1  ;;  %v12693_v26 = vpop.f32.mrb[48].mxu0 }
0x162f   :  { %v14479_v28 = vadd.f32 %v12693_v26, %v11527_v24  ;;  %v5824_v54 = vpop.f32.mrb[73].mxu1  ;;  %v5984_v34 = vpop.f32.mrb[49].mxu0  ;;  %v5830_v31 = vadd.f32 %v12671_v63, %v11521_v61  ;;  %v6556_v63 = vld [vmem:[#allocation2 + $0x478] sm:$0xff] }
0x1630   :  { %v5985_v35 = vadd.f32 %v11527_v24, %v5984_v34  ;;  %v5825_v32 = vadd.f32 %v11521_v61, %v5824_v54  ;;  %v6555_v24 = vld [vmem:[#allocation2 + $0x470] sm:$0xff] }
0x1631   :  { %v13431_v54 = vpack.c.bf16 %v6556_v63, %v6555_v24 }
0x1632   :  { %12834 = vmatpush3.msra.mxu0 %v5985_v35 }
0x1633   :  { %12843 = vmatprep.subr.mxu0 %v13856_v22 }
0x1636   :  { %v12682_v37 = vpop.f32.mrb[74].mxu1  ;;  %v14482_v38 = vpop.f32.mrb[50].mxu0 }
0x1637   :  { %v5904_v6 = vpop.f32.mrb[75].mxu1  ;;  %v6228_v58 = vpop.f32.mrb[51].mxu0  ;;  %v5910_v42 = vadd.f32 %v12682_v37, %v11524_v36  ;;  %v6234_v26 = vadd.f32 %v14482_v38, %v11534_v20 }
0x1638   :  { %v5905_v39 = vadd.f32 %v11524_v36, %v5904_v6  ;;  %v6229_v52 = vadd.f32 %v11534_v20, %v6228_v58 }
0x163a   :  { %12695 = vmatpush3.xpose.msk.msra.mxu1 %vm361_vm2, %v5905_v39 }
0x163b   :  { %12699 = vmatprep.subr.mxu1 %v13856_v22 }
0x163d   :  { %12697 = vmatmul.mubr.msk.f32.vlgmr.msra.gmra.mrb[76].mxu1 %vm361_vm2, %v5825_v32 }
0x163e   :  { %12700 = vmatpush3.xpose.msk.msra.mxu1 %vm361_vm2, %v5910_v42  ;;  %v14488_v48 = vpop.f32.mrb[52].mxu0  ;;  %12701 = vmatprep.mubr.msk.f32.mxu1 %vm13857_vm1, %v13856_v22  ;;  %v11547_v42 = vld [vmem:[#allocation5 + $0x24] ss:$0 sm:$0xff] }
0x163f   :  { %v14492_v53 = vpop.f32.mrb[53].mxu0  ;;  %13404 = vmatprep.subr.bf16.mxu1 %v13403_v57 }
0x1641   :  { %12702 = vmatmul.mubr.msk.f32.vlgmr.msra.gmra.mrb[78].mxu1 %vm361_vm2, %v5830_v31  ;;  %v6958_v31 = vld [vmem:[#allocation2 + $0x488] sm:$0xff] }
0x1642   :  { %13406 = vmatpush3.bf16.msra.mxu1 %v13403_v57  ;;  %12723 = vmatprep.mubr.msk.f32.mxu1 %vm62_vm0, %v14433_v2 }
0x1643   :  { %13408 = vmatprep.subr.bf16.mxu1 %v13407_v56 }
0x1646   :  { %13410 = vmatpush3.bf16.msra.mxu1 %v13407_v56  ;;  %v14497_v25 = vpop.f32.mrb[54].mxu0 }
0x1647   :  { %v14499_v59 = vpop.f32.mrb[55].mxu0  ;;  %12737 = vmatprep.subr.mxu1 %v13856_v22 }
0x1648   :  { %v6633_v56 = vadd.f32 %v11547_v42, %v14499_v59 }
0x1649   :  { %12724 = vmatmul.mubr.msk.f32.vlgmr.msra.gmra.mrb[80].mxu1 %vm62_vm0, %v14435_v62 }
0x164a   :  { %12739 = vmatprep.mubr.msk.f32.mxu1 %vm13857_vm1, %v13856_v22 }
0x164e   :  { %v12779_v5 = vpop.f32.mrb[56].mxu0 }
0x164f   :  { %v14509_v50 = vadd.f32 %v12779_v5, %v14506_v3  ;;  %v14511_v7 = vpop.f32.mrb[57].mxu0  ;;  %v13451_v5 = vpack.c.bf16 %v6958_v31, %v6957_v46 }
0x1656   :  { %v14513_v8 = vpop.f32.mrb[58].mxu0 }
0x1657   :  { %v14515_v11 = vpop.f32.mrb[59].mxu0 }
0x165e   :  { %v12822_v44 = vpop.f32.mrb[60].mxu0 }
0x165f   :  { %v14520_v13 = vadd.f32 %v12822_v44, %v14517_v12  ;;  %v14522_v14 = vpop.f32.mrb[61].mxu0 }
0x1710   :  { %v6065_v29 = vpop.f32.mrb[76].mxu1 }
0x1711   :  { %v7357_v55 = vmul.f32 0.35355338, %v6065_v29  ;;  %v12698_v33 = vpop.f32.mrb[77].mxu1  ;;  %v6959_v29 = vld [vmem:[#allocation2 + $0x490] sm:$0xff] }
0x1712   :  { %v6638_v33 = vadd.f32 %v14497_v25, %v11547_v42 }
0x1713   :  { %v14530_v18 = vadd.f32 %v14527_v17, %v7357_v55  ;;  %v6960_v55 = vld [vmem:[#allocation2 + $0x498] sm:$0xff] }
0x1714   :  { %v6141_v19 = vpop.f32.mrb[78].mxu1 }
0x1715   :  { %v7358_v4 = vmul.f32 0.35355338, %v6141_v19  ;;  %v12703_v45 = vpop.f32.mrb[79].mxu1  ;;  %v7373_v16 = vsel %vm361_vm2, %v14530_v18, -inf  ;;  %v13455_v19 = vpack.c.bf16 %v6960_v55, %v6959_v29 }
0x1716   :  { %7374 = vmax.xlane.f32.xlu0 %v7373_v16 }
0x1717   :  { %v14540_v27 = vadd.f32 %v14537_v9, %v7358_v4 }
0x1719   :  { %v7376_v15 = vsel %vm361_vm2, %v14540_v27, -inf }
0x171a   :  { %7377 = vmax.xlane.f32.xlu1 %v7376_v15 }
0x171c   :  { %v12725_v1 = vpop.f32.mrb[80].mxu1 }
0x171d   :  { %v6308_v47 = vpop.f32.mrb[81].mxu1  ;;  %v6314_v49 = vadd.f32 %v12725_v1, %v11537_v30 }
0x171e   :  { %v6309_v60 = vadd.f32 %v11537_v30, %v6308_v47 }
0x1720   :  { %12738 = vmatpush3.xpose.msk.msra.mxu1 %vm361_vm2, %v6309_v60 }
0x1721   :  { %12742 = vmatprep.subr.mxu1 %v13856_v22 }
0x1723   :  { %12740 = vmatmul.mubr.msk.f32.vlgmr.msra.gmra.mrb[82].mxu1 %vm361_vm2, %v6229_v52 }
0x1724   :  { %12743 = vmatpush3.xpose.msk.msra.mxu1 %vm361_vm2, %v6314_v49  ;;  %12744 = vmatprep.mubr.msk.f32.mxu1 %vm13857_vm1, %v13856_v22 }
0x1725   :  { %13428 = vmatprep.subr.bf16.mxu1 %v13427_v10 }
0x1727   :  { %12745 = vmatmul.mubr.msk.f32.vlgmr.msra.gmra.mrb[84].mxu1 %vm361_vm2, %v6234_v26 }
0x1728   :  { %13430 = vmatpush3.bf16.msra.mxu1 %v13427_v10  ;;  %12766 = vmatprep.mubr.msk.f32.mxu1 %vm62_vm0, %v14433_v2 }
0x1729   :  { %13432 = vmatprep.subr.bf16.mxu1 %v13431_v54 }
0x172c   :  { %13434 = vmatpush3.bf16.msra.mxu1 %v13431_v54 }
0x172d   :  { %12780 = vmatprep.subr.mxu1 %v13856_v22 }
0x172f   :  { %12767 = vmatmul.mubr.msk.f32.vlgmr.msra.gmra.mrb[86].mxu1 %vm62_vm0, %v14435_v62 }
0x1730   :  { %12782 = vmatprep.mubr.msk.f32.mxu1 %vm13857_vm1, %v13856_v22 }
0x17a3   :  { %v7375_v59 = vpop.xlane.xlu0 %7374 }
0x17a4   :  { %v7397_v25 = vsub.f32 %v14530_v18, %v7375_v59 }
0x17a6   :  { %v7405_v15 = vmul.f32 1.442695, %v7397_v25 }
0x17a7   :  { %v7378_v4 = vpop.xlane.xlu1 %7377 }
0x17a8   :  { %v7398_v16 = vsub.f32 %v14540_v27, %v7378_v4  ;;  %13698 = vpow2.f32 %v7405_v15 }
0x17aa   :  { %v7407_v1 = vmul.f32 1.442695, %v7398_v16 }
0x17ac   :  { %13700 = vpow2.f32 %v7407_v1 }
0x17b2   :  { %v13699_v24 = vpop.eup %13698 }
0x17b3   :  { %v7421_v54 = vsel %vm361_vm2, %v13699_v24, 0.0 }
0x17b6   :  { %v14584_v26 = vpop.eup %13700 }
0x17f6   :  { %v6469_v34 = vpop.f32.mrb[82].mxu1 }
0x17f7   :  { %v7359_v35 = vmul.f32 0.35355338, %v6469_v34  ;;  %v12741_v36 = vpop.f32.mrb[83].mxu1 }
0x17f8   :  { %v11563_v36 = vld [vmem:[#allocation5 + $0x29] ss:$0 sm:$0xff] }
0x17f9   :  { %v7367_v37 = vadd.f32 %v14527_v17, %v7359_v35 }
0x17fa   :  { %v6545_v38 = vpop.f32.mrb[84].mxu1 }
0x17fb   :  { %v7360_v6 = vmul.f32 0.35355338, %v6545_v38  ;;  %v12746_v58 = vpop.f32.mrb[85].mxu1  ;;  %v7379_v61 = vsel %vm361_vm2, %v7367_v37, -inf }
0x17fc   :  { %7380 = vmax.xlane.f32.xlu0 %v7379_v61  ;;  %v7424_v58 = vsel %vm361_vm2, %v14584_v26, 0.0 }
0x17fd   :  { %v7368_v39 = vadd.f32 %v14537_v9, %v7360_v6 }
0x17ff   :  { %v7382_v40 = vsel %vm361_vm2, %v7368_v39, -inf }
0x1800   :  { %7383 = vmax.xlane.f32.xlu1 %v7382_v40 }
0x1802   :  { %v12768_v32 = vpop.f32.mrb[86].mxu1 }
0x1803   :  { %v6712_v57 = vpop.f32.mrb[87].mxu1  ;;  %v6718_v44 = vadd.f32 %v12768_v32, %v11550_v41 }
0x1804   :  { %v6713_v43 = vadd.f32 %v11550_v41, %v6712_v57 }
0x1806   :  { %12781 = vmatpush3.xpose.msk.msra.mxu1 %vm361_vm2, %v6713_v43 }
0x1807   :  { %12785 = vmatprep.subr.mxu1 %v13856_v22 }
0x1809   :  { %12783 = vmatmul.mubr.msk.f32.vlgmr.msra.gmra.mrb[88].mxu1 %vm361_vm2, %v6633_v56 }
0x180a   :  { %12786 = vmatpush3.xpose.msk.msra.mxu1 %vm361_vm2, %v6718_v44  ;;  %12787 = vmatprep.mubr.msk.f32.mxu1 %vm13857_vm1, %v13856_v22 }
0x180b   :  { %13452 = vmatprep.subr.bf16.mxu1 %v13451_v5 }
0x180d   :  { %12788 = vmatmul.mubr.msk.f32.vlgmr.msra.gmra.mrb[90].mxu1 %vm361_vm2, %v6638_v33  ;;  %v11540_v33 = vld [vmem:[#allocation5 + $0x2b] ss:$0 sm:$0xff] }
0x180e   :  { %13454 = vmatpush3.bf16.msra.mxu1 %v13451_v5  ;;  %12809 = vmatprep.mubr.msk.f32.mxu1 %vm62_vm0, %v14433_v2  ;;  %v6389_v4 = vadd.f32 %v11540_v33, %v14492_v53 }
0x180f   :  { %13456 = vmatprep.subr.bf16.mxu1 %v13455_v19 }
0x1812   :  { %13458 = vmatpush3.bf16.msra.mxu1 %v13455_v19 }
0x1813   :  { %12823 = vmatprep.subr.mxu1 %v13856_v22 }
0x1815   :  { %12810 = vmatmul.mubr.msk.f32.vlgmr.msra.gmra.mrb[92].mxu1 %vm62_vm0, %v14435_v62 }
0x1816   :  { %12825 = vmatprep.mubr.msk.f32.mxu1 %vm13857_vm1, %v13856_v22 }
0x1889   :  { %v7381_v45 = vpop.xlane.xlu0 %7380 }
0x188a   :  { %v7399_v30 = vsub.f32 %v7367_v37, %v7381_v45 }
0x188c   :  { %v7409_v47 = vmul.f32 1.442695, %v7399_v30 }
0x188d   :  { %v7384_v2 = vpop.xlane.xlu1 %7383 }
0x188e   :  { %v7400_v20 = vsub.f32 %v7368_v39, %v7384_v2  ;;  %13702 = vpow2.f32 %v7409_v47  ;;  %v11560_v39 = vld [vmem:[#allocation5 + $0x25] ss:$0 sm:$0xff] }
0x188f   :  { %v7037_v41 = vadd.f32 %v11560_v39, %v14515_v11  ;;  %v7042_v42 = vadd.f32 %v14513_v8, %v11560_v39 }
0x1890   :  { %v7411_v62 = vmul.f32 1.442695, %v7400_v20  ;;  %v6394_v20 = vadd.f32 %v14488_v48, %v11540_v33 }
0x1892   :  { %13704 = vpow2.f32 %v7411_v62  ;;  %v6793_v62 = vadd.f32 %v14506_v3, %v14511_v7 }
0x1898   :  { %v13703_v35 = vpop.eup %13702 }
0x1899   :  { %v7427_v6 = vsel %vm361_vm2, %v13703_v35, 0.0 }
0x189c   :  { %v13705_v61 = vpop.eup %13704 }
0x189d   :  { %v7430_v32 = vsel %vm361_vm2, %v13705_v61, 0.0 }
0x18dc   :  { %v6873_v60 = vpop.f32.mrb[88].mxu1 }
0x18dd   :  { %v7361_v21 = vmul.f32 0.35355338, %v6873_v60  ;;  %v12784_v0 = vpop.f32.mrb[89].mxu1 }
0x18df   :  { %v7369_v52 = vadd.f32 %v14527_v17, %v7361_v21 }
0x18e0   :  { %v6949_v18 = vpop.f32.mrb[90].mxu1 }
0x18e1   :  { %v7362_v10 = vmul.f32 0.35355338, %v6949_v18  ;;  %v12789_v49 = vpop.f32.mrb[91].mxu1  ;;  %v7385_v27 = vsel %vm361_vm2, %v7369_v52, -inf }
0x18e2   :  { %7386 = vmax.xlane.f32.xlu0 %v7385_v27  ;;  %v7754_v27 = vld [vmem:[#allocation2 + $0x528] sm:$0xff] }
0x18e3   :  { %v7370_v63 = vadd.f32 %v14537_v9, %v7362_v10 }
0x18e5   :  { %v7388_v34 = vsel %vm361_vm2, %v7370_v63, -inf }
0x18e6   :  { %7422 = vadd.xlane.f32.xlu0 %v7421_v54  ;;  %7389 = vmax.xlane.f32.xlu1 %v7388_v34 }
0x18e8   :  { %v12811_v37 = vpop.f32.mrb[92].mxu1 }
0x18e9   :  { %v7116_v38 = vpop.f32.mrb[93].mxu1  ;;  %v7122_v57 = vadd.f32 %v12811_v37, %v11563_v36 }
0x18ea   :  { %v7117_v40 = vadd.f32 %v11563_v36, %v7116_v38  ;;  %7428 = vadd.xlane.f32.xlu0 %v7427_v6  ;;  %7425 = vadd.xlane.f32.xlu1 %v7424_v58 }
0x18ec   :  { %12824 = vmatpush3.xpose.msk.msra.mxu1 %vm361_vm2, %v7117_v40 }
0x18ed   :  { %12828 = vmatprep.subr.mxu1 %v13856_v22 }
0x18ee   :  { %7431 = vadd.xlane.f32.xlu1 %v7430_v32 }
0x18ef   :  { %12826 = vmatmul.mubr.msk.f32.vlgmr.msra.gmra.mrb[94].mxu1 %vm361_vm2, %v7037_v41 }
0x18f0   :  { %12829 = vmatpush3.xpose.msk.msra.mxu1 %vm361_vm2, %v7122_v57  ;;  %12830 = vmatprep.mubr.msk.f32.mxu1 %vm13857_vm1, %v13856_v22 }
0x18f1   :  { %12838 = vmatprep.subr.mxu1 %v13856_v22 }
0x18f3   :  { %12831 = vmatmul.mubr.msk.f32.vlgmr.msra.gmra.mrb[96].mxu1 %vm361_vm2, %v7042_v42 }
0x18f4   :  { %12839 = vmatpush3.msra.mxu1 %v14479_v28  ;;  %12840 = vmatprep.mubr.msk.f32.mxu1 %vm13857_vm1, %v13856_v22 }
0x18f5   :  { %12848 = vmatprep.subr.mxu1 %v13856_v22 }
0x196f   :  { %v7387_v11 = vpop.xlane.xlu0 %7386 }
0x1970   :  { %v7401_v43 = vsub.f32 %v7369_v52, %v7387_v11 }
0x1972   :  { %v7413_v46 = vmul.f32 1.442695, %v7401_v43 }
0x1973   :  { %v7423_v31 = vpop.xlane.xlu0 %7422  ;;  %v7390_v56 = vpop.xlane.xlu1 %7389 }
0x1974   :  { %13706 = vpow2.f32 %v7413_v46  ;;  %v7402_v5 = vsub.f32 %v7370_v63, %v7390_v56 }
0x1975   :  { %13708 = vrcp.f32 %v7423_v31  ;;  %v8063_v31 = vld [vmem:[#allocation2 + $0x530] sm:$0xff] }
0x1976   :  { %v7415_v8 = vmul.f32 1.442695, %v7402_v5 }
0x1977   :  { %v7429_v44 = vpop.xlane.xlu0 %7428  ;;  %v7426_v29 = vpop.xlane.xlu1 %7425 }
0x1978   :  { %13710 = vpow2.f32 %v7415_v8 }
0x1979   :  { %13712 = vrcp.f32 %v7429_v44 }
0x197a   :  { %13714 = vrcp.f32 %v7426_v29 }
0x197b   :  { %v7432_v28 = vpop.xlane.xlu1 %7431 }
0x197c   :  { %13716 = vrcp.f32 %v7432_v28 }
0x197e   :  { %v13707_v55 = vpop.eup %13706 }
0x197f   :  { %v13709_v19 = vpop.eup %13708  ;;  %v7433_v59 = vsel %vm361_vm2, %v13707_v55, 0.0 }
0x1980   :  { %v7446_v25 = vmul.f32 %v13709_v19, %v13699_v24  ;;  %7434 = vadd.xlane.f32.xlu0 %v7433_v59  ;;  %v7607_v24 = vld [vmem:[#allocation2 + $0x520] sm:$0xff] }
0x1982   :  { %v13711_v45 = vpop.eup %13710  ;;  %12836 = vmatmul.mubr.msk.f32.vlgmr.msra.gmra.mrb[62].mxu0 %vm361_vm2, %v7446_v25  ;;  %v8293_v25 = vld [vmem:[#allocation2 + $0x538] sm:$0xff] }
0x1983   :  { %v13713_v16 = vpop.eup %13712  ;;  %12844 = vmatpush3.msra.mxu0 %v6389_v4  ;;  %12845 = vmatprep.mubr.msk.f32.mxu0 %vm13857_vm1, %v13856_v22  ;;  %v7436_v15 = vsel %vm361_vm2, %v13711_v45, 0.0 }
0x1984   :  { %v13715_v30 = vpop.eup %13714  ;;  %v7450_v2 = vmul.f32 %v13713_v16, %v13703_v35  ;;  %7437 = vadd.xlane.f32.xlu1 %v7436_v15  ;;  %12853 = vmatprep.subr.mxu0 %v7754_v27  ;;  %v7197_v35 = vadd.f32 %v14517_v12, %v14522_v14  ;;  %v14658_v15 = vld [vmem:[%s14931_s1] sm:$0xff] }
0x1985   :  { %v7448_v1 = vmul.f32 %v13715_v30, %v14584_v26  ;;  %v11589_v30 = vld [vmem:[#allocation5 + $0x3a] ss:$0 sm:$0xff] }
0x1986   :  { %v13717_v47 = vpop.eup %13716  ;;  %12846 = vmatmul.mubr.msk.f32.vlgmr.msra.gmra.mrb[64].mxu0 %vm361_vm2, %v7450_v2 }
0x1987   :  { %v7452_v53 = vmul.f32 %v13717_v47, %v13705_v61  ;;  %12841 = vmatmul.mubr.msk.f32.vlgmr.msra.gmra.mrb[98].mxu1 %vm361_vm2, %v7448_v1  ;;  %12854 = vmatpush3.msra.mxu0 %v7754_v27  ;;  %v8430_v27 = vld [vmem:[#allocation2 + $0x5c0] sm:$0xff] }
0x1988   :  { %12849 = vmatpush3.msra.mxu1 %v6394_v20  ;;  %12850 = vmatprep.mubr.msk.f32.mxu1 %vm13857_vm1, %v13856_v22 }
0x1989   :  { %12863 = vmatprep.subr.mxu1 %v13856_v22  ;;  %12858 = vmatprep.subr.mxu0 %v7607_v24 }
0x198b   :  { %12851 = vmatmul.mubr.msk.f32.vlgmr.msra.gmra.mrb[100].mxu1 %vm361_vm2, %v7452_v53 }
0x198c   :  { %12864 = vmatpush3.msra.mxu1 %v6793_v62  ;;  %12865 = vmatprep.mubr.msk.f32.mxu1 %vm13857_vm1, %v13856_v22 }
0x198d   :  { %12868 = vmatprep.subr.mxu1 %v13856_v22 }
0x19c2   :  { %v7277_v48 = vpop.f32.mrb[94].mxu1 }
0x19c3   :  { %v7363_v60 = vmul.f32 0.35355338, %v7277_v48  ;;  %v12827_v21 = vpop.f32.mrb[95].mxu1 }
0x19c5   :  { %v7371_v0 = vadd.f32 %v14527_v17, %v7363_v60 }
0x19c6   :  { %v7353_v52 = vpop.f32.mrb[96].mxu1 }
0x19c7   :  { %v7364_v18 = vmul.f32 0.35355338, %v7353_v52  ;;  %v12832_v10 = vpop.f32.mrb[97].mxu1  ;;  %v7391_v49 = vsel %vm361_vm2, %v7371_v0, -inf }
0x19c8   :  { %7392 = vmax.xlane.f32.xlu0 %v7391_v49 }
0x19c9   :  { %v7372_v3 = vadd.f32 %v14537_v9, %v7364_v18 }
0x19cb   :  { %v7394_v7 = vsel %vm361_vm2, %v7372_v3, -inf }
0x19cc   :  { %7395 = vmax.xlane.f32.xlu1 %v7394_v7 }
0x1a0d   :  { %v7435_v63 = vpop.xlane.xlu0 %7434 }
0x1a0e   :  { %13718 = vrcp.f32 %v7435_v63  ;;  %v8432_v63 = vld [vmem:[#allocation2 + $0x5d0] sm:$0xff] }
0x1a11   :  { %v7438_v26 = vpop.xlane.xlu1 %7437 }
0x1a12   :  { %13720 = vrcp.f32 %v7438_v26 }
0x1a18   :  { %v13719_v17 = vpop.eup %13718 }
0x1a19   :  { %v7454_v54 = vmul.f32 %v13719_v17, %v13707_v55  ;;  %v8433_v17 = vld [vmem:[#allocation2 + $0x5d8] sm:$0xff] }
0x1a1b   :  { %12866 = vmatmul.mubr.msk.f32.vlgmr.msra.gmra.mrb[102].mxu1 %vm361_vm2, %v7454_v54  ;;  %v8426_v54 = vld [vmem:[#allocation2 + $0x540] sm:$0xff] }
0x1a1c   :  { %v13721_v34 = vpop.eup %13720  ;;  %12869 = vmatpush3.msra.mxu1 %v14509_v50  ;;  %12870 = vmatprep.mubr.msk.f32.mxu1 %vm13857_vm1, %v13856_v22 }
0x1a1d   :  { %v7456_v9 = vmul.f32 %v13721_v34, %v13711_v45  ;;  %12878 = vmatprep.subr.mxu1 %v13856_v22  ;;  %v8427_v34 = vld [vmem:[#allocation2 + $0x548] sm:$0xff] }
0x1a1f   :  { %12871 = vmatmul.mubr.msk.f32.vlgmr.msra.gmra.mrb[104].mxu1 %vm361_vm2, %v7456_v9  ;;  %v13479_v9 = vpack.c.bf16 %v8433_v17, %v8432_v63  ;;  %v8847_v63 = vld [vmem:[#allocation2 + $0x678] sm:$0xff] }
0x1a20   :  { %12879 = vmatpush3.msra.mxu1 %v7197_v35  ;;  %12880 = vmatprep.mubr.msk.f32.mxu1 %vm13857_vm1, %v13856_v22  ;;  %v13467_v35 = vpack.c.bf16 %v8427_v34, %v8426_v54 }
0x1a22   :  { %13468 = vmatprep.subr.bf16.mxu1 %v13467_v35 }
0x1a55   :  { %v7530_v36 = vpop.f32.mrb[62].mxu0  ;;  %v7393_v37 = vpop.xlane.xlu0 %7392 }
0x1a56   :  { %v12837_v38 = vpop.f32.mrb[63].mxu0  ;;  %v7403_v6 = vsub.f32 %v7371_v0, %v7393_v37  ;;  %v8429_v37 = vld [vmem:[#allocation2 + $0x558] sm:$0xff] }
0x1a58   :  { %v7417_v50 = vmul.f32 1.442695, %v7403_v6  ;;  %v14680_v6 = vld [vmem:[%s14931_s1 + $0x8] sm:$0xff] }
0x1a59   :  { %v7677_v58 = vpop.f32.mrb[64].mxu0  ;;  %v7396_v61 = vpop.xlane.xlu1 %7395 }
0x1a5a   :  { %13722 = vpow2.f32 %v7417_v50  ;;  %v7603_v39 = vpop.f32.mrb[98].mxu1  ;;  %v12847_v40 = vpop.f32.mrb[65].mxu0  ;;  %12855 = vmatprep.mubr.msk.f32.mxu0 %vm361_vm2, %v7677_v58  ;;  %v7404_v41 = vsub.f32 %v7372_v3, %v7396_v61  ;;  %v8434_v50 = vld [vmem:[#allocation2 + $0x640] sm:$0xff]  ;;  %v8435_v58 = vld [vmem:[#allocation2 + $0x648] sm:$0xff] }
0x1a5b   :  { %v12842_v12 = vpop.f32.mrb[99].mxu1  ;;  %v13483_v61 = vpack.c.bf16 %v8435_v58, %v8434_v50  ;;  %v9248_v58 = vld [vmem:[#allocation2 + $0x680] sm:$0xff] }
0x1a5c   :  { %v7419_v14 = vmul.f32 1.442695, %v7404_v41 }
0x1a5e   :  { %13724 = vpow2.f32 %v7419_v14  ;;  %v7750_v32 = vpop.f32.mrb[100].mxu1 }
0x1a5f   :  { %v12852_v57 = vpop.f32.mrb[101].mxu1  ;;  %12856 = vmatmul.mubr.msk.f32.vlgmr.msra.gmra.mrb[66].mxu0 %vm361_vm2, %v7750_v32 }
0x1a60   :  { %12860 = vmatprep.mubr.msk.f32.mxu0 %vm361_vm2, %v7530_v36  ;;  %12859 = vmatpush3.msra.mxu0 %v7607_v24  ;;  %v8431_v24 = vld [vmem:[#allocation2 + $0x5c8] sm:$0xff]  ;;  %v8428_v36 = vld [vmem:[#allocation2 + $0x550] sm:$0xff]  ;;  %v11590_v57 = vld [vmem:[#allocation5 + $0x40] ss:$0 sm:$0xff] }
0x1a61   :  { %12873 = vmatprep.subr.mxu0 %v8063_v31  ;;  %v13475_v26 = vpack.c.bf16 %v8431_v24, %v8430_v27  ;;  %v13471_v38 = vpack.c.bf16 %v8429_v37, %v8428_v36  ;;  %v14707_v27 = vld [vmem:[#allocation5 + $0x36] ss:$0 sm:$0xff] }
0x1a62   :  { %v8846_v24 = vld [vmem:[#allocation2 + $0x670] sm:$0xff] }
0x1a63   :  { %v13511_v34 = vpack.c.bf16 %v8847_v63, %v8846_v24  ;;  %v9242_v37 = vld [vmem:[#allocation2 + $0x590] sm:$0xff] }
0x1a64   :  { %v13723_v42 = vpop.eup %13722 }
0x1a65   :  { %v7439_v11 = vsel %vm361_vm2, %v13723_v42, 0.0 }
0x1a66   :  { %7440 = vadd.xlane.f32.xlu0 %v7439_v11 }
0x1a67   :  { %12861 = vmatmul.mubr.msk.f32.vlgmr.msra.gmra.mrb[66].mxu0 %vm361_vm2, %v7603_v39 }
0x1a68   :  { %v13725_v43 = vpop.eup %13724  ;;  %12874 = vmatpush3.msra.mxu0 %v8063_v31  ;;  %v11591_v31 = vld [vmem:[#allocation5 + $0x41] ss:$0 sm:$0xff] }
0x1a69   :  { %v7442_v46 = vsel %vm361_vm2, %v13725_v43, 0.0  ;;  %12883 = vmatprep.subr.mxu0 %v13856_v22 }
0x1a6a   :  { %7443 = vadd.xlane.f32.xlu1 %v7442_v46 }
0x1aee   :  { %v7986_v56 = vpop.f32.mrb[102].mxu1 }
0x1aef   :  { %v12867_v5 = vpop.f32.mrb[103].mxu1  ;;  %12875 = vmatprep.mubr.msk.f32.mxu0 %vm361_vm2, %v7986_v56 }
0x1af2   :  { %v8059_v8 = vpop.f32.mrb[104].mxu1 }
0x1af3   :  { %v7441_v44 = vpop.xlane.xlu0 %7440  ;;  %v12872_v29 = vpop.f32.mrb[105].mxu1  ;;  %12876 = vmatmul.mubr.msk.f32.vlgmr.msra.gmra.mrb[66].mxu0 %vm361_vm2, %v8059_v8  ;;  %v8436_v8 = vld [vmem:[#allocation2 + $0x650] sm:$0xff] }
0x1af4   :  { %13726 = vrcp.f32 %v7441_v44  ;;  %12884 = vmatpush3.msra.mxu0 %v14520_v13  ;;  %12885 = vmatprep.mubr.msk.f32.mxu0 %vm13857_vm1, %v13856_v22  ;;  %v8437_v44 = vld [vmem:[#allocation2 + $0x658] sm:$0xff] }
0x1af5   :  { %12888 = vmatprep.subr.mxu0 %v8293_v25 }
0x1af7   :  { %v7444_v28 = vpop.xlane.xlu1 %7443 }
0x1af8   :  { %13728 = vrcp.f32 %v7444_v28 }
0x1afe   :  { %v13727_v55 = vpop.eup %13726 }
0x1aff   :  { %v7458_v33 = vmul.f32 %v13727_v55, %v13723_v42  ;;  %v13487_v55 = vpack.c.bf16 %v8437_v44, %v8436_v8  ;;  %v9655_v8 = vld [vmem:[#allocation2 + $0x6b8] sm:$0xff] }
0x1b01   :  { %12881 = vmatmul.mubr.msk.f32.vlgmr.msra.gmra.mrb[106].mxu1 %vm361_vm2, %v7458_v33  ;;  %v11595_v33 = vld [vmem:[#allocation5 + $0x32] ss:$0 sm:$0xff] }
0x1b02   :  { %v13729_v19 = vpop.eup %13728  ;;  %13470 = vmatpush3.bf16.msra.mxu1 %v13467_v35  ;;  %v9241_v35 = vld [vmem:[#allocation2 + $0x588] sm:$0xff] }
0x1b03   :  { %v7460_v59 = vmul.f32 %v13729_v19, %v13725_v43  ;;  %13472 = vmatprep.subr.bf16.mxu1 %v13471_v38 }
0x1b05   :  { %12886 = vmatmul.mubr.msk.f32.vlgmr.msra.gmra.mrb[68].mxu0 %vm361_vm2, %v7460_v59 }
0x1b06   :  { %12889 = vmatpush3.msra.mxu0 %v8293_v25  ;;  %13474 = vmatpush3.bf16.msra.mxu1 %v13471_v38  ;;  %v9243_v38 = vld [vmem:[#allocation2 + $0x598] sm:$0xff] }
0x1b07   :  { %13476 = vmatprep.subr.bf16.mxu0 %v13475_v26  ;;  %13484 = vmatprep.subr.bf16.mxu1 %v13483_v61  ;;  %v13519_v50 = vpack.c.bf16 %v9243_v38, %v9242_v37 }
0x1bd4   :  { %v8216_v4 = vpop.f32.mrb[106].mxu1 }
0x1bd5   :  { %v12882_v45 = vpop.f32.mrb[107].mxu1  ;;  %12890 = vmatprep.mubr.msk.f32.mxu0 %vm361_vm2, %v8216_v4 }
0x1bd6   :  { %v8840_v45 = vld [vmem:[#allocation2 + $0x5e0] sm:$0xff] }
0x1bd8   :  { %v8289_v13 = vpop.f32.mrb[68].mxu0 }
0x1bd9   :  { %v12887_v16 = vpop.f32.mrb[69].mxu0  ;;  %12891 = vmatmul.mubr.msk.f32.vlgmr.msra.gmra.mrb[66].mxu0 %vm361_vm2, %v8289_v13  ;;  %v8841_v13 = vld [vmem:[#allocation2 + $0x5e8] sm:$0xff] }
0x1bda   :  { %12912 = vmatprep.mubr.msk.f32.mxu0 %vm62_vm0, %v14658_v15  ;;  %13478 = vmatpush3.bf16.msra.mxu0 %v13475_v26  ;;  %v13499_v16 = vpack.c.bf16 %v8841_v13, %v8840_v45  ;;  %v14757_v13 = vld [vmem:[%s14932_s2] ss:$0 sm:$0xff] }
0x1bdb   :  { %13480 = vmatprep.subr.bf16.mxu0 %v13479_v9 }
0x1bde   :  { %13482 = vmatpush3.bf16.msra.mxu0 %v13479_v9  ;;  %v9240_v9 = vld [vmem:[#allocation2 + $0x580] sm:$0xff] }
0x1bdf   :  { %12926 = vmatprep.subr.mxu0 %v13856_v22  ;;  %v13515_v36 = vpack.c.bf16 %v9241_v35, %v9240_v9 }
0x1be1   :  { %12913 = vmatmul.mubr.msk.f32.vlgmr.msra.gmra.mrb[70].mxu0 %vm62_vm0, %v14680_v6 }
0x1be2   :  { %12928 = vmatprep.mubr.msk.f32.mxu0 %vm13857_vm1, %v13856_v22 }
0x1cac   :  { %v12892_v2 = vpop.f32.mrb[66].mxu0 }
0x1cad   :  { %v8383_v1 = vadd.f32 %v12892_v2, %v11589_v30  ;;  %v8366_v47 = vpop.f32.mrb[67].mxu0  ;;  %v8837_v2 = vld [vmem:[#allocation2 + $0x568] sm:$0xff] }
0x1cae   :  { %v8382_v20 = vadd.f32 %v11589_v30, %v8366_v47  ;;  %v8836_v30 = vld [vmem:[#allocation2 + $0x560] sm:$0xff]  ;;  %v11592_v47 = vld [vmem:[#allocation5 + $0x2e] ss:$0 sm:$0xff] }
0x1caf   :  { %v14663_v53 = vadd.f32 %v8383_v1, %v14421_v23  ;;  %v13491_v1 = vpack.c.bf16 %v8837_v2, %v8836_v30 }
0x1cb0   :  { %v14666_v62 = vadd.f32 %v8382_v20, %v14423_v51  ;;  %v8842_v20 = vld [vmem:[#allocation2 + $0x5f0] sm:$0xff] }
0x1cb1   :  { %v8391_v48 = vsel %vm62_vm0, %v14663_v53, 0.0 }
0x1cb2   :  { %8392 = vadd.xlane.f32.xlu1 %v8391_v48  ;;  %v8388_v60 = vsel %vm62_vm0, %v14666_v62, 0.0  ;;  %v8843_v48 = vld [vmem:[#allocation2 + $0x5f8] sm:$0xff] }
0x1cb3   :  { %8389 = vadd.xlane.f32.xlu0 %v8388_v60  ;;  %v8838_v60 = vld [vmem:[#allocation2 + $0x570] sm:$0xff] }
0x1cb4   :  { %v12914_v19 = vpop.f32.mrb[70].mxu0 }
0x1cb5   :  { %v8601_v59 = vadd.f32 %v12914_v19, %v11595_v33  ;;  %v8595_v25 = vpop.f32.mrb[71].mxu0 }
0x1cb6   :  { %v8596_v4 = vadd.f32 %v11595_v33, %v8595_v25 }
0x1cb8   :  { %12927 = vmatpush3.xpose.msk.msra.mxu0 %vm361_vm2, %v8596_v4  ;;  %v14749_v4 = vld [vmem:[%s14932_s2 + $0x1] ss:$0 sm:$0xff]  ;;  %s13858_s2 = smov [#allocation7]  }
0x1cb9   :  { %13492 = vmatprep.subr.bf16.mxu0 %v13491_v1  ;;  %s11354_s23 = sshll.u32 %s13858_s2, 4  ;;  %s11355_s23 = int_to_ptr.vmem [resolvable:$true] %s11354_s23 }
0x1cba   :  { %s13824_s24 = scalar_lea.vmem %s11355_s23, 256  ;;  %p13829_p3 = scmp.lt.s32.totalorder %s11355_s23, %s11355_s23 }
0x1cbb   :  { %p13825_p2 = scmp.ne.s32.totalorder %s11355_s23, %s13824_s24  ;;  %p13830_p4 = scmp.lt.s32.totalorder %s13824_s24, %s13824_s24 }
0x1cbd   :  { %p13831_p5 = por %p13830_p4, %p13829_p3 }
0x1cbf   :  { %p13832_p6 = pnand %p13831_p5, %p13825_p2 }
0x1d3f   :  { %v8393_v21 = vpop.xlane.xlu1 %8392 }
0x1d40   :  { %v8395_v0 = vmul.f32 0.03125, %v8393_v21  ;;  %v8390_v52 = vpop.xlane.xlu0 %8389  ;;  %v8839_v21 = vld [vmem:[#allocation2 + $0x578] sm:$0xff] }
0x1d41   :  { %v8394_v18 = vmul.f32 0.03125, %v8390_v52 }
0x1d42   :  { %v8397_v10 = vsub.f32 %v14663_v53, %v8395_v0 }
0x1d43   :  { %v8396_v23 = vsub.f32 %v14666_v62, %v8394_v18 }
0x1d44   :  { %v8399_v49 = vmul.f32 %v8397_v10, %v8397_v10  ;;  %v8413_v42 = vmul.f32 %v11590_v57, %v8397_v10 }
0x1d45   :  { %v8398_v3 = vmul.f32 %v8396_v23, %v8396_v23  ;;  %v8412_v43 = vmul.f32 %v11590_v57, %v8396_v23  ;;  %v13503_v23 = vpack.c.bf16 %v8843_v48, %v8842_v20 }
0x1d46   :  { %v8403_v51 = vsel %vm62_vm0, %v8399_v49, 0.0  ;;  %v13495_v49 = vpack.c.bf16 %v8839_v21, %v8838_v60  ;;  %v11605_v60 = vld [vmem:[#allocation5 + $0x2f] ss:$0 sm:$0xff] }
0x1d47   :  { %8404 = vadd.xlane.f32.xlu1 %v8403_v51  ;;  %v8400_v7 = vsel %vm62_vm0, %v8398_v3, 0.0  ;;  %v8844_v3 = vld [vmem:[#allocation2 + $0x660] sm:$0xff]  ;;  %v8845_v51 = vld [vmem:[#allocation2 + $0x668] sm:$0xff] }
0x1d48   :  { %8401 = vadd.xlane.f32.xlu0 %v8400_v7  ;;  %v13507_v7 = vpack.c.bf16 %v8845_v51, %v8844_v3  ;;  %v9246_v3 = vld [vmem:[#allocation2 + $0x610] sm:$0xff]  ;;  %v9247_v51 = vld [vmem:[#allocation2 + $0x618] sm:$0xff] }
0x1d49   :  { %v13527_v24 = vpack.c.bf16 %v9247_v51, %v9246_v3 }
0x1dd4   :  { %v8405_v39 = vpop.xlane.xlu1 %8404 }
0x1dd5   :  { %v8407_v40 = vmul.f32 0.032258064, %v8405_v39  ;;  %v8402_v41 = vpop.xlane.xlu0 %8401 }
0x1dd6   :  { %v8406_v12 = vmul.f32 0.032258064, %v8402_v41  ;;  %v9251_v41 = vld [vmem:[#allocation2 + $0x698] sm:$0xff] }
0x1dd7   :  { %v8415_v14 = vadd.f32 1e-06, %v8407_v40  ;;  %v9250_v40 = vld [vmem:[#allocation2 + $0x690] sm:$0xff] }
0x1dd8   :  { %v8414_v32 = vadd.f32 1e-06, %v8406_v12  ;;  %v13535_v12 = vpack.c.bf16 %v9251_v41, %v9250_v40 }
0x1dd9   :  { %13730 = vrsqrt.f32 %v8415_v14  ;;  %v9644_v14 = vld [vmem:[#allocation2 + $0x5a0] sm:$0xff] }
0x1dda   :  { %13732 = vrsqrt.f32 %v8414_v32  ;;  %v9645_v32 = vld [vmem:[#allocation2 + $0x5a8] sm:$0xff] }
0x1ddb   :  { %v13539_v57 = vpack.c.bf16 %v9645_v32, %v9644_v14 }
0x1de3   :  { %v13731_v11 = vpop.eup %13730 }
0x1de4   :  { %v13733_v46 = vpop.eup %13732  ;;  %v8419_v56 = vmul.f32 %v13731_v11, %v8413_v42  ;;  %v9646_v42 = vld [vmem:[#allocation2 + $0x5b0] sm:$0xff]  ;;  %v9647_v11 = vld [vmem:[#allocation2 + $0x5b8] sm:$0xff] }
0x1de5   :  { %v8418_v5 = vmul.f32 %v13733_v46, %v8412_v43  ;;  %v13543_v43 = vpack.c.bf16 %v9647_v11, %v9646_v42  ;;  %v9652_v46 = vld [vmem:[#allocation2 + $0x6a0] sm:$0xff]  ;;  %v11621_v42 = vld [vmem:[#allocation5 + $0x34] ss:$0 sm:$0xff] }
0x1de6   :  { %v14688_v28 = vadd.f32 %v11591_v31, %v8419_v56 }
0x1de7   :  { %v14686_v29 = vadd.f32 %v11591_v31, %v8418_v5  ;;  %v9653_v31 = vld [vmem:[#allocation2 + $0x6a8] sm:$0xff]  ;;  %v9654_v5 = vld [vmem:[#allocation2 + $0x6b0] sm:$0xff] }
0x1de8   :  { %v13555_v56 = vpack.c.bf16 %v9653_v31, %v9652_v46  ;;  %v13559_v44 = vpack.c.bf16 %v9655_v8, %v9654_v5  ;;  %v11618_v46 = vld [vmem:[#allocation5 + $0x30] ss:$0 sm:$0xff]  ;;  %v9649_v5 = vld [vmem:[#allocation2 + $0x628] sm:$0xff] }
0x1de9   :  { %12901 = vmatprep.mubr.msk.f32.mxu1 %vm62_vm0, %v14686_v29 }
0x1dea   :  { %12902 = vmatmul.mubr.msk.f32.vlgmr.msra.gmra.mrb[108].mxu1 %vm62_vm0, %v14688_v28 }
0x1deb   :  { %13486 = vmatpush3.bf16.msra.mxu1 %v13483_v61  ;;  %12923 = vmatprep.mubr.msk.f32.mxu1 %vm62_vm0, %v14658_v15  ;;  %v9249_v61 = vld [vmem:[#allocation2 + $0x688] sm:$0xff] }
0x1dec   :  { %13488 = vmatprep.subr.bf16.mxu1 %v13487_v55  ;;  %v13531_v39 = vpack.c.bf16 %v9249_v61, %v9248_v58 }
0x1def   :  { %13490 = vmatpush3.bf16.msra.mxu1 %v13487_v55 }
0x1df0   :  { %12931 = vmatprep.subr.mxu1 %v13856_v22 }
0x1df2   :  { %12924 = vmatmul.mubr.msk.f32.vlgmr.msra.gmra.mrb[110].mxu1 %vm62_vm0, %v14680_v6 }
0x1df3   :  { %12933 = vmatprep.mubr.msk.f32.mxu1 %vm13857_vm1, %v13856_v22 }
0x1df8   :  { %12932 = vmatpush3.xpose.msk.msra.mxu1 %vm361_vm2, %v8601_v59 }
0x1df9   :  { %13500 = vmatprep.subr.bf16.mxu1 %v13499_v16 }
0x1ebd   :  { %v12903_v0 = vpop.f32.mrb[108].mxu1 }
0x1ebe   :  { %v8521_v52 = vadd.f32 %v12903_v0, %v11592_v47  ;;  %v8515_v18 = vpop.f32.mrb[109].mxu1 }
0x1ebf   :  { %v8516_v10 = vadd.f32 %v11592_v47, %v8515_v18  ;;  %v9245_v18 = vld [vmem:[#allocation2 + $0x608] sm:$0xff] }
0x1ec0   :  { %12934 = vmatmul.mubr.msk.f32.vlgmr.msra.gmra.mrb[112].mxu1 %vm361_vm2, %v8521_v52  ;;  %v9244_v52 = vld [vmem:[#allocation2 + $0x600] sm:$0xff] }
0x1ec1   :  { %13502 = vmatpush3.bf16.msra.mxu1 %v13499_v16  ;;  %12929 = vmatmul.mubr.msk.f32.vlgmr.msra.gmra.mrb[72].mxu0 %vm361_vm2, %v8516_v10 }
0x1ec2   :  { %13494 = vmatpush3.bf16.msra.mxu0 %v13491_v1  ;;  %12944 = vmatprep.mubr.msk.f32.mxu0 %vm62_vm0, %v14686_v29  ;;  %v11608_v1 = vld [vmem:[#allocation5 + $0x33] ss:$0 sm:$0xff] }
0x1ec3   :  { %13504 = vmatprep.subr.bf16.mxu1 %v13503_v23  ;;  %13496 = vmatprep.subr.bf16.mxu0 %v13495_v49 }
0x1ec4   :  { %12955 = vmatprep.mubr.msk.f32.mxu1 %vm62_vm0, %v14658_v15 }
0x1ec5   :  { %13506 = vmatpush3.bf16.msra.mxu1 %v13503_v23  ;;  %v12925_v26 = vpop.f32.mrb[110].mxu1  ;;  %v13523_v23 = vpack.c.bf16 %v9245_v18, %v9244_v52 }
0x1ec6   :  { %13498 = vmatpush3.bf16.msra.mxu0 %v13495_v49  ;;  %v14712_v17 = vadd.f32 %v12925_v26, %v14707_v27  ;;  %v8675_v54 = vpop.f32.mrb[111].mxu1  ;;  %12969 = vmatprep.subr.mxu1 %v13856_v22 }
0x1ec7   :  { %13508 = vmatprep.subr.bf16.mxu0 %v13507_v7  ;;  %v8676_v55 = vadd.f32 %v14707_v27, %v8675_v54 }
0x1ec8   :  { %12956 = vmatmul.mubr.msk.f32.vlgmr.msra.gmra.mrb[114].mxu1 %vm62_vm0, %v14680_v6 }
0x1ec9   :  { %12945 = vmatmul.mubr.msk.f32.vlgmr.msra.gmra.mrb[74].mxu0 %vm62_vm0, %v14688_v28  ;;  %12971 = vmatprep.mubr.msk.f32.mxu1 %vm13857_vm1, %v13856_v22 }
0x1eca   :  { %13510 = vmatpush3.bf16.msra.mxu0 %v13507_v7  ;;  %12966 = vmatprep.mubr.msk.f32.mxu0 %vm62_vm0, %v14658_v15 }
0x1ecb   :  { %13512 = vmatprep.subr.bf16.mxu0 %v13511_v34 }
0x1ece   :  { %13514 = vmatpush3.bf16.msra.mxu0 %v13511_v34  ;;  %v14784_v34 = vld [vmem:[#allocation5 + $0x38] ss:$0 sm:$0xff] }
0x1ecf   :  { %13516 = vmatprep.subr.bf16.mxu0 %v13515_v36 }
0x1ed1   :  { %12967 = vmatmul.mubr.msk.f32.vlgmr.msra.gmra.mrb[76].mxu0 %vm62_vm0, %v14680_v6 }
0x1ed2   :  { %13518 = vmatpush3.bf16.msra.mxu0 %v13515_v36  ;;  %12987 = vmatprep.mubr.msk.f32.mxu0 %vm62_vm0, %v14686_v29 }
0x1ed3   :  { %13520 = vmatprep.subr.bf16.mxu0 %v13519_v50 }
0x1ed6   :  { %13522 = vmatpush3.bf16.msra.mxu0 %v13519_v50 }
0x1ed7   :  { %13532 = vmatprep.subr.bf16.mxu0 %v13531_v39 }
0x1ed9   :  { %12988 = vmatmul.mubr.msk.f32.vlgmr.msra.gmra.mrb[78].mxu0 %vm62_vm0, %v14688_v28 }
0x1eda   :  { %13534 = vmatpush3.bf16.msra.mxu0 %v13531_v39  ;;  %13009 = vmatprep.mubr.msk.f32.mxu0 %vm62_vm0, %v14658_v15 }
0x1edb   :  { %13536 = vmatprep.subr.bf16.mxu0 %v13535_v12 }
0x1ede   :  { %13538 = vmatpush3.bf16.msra.mxu0 %v13535_v12 }
0x1edf   :  { %13540 = vmatprep.subr.bf16.mxu0 %v13539_v57 }
0x1ee1   :  { %13010 = vmatmul.mubr.msk.f32.vlgmr.msra.gmra.mrb[80].mxu0 %vm62_vm0, %v14680_v6 }
0x1ee2   :  { %13542 = vmatpush3.bf16.msra.mxu0 %v13539_v57  ;;  %13030 = vmatprep.mubr.msk.f32.mxu0 %vm62_vm0, %v14686_v29 }
0x1ee3   :  { %13544 = vmatprep.subr.bf16.mxu0 %v13543_v43 }
0x1ee6   :  { %13546 = vmatpush3.bf16.msra.mxu0 %v13543_v43 }
0x1ee7   :  { %13556 = vmatprep.subr.bf16.mxu0 %v13555_v56 }
0x1ee9   :  { %13031 = vmatmul.mubr.msk.f32.vlgmr.msra.gmra.mrb[82].mxu0 %vm62_vm0, %v14688_v28 }
0x1eea   :  { %13558 = vmatpush3.bf16.msra.mxu0 %v13555_v56  ;;  %13052 = vmatprep.mubr.msk.f32.mxu0 %vm62_vm0, %v14658_v15  ;;  %v9648_v56 = vld [vmem:[#allocation2 + $0x620] sm:$0xff] }
0x1eeb   :  { %13560 = vmatprep.subr.bf16.mxu0 %v13559_v44 }
0x1eee   :  { %13562 = vmatpush3.bf16.msra.mxu0 %v13559_v44  ;;  %v13547_v44 = vpack.c.bf16 %v9649_v5, %v9648_v56 }
0x1eef   :  { %13065 = vmatprep.subr.mxu0 %v13856_v22 }
0x1ef1   :  { %13053 = vmatmul.mubr.msk.f32.vlgmr.msra.gmra.mrb[84].mxu0 %vm62_vm0, %v14680_v6 }
0x1ef2   :  { %13066 = vmatpush3.msra.mxu0 %v8676_v55  ;;  %13067 = vmatprep.mubr.msk.f32.mxu0 %vm13857_vm1, %v13856_v22 }
0x1ef3   :  { %13075 = vmatprep.subr.mxu0 %v13856_v22 }
0x1f93   :  { %v8832_v29 = vpop.f32.mrb[112].mxu1 }
0x1f94   :  { %v10049_v28 = vmul.f32 0.35355338, %v8832_v29  ;;  %v8756_v33 = vpop.f32.mrb[72].mxu0  ;;  %v12935_v19 = vpop.f32.mrb[113].mxu1  ;;  %v9650_v29 = vld [vmem:[#allocation2 + $0x630] sm:$0xff] }
0x1f95   :  { %v10048_v59 = vmul.f32 0.35355338, %v8756_v33  ;;  %v12930_v25 = vpop.f32.mrb[73].mxu0 }
0x1f96   :  { %v14752_v45 = vadd.f32 %v14749_v4, %v10049_v28  ;;  %v9651_v28 = vld [vmem:[#allocation2 + $0x638] sm:$0xff] }
0x1f97   :  { %v14760_v16 = vadd.f32 %v14757_v13, %v10048_v59  ;;  %v13551_v19 = vpack.c.bf16 %v9651_v28, %v9650_v29 }
0x1f98   :  { %v10067_v30 = vsel %vm361_vm2, %v14752_v45, -inf }
0x1f99   :  { %10068 = vmax.xlane.f32.xlu1 %v10067_v30  ;;  %v10064_v2 = vsel %vm361_vm2, %v14760_v16, -inf }
0x1f9a   :  { %10065 = vmax.xlane.f32.xlu0 %v10064_v2 }
0x1f9b   :  { %v12957_v47 = vpop.f32.mrb[114].mxu1 }
0x1f9c   :  { %v12946_v20 = vpop.f32.mrb[74].mxu0  ;;  %v8999_v48 = vpop.f32.mrb[115].mxu1  ;;  %v9005_v49 = vadd.f32 %v12957_v47, %v11608_v1 }
0x1f9d   :  { %v9000_v21 = vadd.f32 %v11608_v1, %v8999_v48  ;;  %v8919_v0 = vpop.f32.mrb[75].mxu0  ;;  %v8925_v7 = vadd.f32 %v12946_v20, %v11605_v60 }
0x1f9e   :  { %v8920_v10 = vadd.f32 %v11605_v60, %v8919_v0 }
0x1f9f   :  { %12970 = vmatpush3.xpose.msk.msra.mxu1 %vm361_vm2, %v9000_v21 }
0x1fa0   :  { %12974 = vmatprep.subr.mxu1 %v13856_v22 }
0x1fa2   :  { %12972 = vmatmul.mubr.msk.f32.vlgmr.msra.gmra.mrb[116].mxu1 %vm361_vm2, %v8920_v10 }
0x1fa3   :  { %12975 = vmatpush3.xpose.msk.msra.mxu1 %vm361_vm2, %v9005_v49  ;;  %12976 = vmatprep.mubr.msk.f32.mxu1 %vm13857_vm1, %v13856_v22 }
0x1fa4   :  { %13524 = vmatprep.subr.bf16.mxu1 %v13523_v23  ;;  %v14772_v27 = vpop.f32.mrb[76].mxu0 }
0x1fa5   :  { %v14774_v63 = vpop.f32.mrb[77].mxu0 }
0x1fa6   :  { %12977 = vmatmul.mubr.msk.f32.vlgmr.msra.gmra.mrb[118].mxu1 %vm361_vm2, %v8925_v7 }
0x1fa7   :  { %13526 = vmatpush3.bf16.msra.mxu1 %v13523_v23  ;;  %12998 = vmatprep.mubr.msk.f32.mxu1 %vm62_vm0, %v14658_v15 }
0x1fa8   :  { %13528 = vmatprep.subr.bf16.mxu1 %v13527_v24 }
0x1fab   :  { %13530 = vmatpush3.bf16.msra.mxu1 %v13527_v24 }
0x1fac   :  { %v12989_v26 = vpop.f32.mrb[78].mxu0  ;;  %13012 = vmatprep.subr.mxu1 %v13856_v22 }
0x1fad   :  { %v9323_v54 = vpop.f32.mrb[79].mxu0  ;;  %v9329_v33 = vadd.f32 %v12989_v26, %v11618_v46 }
0x1fae   :  { %12999 = vmatmul.mubr.msk.f32.vlgmr.msra.gmra.mrb[120].mxu1 %vm62_vm0, %v14680_v6  ;;  %v9324_v8 = vadd.f32 %v11618_v46, %v9323_v54 }
0x1faf   :  { %13014 = vmatprep.mubr.msk.f32.mxu1 %vm13857_vm1, %v13856_v22 }
0x1fb4   :  { %v13011_v9 = vpop.f32.mrb[80].mxu0 }
0x1fb5   :  { %v14787_v35 = vadd.f32 %v13011_v9, %v14784_v34  ;;  %v14789_v36 = vpop.f32.mrb[81].mxu0  ;;  %v11634_v9 = vld [vmem:[#allocation5 + $0x35] ss:$0 sm:$0xff] }
0x1fbc   :  { %v14791_v37 = vpop.f32.mrb[82].mxu0 }
0x1fbd   :  { %v14793_v38 = vpop.f32.mrb[83].mxu0 }
0x2026   :  { %v10069_v25 = vpop.xlane.xlu1 %10068 }
0x2027   :  { %v10066_v59 = vpop.xlane.xlu0 %10065  ;;  %v10089_v1 = vsub.f32 %v14752_v45, %v10069_v25 }
0x2028   :  { %v10088_v30 = vsub.f32 %v14760_v16, %v10066_v59 }
0x2029   :  { %v10098_v48 = vmul.f32 1.442695, %v10089_v1 }
0x202a   :  { %v10096_v47 = vmul.f32 1.442695, %v10088_v30 }
0x202c   :  { %13734 = vpow2.f32 %v10096_v47 }
0x202d   :  { %13736 = vpow2.f32 %v10098_v48  ;;  %v9484_v48 = vadd.f32 %v14784_v34, %v14789_v36 }
0x2036   :  { %v13735_v3 = vpop.eup %13734 }
0x2037   :  { %v14818_v7 = vpop.eup %13736  ;;  %v10112_v24 = vsel %vm361_vm2, %v13735_v3, 0.0 }
0x2075   :  { %v9160_v50 = vpop.f32.mrb[116].mxu1 }
0x2076   :  { %v10050_v58 = vmul.f32 0.35355338, %v9160_v50  ;;  %v12973_v61 = vpop.f32.mrb[117].mxu1 }
0x2078   :  { %v10058_v39 = vadd.f32 %v14757_v13, %v10050_v58 }
0x2079   :  { %v9236_v40 = vpop.f32.mrb[118].mxu1 }
0x207a   :  { %v10051_v41 = vmul.f32 0.35355338, %v9236_v40  ;;  %v12978_v12 = vpop.f32.mrb[119].mxu1  ;;  %v10070_v14 = vsel %vm361_vm2, %v10058_v39, -inf }
0x207b   :  { %10071 = vmax.xlane.f32.xlu0 %v10070_v14 }
0x207c   :  { %v10059_v32 = vadd.f32 %v14749_v4, %v10051_v41  ;;  %v11631_v41 = vld [vmem:[#allocation5 + $0x31] ss:$0 sm:$0xff] }
0x207d   :  { %v9728_v14 = vadd.f32 %v11631_v41, %v14793_v38 }
0x207e   :  { %v10073_v57 = vsel %vm361_vm2, %v10059_v32, -inf }
0x207f   :  { %10074 = vmax.xlane.f32.xlu1 %v10073_v57 }
0x2081   :  { %v13000_v11 = vpop.f32.mrb[120].mxu1 }
0x2082   :  { %v9403_v43 = vpop.f32.mrb[121].mxu1  ;;  %v9409_v55 = vadd.f32 %v13000_v11, %v11621_v42 }
0x2083   :  { %v9404_v31 = vadd.f32 %v11621_v42, %v9403_v43  ;;  %v9733_v42 = vadd.f32 %v14791_v37, %v11631_v41 }
0x2085   :  { %13013 = vmatpush3.xpose.msk.msra.mxu1 %vm361_vm2, %v9404_v31 }
0x2086   :  { %13017 = vmatprep.subr.mxu1 %v13856_v22 }
0x2088   :  { %13015 = vmatmul.mubr.msk.f32.vlgmr.msra.gmra.mrb[122].mxu1 %vm361_vm2, %v9324_v8 }
0x2089   :  { %13018 = vmatpush3.xpose.msk.msra.mxu1 %vm361_vm2, %v9409_v55  ;;  %13019 = vmatprep.mubr.msk.f32.mxu1 %vm13857_vm1, %v13856_v22  ;;  %v11611_v55 = vld [vmem:[#allocation5 + $0x37] ss:$0 sm:$0xff] }
0x208a   :  { %13548 = vmatprep.subr.bf16.mxu1 %v13547_v44 }
0x208c   :  { %13020 = vmatmul.mubr.msk.f32.vlgmr.msra.gmra.mrb[124].mxu1 %vm361_vm2, %v9329_v33 }
0x208d   :  { %13550 = vmatpush3.bf16.msra.mxu1 %v13547_v44  ;;  %13041 = vmatprep.mubr.msk.f32.mxu1 %vm62_vm0, %v14658_v15 }
0x208e   :  { %13552 = vmatprep.subr.bf16.mxu1 %v13551_v19 }
0x2091   :  { %13554 = vmatpush3.bf16.msra.mxu1 %v13551_v19  ;;  %v9080_v19 = vadd.f32 %v11611_v55, %v14774_v63 }
0x2092   :  { %13055 = vmatprep.subr.mxu1 %v13856_v22 }
0x2094   :  { %13042 = vmatmul.mubr.msk.f32.vlgmr.msra.gmra.mrb[126].mxu1 %vm62_vm0, %v14680_v6 }
0x2095   :  { %13057 = vmatprep.mubr.msk.f32.mxu1 %vm13857_vm1, %v13856_v22 }
0x2108   :  { %v10072_v2 = vpop.xlane.xlu0 %10071 }
0x2109   :  { %v10090_v20 = vsub.f32 %v10058_v39, %v10072_v2  ;;  %v10115_v39 = vsel %vm361_vm2, %v14818_v7, 0.0 }
0x210b   :  { %v10100_v60 = vmul.f32 1.442695, %v10090_v20 }
0x210c   :  { %v10075_v15 = vpop.xlane.xlu1 %10074 }
0x210d   :  { %v10091_v21 = vsub.f32 %v10059_v32, %v10075_v15  ;;  %13738 = vpow2.f32 %v10100_v60  ;;  %v9085_v15 = vadd.f32 %v14772_v27, %v11611_v55  ;;  %v13054_v27 = vpop.f32.mrb[84].mxu0  ;;  %v11637_v60 = vld [vmem:[#allocation5 + $0x39] ss:$0 sm:$0xff] }
0x210f   :  { %v10102_v6 = vmul.f32 1.442695, %v10091_v21  ;;  %v14859_v21 = vadd.f32 %v13054_v27, %v11637_v60 }
0x2111   :  { %13740 = vpow2.f32 %v10102_v6  ;;  %v9887_v6 = vpop.f32.mrb[85].mxu0 }
0x2117   :  { %v13739_v54 = vpop.eup %13738 }
0x2118   :  { %v10118_v61 = vsel %vm361_vm2, %v13739_v54, 0.0 }
0x211b   :  { %v13741_v40 = vpop.eup %13740 }
0x211c   :  { %v10121_v32 = vsel %vm361_vm2, %v13741_v40, 0.0 }
0x215b   :  { %v9564_v0 = vpop.f32.mrb[122].mxu1 }
0x215c   :  { %v10052_v52 = vmul.f32 0.35355338, %v9564_v0  ;;  %v13016_v18 = vpop.f32.mrb[123].mxu1 }
0x215e   :  { %v10060_v10 = vadd.f32 %v14757_v13, %v10052_v52 }
0x215f   :  { %v9640_v16 = vpop.f32.mrb[124].mxu1 }
0x2160   :  { %v10053_v23 = vmul.f32 0.35355338, %v9640_v16  ;;  %v13021_v49 = vpop.f32.mrb[125].mxu1  ;;  %v10076_v45 = vsel %vm361_vm2, %v10060_v10, -inf }
0x2161   :  { %10077 = vmax.xlane.f32.xlu0 %v10076_v45 }
0x2162   :  { %v10061_v51 = vadd.f32 %v14749_v4, %v10053_v23 }
0x2164   :  { %v10079_v26 = vsel %vm361_vm2, %v10061_v51, -inf }
0x2165   :  { %10113 = vadd.xlane.f32.xlu0 %v10112_v24  ;;  %10080 = vmax.xlane.f32.xlu1 %v10079_v26 }
0x2167   :  { %v13043_v50 = vpop.f32.mrb[126].mxu1 }
0x2168   :  { %v9807_v58 = vpop.f32.mrb[127].mxu1  ;;  %v9813_v57 = vadd.f32 %v13043_v50, %v11634_v9 }
0x2169   :  { %v9808_v12 = vadd.f32 %v11634_v9, %v9807_v58  ;;  %10119 = vadd.xlane.f32.xlu0 %v10118_v61  ;;  %10116 = vadd.xlane.f32.xlu1 %v10115_v39 }
0x216b   :  { %13056 = vmatpush3.xpose.msk.msra.mxu1 %vm361_vm2, %v9808_v12 }
0x216c   :  { %13060 = vmatprep.subr.mxu1 %v13856_v22 }
0x216d   :  { %10122 = vadd.xlane.f32.xlu1 %v10121_v32 }
0x216e   :  { %13058 = vmatmul.mubr.msk.f32.vlgmr.msra.gmra.mrb[128].mxu1 %vm361_vm2, %v9728_v14 }
0x216f   :  { %13061 = vmatpush3.xpose.msk.msra.mxu1 %vm361_vm2, %v9813_v57  ;;  %13062 = vmatprep.mubr.msk.f32.mxu1 %vm13857_vm1, %v13856_v22 }
0x2170   :  { %13070 = vmatprep.subr.mxu1 %v13856_v22 }
0x2172   :  { %13063 = vmatmul.mubr.msk.f32.vlgmr.msra.gmra.mrb[130].mxu1 %vm361_vm2, %v9733_v42 }
0x2173   :  { %13071 = vmatpush3.msra.mxu1 %v14712_v17  ;;  %13072 = vmatprep.mubr.msk.f32.mxu1 %vm13857_vm1, %v13856_v22 }
0x2174   :  { %13080 = vmatprep.subr.mxu1 %v13856_v22 }
0x21ee   :  { %v10078_v38 = vpop.xlane.xlu0 %10077 }
0x21ef   :  { %v10092_v11 = vsub.f32 %v10060_v10, %v10078_v38 }
0x21f1   :  { %v10104_v43 = vmul.f32 1.442695, %v10092_v11 }
0x21f2   :  { %v10114_v46 = vpop.xlane.xlu0 %10113  ;;  %v10081_v31 = vpop.xlane.xlu1 %10080 }
0x21f3   :  { %13742 = vpow2.f32 %v10104_v43  ;;  %v10093_v56 = vsub.f32 %v10061_v51, %v10081_v31  ;;  %v10298_v51 = vld [vmem:[#allocation2 + $0x6c0] sm:$0xff] }
0x21f4   :  { %13744 = vrcp.f32 %v10114_v46 }
0x21f5   :  { %v10106_v37 = vmul.f32 1.442695, %v10093_v56 }
0x21f6   :  { %v10120_v5 = vpop.xlane.xlu0 %10119  ;;  %v10117_v8 = vpop.xlane.xlu1 %10116 }
0x21f7   :  { %13746 = vpow2.f32 %v10106_v37  ;;  %v10754_v37 = vld [vmem:[#allocation2 + $0x6d0] sm:$0xff] }
0x21f8   :  { %13748 = vrcp.f32 %v10120_v5 }
0x21f9   :  { %13750 = vrcp.f32 %v10117_v8 }
0x21fa   :  { %v10123_v17 = vpop.xlane.xlu1 %10122 }
0x21fb   :  { %13752 = vrcp.f32 %v10123_v17 }
0x21fd   :  { %v13743_v44 = vpop.eup %13742 }
0x21fe   :  { %v13745_v29 = vpop.eup %13744  ;;  %v10124_v28 = vsel %vm361_vm2, %v13743_v44, 0.0 }
0x21ff   :  { %v10137_v33 = vmul.f32 %v13745_v29, %v13735_v3  ;;  %10125 = vadd.xlane.f32.xlu0 %v10124_v28  ;;  %v10445_v3 = vld [vmem:[#allocation2 + $0x6c8] sm:$0xff] }
0x2201   :  { %v13747_v59 = vpop.eup %13746  ;;  %13068 = vmatmul.mubr.msk.f32.vlgmr.msra.gmra.mrb[86].mxu0 %vm361_vm2, %v10137_v33 }
0x2202   :  { %v13749_v25 = vpop.eup %13748  ;;  %13076 = vmatpush3.msra.mxu0 %v9080_v19  ;;  %13077 = vmatprep.mubr.msk.f32.mxu0 %vm13857_vm1, %v13856_v22  ;;  %v10127_v30 = vsel %vm361_vm2, %v13747_v59, 0.0 }
0x2203   :  { %v13751_v2 = vpop.eup %13750  ;;  %v10141_v1 = vmul.f32 %v13749_v25, %v13739_v54  ;;  %10128 = vadd.xlane.f32.xlu1 %v10127_v30  ;;  %13085 = vmatprep.subr.mxu0 %v10445_v3  ;;  %v10984_v25 = vld [vmem:[#allocation2 + $0x6d8] sm:$0xff] }
0x2204   :  { %v10139_v47 = vmul.f32 %v13751_v2, %v14818_v7 }
0x2205   :  { %v13753_v20 = vpop.eup %13752  ;;  %13078 = vmatmul.mubr.msk.f32.vlgmr.msra.gmra.mrb[88].mxu0 %vm361_vm2, %v10141_v1 }
0x2206   :  { %v10143_v63 = vmul.f32 %v13753_v20, %v13741_v40  ;;  %13073 = vmatmul.mubr.msk.f32.vlgmr.msra.gmra.mrb[132].mxu1 %vm361_vm2, %v10139_v47  ;;  %13086 = vmatpush3.msra.mxu0 %v10445_v3  ;;  %v11119_v3 = vld [vmem:[#allocation2 + $0x6f0] sm:$0xff] }
0x2207   :  { %13081 = vmatpush3.msra.mxu1 %v9085_v15  ;;  %13082 = vmatprep.mubr.msk.f32.mxu1 %vm13857_vm1, %v13856_v22 }
0x2208   :  { %13095 = vmatprep.subr.mxu1 %v13856_v22  ;;  %13090 = vmatprep.subr.mxu0 %v10298_v51 }
0x220a   :  { %13083 = vmatmul.mubr.msk.f32.vlgmr.msra.gmra.mrb[134].mxu1 %vm361_vm2, %v10143_v63 }
0x220b   :  { %13096 = vmatpush3.msra.mxu1 %v9484_v48  ;;  %13097 = vmatprep.mubr.msk.f32.mxu1 %vm13857_vm1, %v13856_v22 }
0x220c   :  { %13100 = vmatprep.subr.mxu1 %v13856_v22 }
0x2241   :  { %v9968_v0 = vpop.f32.mrb[128].mxu1 }
0x2242   :  { %v10054_v52 = vmul.f32 0.35355338, %v9968_v0  ;;  %v13059_v18 = vpop.f32.mrb[129].mxu1 }
0x2244   :  { %v10062_v10 = vadd.f32 %v14757_v13, %v10054_v52 }
0x2245   :  { %v10044_v16 = vpop.f32.mrb[130].mxu1 }
0x2246   :  { %v10055_v34 = vmul.f32 0.35355338, %v10044_v16  ;;  %v13064_v36 = vpop.f32.mrb[131].mxu1  ;;  %v10082_v23 = vsel %vm361_vm2, %v10062_v10, -inf }
0x2247   :  { %10083 = vmax.xlane.f32.xlu0 %v10082_v23 }
0x2248   :  { %v10063_v49 = vadd.f32 %v14749_v4, %v10055_v34  ;;  %v9888_v4 = vadd.f32 %v11637_v60, %v9887_v6 }
0x224a   :  { %v10085_v45 = vsel %vm361_vm2, %v10063_v49, -inf }
0x224b   :  { %10086 = vmax.xlane.f32.xlu1 %v10085_v45  ;;  %v11118_v45 = vld [vmem:[#allocation2 + $0x6e8] sm:$0xff] }
0x228c   :  { %v10126_v7 = vpop.xlane.xlu0 %10125 }
0x228d   :  { %13754 = vrcp.f32 %v10126_v7  ;;  %v11120_v7 = vld [vmem:[#allocation2 + $0x6f8] sm:$0xff] }
0x2290   :  { %v10129_v24 = vpop.xlane.xlu1 %10128 }
0x2291   :  { %13756 = vrcp.f32 %v10129_v24  ;;  %v13567_v24 = vpack.c.bf16 %v11120_v7, %v11119_v3  ;;  %v11669_v3 = vld [vmem:[#allocation5 + $0x44] ss:$0 sm:$0xff] }
0x2297   :  { %v13755_v13 = vpop.eup %13754 }
0x2298   :  { %v10145_v26 = vmul.f32 %v13755_v13, %v13743_v44  ;;  %v11209_v13 = vld [vmem:[#allocation2 + $0x700] sm:$0xff] }
0x229a   :  { %13098 = vmatmul.mubr.msk.f32.vlgmr.msra.gmra.mrb[136].mxu1 %vm361_vm2, %v10145_v26  ;;  %v11210_v26 = vld [vmem:[#allocation2 + $0x708] sm:$0xff] }
0x229b   :  { %v13757_v54 = vpop.eup %13756  ;;  %13101 = vmatpush3.msra.mxu1 %v14787_v35  ;;  %13102 = vmatprep.mubr.msk.f32.mxu1 %vm13857_vm1, %v13856_v22 }
0x229c   :  { %v10147_v9 = vmul.f32 %v13757_v54, %v13747_v59  ;;  %13110 = vmatprep.subr.mxu1 %v13856_v22  ;;  %v11211_v54 = vld [vmem:[#allocation2 + $0x710] sm:$0xff] }
0x229e   :  { %13103 = vmatmul.mubr.msk.f32.vlgmr.msra.gmra.mrb[138].mxu1 %vm361_vm2, %v10147_v9  ;;  %v11212_v9 = vld [vmem:[#allocation2 + $0x718] sm:$0xff] }
0x229f   :  { %13111 = vmatpush3.msra.mxu1 %v9888_v4  ;;  %13112 = vmatprep.mubr.msk.f32.mxu1 %vm13857_vm1, %v13856_v22  ;;  %v13571_v4 = vpack.c.bf16 %v11210_v26, %v11209_v13  ;;  %v11670_v13 = vld [vmem:[#allocation5 + $0x45] ss:$0 sm:$0xff] }
0x22d4   :  { %v10221_v50 = vpop.f32.mrb[86].mxu0  ;;  %v10084_v58 = vpop.xlane.xlu0 %10083 }
0x22d5   :  { %v13069_v61 = vpop.f32.mrb[87].mxu0  ;;  %v10094_v39 = vsub.f32 %v10062_v10, %v10084_v58  ;;  %v11213_v58 = vld [vmem:[#allocation2 + $0x720] sm:$0xff] }
0x22d6   :  { %v11214_v61 = vld [vmem:[#allocation2 + $0x728] sm:$0xff] }
0x22d7   :  { %v10108_v40 = vmul.f32 1.442695, %v10094_v39  ;;  %v13579_v39 = vpack.c.bf16 %v11214_v61, %v11213_v58 }
0x22d8   :  { %v10368_v41 = vpop.f32.mrb[88].mxu0  ;;  %v10087_v35 = vpop.xlane.xlu1 %10086 }
0x22d9   :  { %13758 = vpow2.f32 %v10108_v40  ;;  %v10294_v12 = vpop.f32.mrb[132].mxu1  ;;  %v13079_v14 = vpop.f32.mrb[89].mxu0  ;;  %13087 = vmatprep.mubr.msk.f32.mxu0 %vm361_vm2, %v10368_v41  ;;  %v10095_v32 = vsub.f32 %v10063_v49, %v10087_v35  ;;  %v11117_v49 = vld [vmem:[#allocation2 + $0x6e0] sm:$0xff] }
0x22da   :  { %v13074_v57 = vpop.f32.mrb[133].mxu1 }
0x22db   :  { %v10110_v42 = vmul.f32 1.442695, %v10095_v32  ;;  %v11661_v57 = vld [vmem:[#allocation5 + $0x42] ss:$0 sm:$0xff] }
0x22dd   :  { %13760 = vpow2.f32 %v10110_v42  ;;  %v10441_v38 = vpop.f32.mrb[134].mxu1 }
0x22de   :  { %v13084_v11 = vpop.f32.mrb[135].mxu1  ;;  %13088 = vmatmul.mubr.msk.f32.vlgmr.msra.gmra.mrb[90].mxu0 %vm361_vm2, %v10441_v38 }
0x22df   :  { %13092 = vmatprep.mubr.msk.f32.mxu0 %vm361_vm2, %v10221_v50  ;;  %13091 = vmatpush3.msra.mxu0 %v10298_v51  ;;  %v13563_v51 = vpack.c.bf16 %v11118_v45, %v11117_v49  ;;  %v13575_v50 = vpack.c.bf16 %v11212_v9, %v11211_v54 }
0x22e0   :  { %13105 = vmatprep.subr.mxu0 %v10754_v37 }
0x22e1   :  { %13564 = vmatprep.subr.bf16.mxu1 %v13563_v51 }
0x22e3   :  { %v13759_v43 = vpop.eup %13758 }
0x22e4   :  { %v10130_v46 = vsel %vm361_vm2, %v13759_v43, 0.0 }
0x22e5   :  { %10131 = vadd.xlane.f32.xlu0 %v10130_v46  ;;  %v11662_v46 = vld [vmem:[#allocation5 + $0x43] ss:$0 sm:$0xff] }
0x22e6   :  { %13093 = vmatmul.mubr.msk.f32.vlgmr.msra.gmra.mrb[90].mxu0 %vm361_vm2, %v10294_v12 }
0x22e7   :  { %v13761_v31 = vpop.eup %13760  ;;  %13106 = vmatpush3.msra.mxu0 %v10754_v37 }
0x22e8   :  { %v10133_v56 = vsel %vm361_vm2, %v13761_v31, 0.0  ;;  %13115 = vmatprep.subr.mxu0 %v13856_v22 }
0x22e9   :  { %10134 = vadd.xlane.f32.xlu1 %v10133_v56 }
0x236d   :  { %v10677_v5 = vpop.f32.mrb[136].mxu1 }
0x236e   :  { %v13099_v8 = vpop.f32.mrb[137].mxu1  ;;  %13107 = vmatprep.mubr.msk.f32.mxu0 %vm361_vm2, %v10677_v5 }
0x236f   :  { %v11215_v8 = vld [vmem:[#allocation2 + $0x730] sm:$0xff] }
0x2371   :  { %v10750_v17 = vpop.f32.mrb[138].mxu1 }
0x2372   :  { %v10132_v44 = vpop.xlane.xlu0 %10131  ;;  %v13104_v55 = vpop.f32.mrb[139].mxu1  ;;  %13108 = vmatmul.mubr.msk.f32.vlgmr.msra.gmra.mrb[90].mxu0 %vm361_vm2, %v10750_v17  ;;  %v11216_v17 = vld [vmem:[#allocation2 + $0x738] sm:$0xff] }
0x2373   :  { %13762 = vrcp.f32 %v10132_v44  ;;  %13116 = vmatpush3.msra.mxu0 %v14859_v21  ;;  %13117 = vmatprep.mubr.msk.f32.mxu0 %vm13857_vm1, %v13856_v22  ;;  %v11660_v22 = vld [vmem:[#allocation5 + $0x3b] ss:$0 sm:$0xff]  ;;  %v13583_v44 = vpack.c.bf16 %v11216_v17, %v11215_v8  ;;  %v11663_v55 = vld [vmem:[#allocation5 + $0x3c] ss:$0 sm:$0xff] }
0x2374   :  { %13120 = vmatprep.subr.mxu0 %v10984_v25 }
0x2376   :  { %v10135_v29 = vpop.xlane.xlu1 %10134 }
0x2377   :  { %13764 = vrcp.f32 %v10135_v29 }
0x237d   :  { %v13763_v28 = vpop.eup %13762 }
0x237e   :  { %v10149_v33 = vmul.f32 %v13763_v28, %v13759_v43 }
0x2380   :  { %13113 = vmatmul.mubr.msk.f32.vlgmr.msra.gmra.mrb[140].mxu1 %vm361_vm2, %v10149_v33 }
0x2381   :  { %v13765_v19 = vpop.eup %13764  ;;  %13566 = vmatpush3.bf16.msra.mxu1 %v13563_v51 }
0x2382   :  { %v10151_v59 = vmul.f32 %v13765_v19, %v13761_v31  ;;  %13568 = vmatprep.subr.bf16.mxu1 %v13567_v24 }
0x2384   :  { %13118 = vmatmul.mubr.msk.f32.vlgmr.msra.gmra.mrb[92].mxu0 %vm361_vm2, %v10151_v59 }
0x2385   :  { %13121 = vmatpush3.msra.mxu0 %v10984_v25  ;;  %13570 = vmatpush3.bf16.msra.mxu1 %v13567_v24 }
0x2386   :  { %13572 = vmatprep.subr.bf16.mxu0 %v13571_v4 }
0x2453   :  { %v10907_v30 = vpop.f32.mrb[140].mxu1 }
0x2454   :  { %v13114_v2 = vpop.f32.mrb[141].mxu1  ;;  %13122 = vmatprep.mubr.msk.f32.mxu0 %vm361_vm2, %v10907_v30 }
0x2455   :  { %v11668_v2 = vld [vmem:[#allocation5 + $0x3d] ss:$0 sm:$0xff] }
0x2457   :  { %v10980_v1 = vpop.f32.mrb[92].mxu0 }
0x2458   :  { %v13119_v47 = vpop.f32.mrb[93].mxu0  ;;  %13123 = vmatmul.mubr.msk.f32.vlgmr.msra.gmra.mrb[90].mxu0 %vm361_vm2, %v10980_v1 }
0x2459   :  { %13574 = vmatpush3.bf16.msra.mxu0 %v13571_v4 }
0x245a   :  { %13576 = vmatprep.subr.bf16.mxu0 %v13575_v50 }
0x245d   :  { %13578 = vmatpush3.bf16.msra.mxu0 %v13575_v50 }
0x245e   :  { %13580 = vmatprep.subr.bf16.mxu0 %v13579_v39 }
0x2461   :  { %13582 = vmatpush3.bf16.msra.mxu0 %v13579_v39 }
0x2462   :  { %13584 = vmatprep.subr.bf16.mxu0 %v13583_v44 }
0x2465   :  { %13586 = vmatpush3.bf16.msra.mxu0 %v13583_v44 }
0x252b   :  { %v13124_v20 = vpop.f32.mrb[90].mxu0 }
0x252c   :  { %v11074_v15 = vadd.f32 %v13124_v20, %v11660_v22  ;;  %v11057_v63 = vpop.f32.mrb[91].mxu0 }
0x252d   :  { %v11073_v48 = vadd.f32 %v11660_v22, %v11057_v63 }
0x252e   :  { %v14890_v27 = vadd.f32 %v11074_v15, %v14663_v53 }
0x252f   :  { %v14893_v60 = vadd.f32 %v11073_v48, %v14666_v62 }
0x2530   :  { %v11082_v21 = vsel %vm62_vm0, %v14890_v27, 0.0 }
0x2531   :  { %11083 = vadd.xlane.f32.xlu1 %v11082_v21  ;;  %v11079_v6 = vsel %vm62_vm0, %v14893_v60, 0.0 }
0x2532   :  { %11080 = vadd.xlane.f32.xlu0 %v11079_v6 }
0x25be   :  { %v11084_v0 = vpop.xlane.xlu1 %11083 }
0x25bf   :  { %v11086_v52 = vmul.f32 0.03125, %v11084_v0  ;;  %v11081_v18 = vpop.xlane.xlu0 %11080 }
0x25c0   :  { %v11085_v10 = vmul.f32 0.03125, %v11081_v18 }
0x25c1   :  { %v11088_v16 = vsub.f32 %v14890_v27, %v11086_v52 }
0x25c2   :  { %v11087_v53 = vsub.f32 %v14893_v60, %v11085_v10 }
0x25c3   :  { %v11090_v34 = vmul.f32 %v11088_v16, %v11088_v16  ;;  %v11104_v42 = vmul.f32 %v11661_v57, %v11088_v16 }
0x25c4   :  { %v11089_v36 = vmul.f32 %v11087_v53, %v11087_v53  ;;  %v11103_v11 = vmul.f32 %v11661_v57, %v11087_v53 }
0x25c5   :  { %v11094_v62 = vsel %vm62_vm0, %v11090_v34, 0.0 }
0x25c6   :  { %11095 = vadd.xlane.f32.xlu1 %v11094_v62  ;;  %v11091_v23 = vsel %vm62_vm0, %v11089_v36, 0.0 }
0x25c7   :  { %11092 = vadd.xlane.f32.xlu0 %v11091_v23 }
0x2653   :  { %v11096_v40 = vpop.xlane.xlu1 %11095 }
0x2654   :  { %v11098_v41 = vmul.f32 0.032258064, %v11096_v40  ;;  %v11093_v35 = vpop.xlane.xlu0 %11092 }
0x2655   :  { %v11097_v12 = vmul.f32 0.032258064, %v11093_v35 }
0x2656   :  { %v11106_v14 = vadd.f32 1e-06, %v11098_v41 }
0x2657   :  { %v11105_v32 = vadd.f32 1e-06, %v11097_v12 }
0x2658   :  { %13766 = vrsqrt.f32 %v11106_v14 }
0x2659   :  { %13768 = vrsqrt.f32 %v11105_v32 }
0x2662   :  { %v13767_v38 = vpop.eup %13766 }
0x2663   :  { %v13769_v43 = vpop.eup %13768  ;;  %v11110_v31 = vmul.f32 %v13767_v38, %v11104_v42 }
0x2664   :  { %v11109_v56 = vmul.f32 %v13769_v43, %v11103_v11 }
0x2665   :  { %v11116_v5 = vadd.f32 %v11662_v46, %v11110_v31 }
0x2666   :  { %v11115_v37 = vadd.f32 %v11662_v46, %v11109_v56 }
0x2668   :  { %13133 = vmatprep.mubr.msk.f32.mxu1 %vm62_vm0, %v11115_v37 }
0x2669   :  { %13134 = vmatmul.mubr.msk.f32.vlgmr.msra.gmra.mrb[142].mxu1 %vm62_vm0, %v11116_v5 }
0x273c   :  { %v13135_v29 = vpop.f32.mrb[142].mxu1 }
0x273d   :  { %v11204_v28 = vadd.f32 %v13135_v29, %v11663_v55  ;;  %v11198_v33 = vpop.f32.mrb[143].mxu1 }
0x273e   :  { %v11199_v19 = vadd.f32 %v11663_v55, %v11198_v33 }
0x273f   :  { %v11208_v25 = vmax.f32 %v11204_v28, 0.0 }
0x2740   :  { %v11207_v59 = vmax.f32 %v11199_v19, 0.0 }
0x2742   :  { %13152 = vmatprep.mubr.msk.f32.mxu0 %vm5604_vm3, %v11207_v59 }
0x2743   :  { %13153 = vmatmul.mubr.msk.f32.vlgmr.msra.gmra.mrb[94].mxu0 %vm5604_vm3, %v11208_v25 }
0x2816   :  { %v13154_v30 = vpop.f32.mrb[94].mxu0 }
0x2817   :  { %v11299_v1 = vadd.f32 %v13154_v30, %v14890_v27  ;;  %v11289_v47 = vpop.f32.mrb[95].mxu0 }
0x2818   :  { %v11298_v22 = vadd.f32 %v11289_v47, %v14893_v60 }
0x2819   :  { %v11306_v20 = vadd.f32 %v11668_v2, %v11299_v1 }
0x281a   :  { %v11305_v15 = vadd.f32 %v11668_v2, %v11298_v22 }
0x281b   :  { %v11312_v63 = vsel %vm62_vm0, %v11306_v20, 0.0 }
0x281c   :  { %11313 = vadd.xlane.f32.xlu1 %v11312_v63  ;;  %v11309_v48 = vsel %vm62_vm0, %v11305_v15, 0.0 }
0x281d   :  { %11310 = vadd.xlane.f32.xlu0 %v11309_v48 }
0x28a9   :  { %v11314_v21 = vpop.xlane.xlu1 %11313 }
0x28aa   :  { %v11316_v6 = vmul.f32 0.03125, %v11314_v21  ;;  %v11311_v0 = vpop.xlane.xlu0 %11310 }
0x28ab   :  { %v11315_v52 = vmul.f32 0.03125, %v11311_v0 }
0x28ac   :  { %v11318_v18 = vsub.f32 %v11306_v20, %v11316_v6 }
0x28ad   :  { %v11317_v10 = vsub.f32 %v11305_v15, %v11315_v52 }
0x28ae   :  { %v11320_v16 = vmul.f32 %v11318_v18, %v11318_v18  ;;  %v11334_v51 = vmul.f32 %v11669_v3, %v11318_v18 }
0x28af   :  { %v11319_v53 = vmul.f32 %v11317_v10, %v11317_v10  ;;  %v11333_v24 = vmul.f32 %v11669_v3, %v11317_v10 }
0x28b0   :  { %v11324_v27 = vsel %vm62_vm0, %v11320_v16, 0.0 }
0x28b1   :  { %11325 = vadd.xlane.f32.xlu1 %v11324_v27  ;;  %v11321_v60 = vsel %vm62_vm0, %v11319_v53, 0.0 }
0x28b2   :  { %11322 = vadd.xlane.f32.xlu0 %v11321_v60 }
0x293e   :  { %v11326_v34 = vpop.xlane.xlu1 %11325 }
0x293f   :  { %v11328_v36 = vmul.f32 0.032258064, %v11326_v34  ;;  %v11323_v62 = vpop.xlane.xlu0 %11322 }
0x2940   :  { %v11327_v23 = vmul.f32 0.032258064, %v11323_v62 }
0x2941   :  { %v11336_v49 = vadd.f32 1e-06, %v11328_v36 }
0x2942   :  { %v11335_v45 = vadd.f32 1e-06, %v11327_v23 }
0x2943   :  { %13770 = vrsqrt.f32 %v11336_v49 }
0x2944   :  { %13772 = vrsqrt.f32 %v11335_v45 }
0x294d   :  { %v13771_v7 = vpop.eup %13770 }
0x294e   :  { %v13773_v26 = vpop.eup %13772  ;;  %v11340_v54 = vmul.f32 %v13771_v7, %v11334_v51 }
0x294f   :  { %v11339_v4 = vmul.f32 %v13773_v26, %v11333_v24 }
0x2950   :  { %v11346_v9 = vadd.f32 %v11670_v13, %v11340_v54 }
0x2951   :  { %v11345_v50 = vadd.f32 %v11670_v13, %v11339_v4 }
0x2952   :  { %11348 = vst.msk [vmem:[#allocation7 + $0x8] sm:$0xff] %vm62_vm0, %v11346_v9 }
0x2953   :  { %11347 = vst.msk [vmem:[#allocation7] sm:$0xff] %vm62_vm0, %v11345_v50 }
0x2954   :  { %13835 = shalt.err (!%p13832_p6)
}
0x2955   :  { %s13836_s5 = scalar_lea.hbm %s14936_s6, 256 }
0x2956   :  { %p13837_p7 = scmp.ne.s32.totalorder %s14936_s6, %s13836_s5  ;;  %p13840_p8 = scmp.lt.u32.totalorder %s13836_s5, %s14936_s6 }
0x2958   :  { %p13842_p9 = pnand %p13840_p8, %p13837_p7 }
0x295a   :  { %13845 = shalt.err (!%p13842_p9)
}
0x295b   :  { %11360 = dma.vmem_to_hbm [thread:$0]  %s11355_s23, 256, %s14936_s6, [#allocation4], %s13853_s7, %s13853_s7, %s13854_s8  }
0x295c   :  { %13850 = dma.done.wait [#allocation4], 256  }
0x295d   :  { %13851 = vsyncadd [#allocation4], 4294967040 }
0x295e   :  { %11364 = vsyncpa [#allocation3], 1 }
0x295f   :  { %11365 = vsyncpa [#allocation6], 1 }
0x2960   :  { %11366 = vsyncpa [#allocation4], 1 }

</bundles_post_ra>
